<compile_context>
chip_gen: v5e
topology: v5e:2x2
jax: 0.10.0
libtpu: 0.0.40
codegen_flags: <defaults>
</compile_context>

<pallas_src>
import functools

import jax
import jax.numpy as jnp
from jax import lax
from jax.experimental import pallas as pl
from jax.experimental.pallas import tpu as pltpu

NEG_INF = -1e30
BN_EPS = 1e-5
LEAKY_SLOPE = 0.2


def _round_up(v, m):
    return ((v + m - 1) // m) * m


def _vmem_limit_bytes():
    # Generation-aware scoped-VMEM limit: ~7/8 of physical VMEM, capped at
    # 112 MiB (v5e/v6e: 128 MiB physical, v7x: 64 MiB). Falls back to 56 MiB
    # when no TPU info is available (e.g. interpret mode on CPU).
    try:
        cap = int(getattr(pltpu.get_tpu_info(), "vmem_capacity_bytes", 0))
    except Exception:
        cap = 0
    if cap <= 0:
        cap = 64 * 1024 * 1024
    return int(min(cap * 7 // 8, 112 * 1024 * 1024))


# ---------------------------------------------------------------------------
# Shared per-edge-block body (grid axis 0 iterates edge tiles, "arbitrary")
# ---------------------------------------------------------------------------
def _gat_edge_block(x_ref, ee_ref, src_ref, dst_ref, dstr_ref,
                    Wlr_ref, blr_ref, vec_ref,
                    xl_s, xr_s, gmax_sm, acc_s):
    e_blk = pl.program_id(0)
    N = x_ref.shape[0]
    C = xl_s.shape[1]
    tE = ee_ref.shape[0]

    @pl.when(e_blk == 0)
    def _init():
        # fused lin_l | lin_r : one [N, in] @ [in, 2C] pass, done once
        xlr = jnp.dot(x_ref[...], Wlr_ref[...],
                      preferred_element_type=jnp.float32) + blr_ref[...]
        xl_s[...] = xlr[:, :C]
        xr_s[...] = xlr[:, C:]
        gmax_sm[0] = jnp.float32(NEG_INF)
        acc_s[...] = jnp.zeros_like(acc_s)

    att = vec_ref[0:1, :]                                  # [1, C]

    src_col = src_ref[...]                                 # [tE, 1] int32 (-1 pad)
    dst_col = dst_ref[...]                                 # [tE, 1] int32
    dst_row = dstr_ref[...]                                # [1, tE] int32
    lane_nodes = lax.broadcasted_iota(jnp.int32, (tE, N), 1)
    sub_nodes = lax.broadcasted_iota(jnp.int32, (N, tE), 0)
    # single compare + cast (no double cast); exact 0/1 values
    src_oh = (src_col == lane_nodes).astype(jnp.float32)   # [tE, N] gather
    dst_oh = (dst_col == lane_nodes).astype(jnp.float32)   # [tE, N] gather
    dst_ohT = (dst_row == sub_nodes).astype(jnp.float32)   # [N, tE] scatter
    valid = dst_col >= 0                                   # [tE, 1] real-edge mask

    # gather node transforms to edges; edge transform was precomputed (ee_ref)
    el = jnp.dot(src_oh, xl_s[...], preferred_element_type=jnp.float32)  # [tE,C]
    er = jnp.dot(dst_oh, xr_s[...], preferred_element_type=jnp.float32)  # [tE,C]
    s = el + er + ee_ref[...]
    s = jnp.where(s > 0, s, LEAKY_SLOPE * s)               # leaky_relu(0.2)
    logits = jnp.sum(s * att, axis=-1, keepdims=True)      # [tE, 1]

    # online softmax with a running GLOBAL shift (shift-invariant => same
    # result as PyG's per-segment max; only the guarded range is smaller).
    blk_max = jnp.max(jnp.where(valid, logits, NEG_INF))   # scalar
    g_old = gmax_sm[0]
    g_new = jnp.maximum(g_old, blk_max)

    @pl.when(blk_max > g_old)
    def _rescale():
        # skipped entirely on blocks where the running max did not grow
        r = jnp.exp(jnp.full((1, 1), g_old - g_new, jnp.float32))
        acc_s[...] = acc_s[...] * r
        gmax_sm[0] = g_new

    p = jnp.where(valid, jnp.exp(logits - g_new), 0.0)      # [tE, 1]
    # fused scatter: weighted messages AND softmax denominator in ONE matmul
    pw = jnp.concatenate([p * el, p], axis=1)               # [tE, C+1]
    acc_s[...] = acc_s[...] + jnp.dot(dst_ohT, pw,
                                      preferred_element_type=jnp.float32)


def _gat_finalize(acc_s, vec_ref):
    # acc_s: [N, C+1] (cols 0..C-1 = weighted sum, col C = softmax denominator)
    C = vec_ref.shape[1]
    a = acc_s[...]
    acc = a[:, :C]
    denom = a[:, C:]
    scale = vec_ref[1:2, :]      # gamma / sqrt(rvar + eps)
    shift = vec_ref[2:3, :]      # beta + (conv_bias - rmean) * scale
    # exact division (no approx reciprocal); guard isolated / underflowed nodes
    h = acc / jnp.maximum(denom, 1e-20)
    h = h * scale + shift        # conv bias + BatchNorm1d (inference), folded
    return jnp.maximum(h, 0.0)   # ReLU


def gat_layer_kernel(x_ref, ee_ref, src_ref, dst_ref, dstr_ref,
                     Wlr_ref, blr_ref, vec_ref,
                     h_ref,
                     xl_s, xr_s, gmax_sm, acc_s):
    _gat_edge_block(x_ref, ee_ref, src_ref, dst_ref, dstr_ref,
                    Wlr_ref, blr_ref, vec_ref, xl_s, xr_s, gmax_sm, acc_s)

    @pl.when(pl.program_id(0) == pl.num_programs(0) - 1)
    def _finalize():
        h_ref[...] = _gat_finalize(acc_s, vec_ref)


def gat_layer_head_kernel(x_ref, ee_ref, src_ref, dst_ref, dstr_ref,
                          Wlr_ref, blr_ref, vec_ref,
                          pool_ref, Wf1_ref, bf1_ref, Wf2_ref, bf2_ref,
                          out_ref,
                          xl_s, xr_s, gmax_sm, acc_s):
    _gat_edge_block(x_ref, ee_ref, src_ref, dst_ref, dstr_ref,
                    Wlr_ref, blr_ref, vec_ref, xl_s, xr_s, gmax_sm, acc_s)

    @pl.when(pl.program_id(0) == pl.num_programs(0) - 1)
    def _finalize():
        h = _gat_finalize(acc_s, vec_ref)                       # [N, C]
        # global_mean_pool + fc1 + ReLU + fc2 fused into the finalize
        pooled = jnp.dot(pool_ref[...], h,
                         preferred_element_type=jnp.float32)    # [G, C]
        z = jnp.dot(pooled, Wf1_ref[...],
                    preferred_element_type=jnp.float32) + bf1_ref[...]
        z = jnp.maximum(z, 0.0)
        out_ref[...] = jnp.dot(z, Wf2_ref[...],
                               preferred_element_type=jnp.float32) + bf2_ref[...]


# ---------------------------------------------------------------------------
# pallas_call wrapper for one GAT layer (optionally with the fused head)
# ---------------------------------------------------------------------------
def _run_gat(x, ee, src_col, dst_col, dst_row, Wlr, blr, vec, *, tE, head=None):
    N, in_dim = x.shape
    C2 = Wlr.shape[1]
    C = C2 // 2
    E_pad = ee.shape[0]
    n_blocks = E_pad // tE

    cst = lambda e: (0, 0)   # resident block (single DMA, persists across steps)
    in_specs = [
        pl.BlockSpec((N, in_dim), cst),                   # node features
        pl.BlockSpec((tE, C), lambda e: (e, 0)),          # precomputed lin_edge
        pl.BlockSpec((tE, 1), lambda e: (e, 0)),          # src ids (column)
        pl.BlockSpec((tE, 1), lambda e: (e, 0)),          # dst ids (column)
        pl.BlockSpec((1, tE), lambda e: (0, e)),          # dst ids (row)
        pl.BlockSpec((in_dim, C2), cst),                  # fused lin_l|lin_r W
        pl.BlockSpec((1, C2), cst),                       # fused lin bias
        pl.BlockSpec((3, C), cst),                        # packed att|scale|shift
    ]
    inputs = [x, ee, src_col, dst_col, dst_row, Wlr, blr, vec]
    scratch = [
        pltpu.VMEM((N, C), jnp.float32),                  # lin_l(x)
        pltpu.VMEM((N, C), jnp.float32),                  # lin_r(x)
        pltpu.SMEM((1,), jnp.float32),                    # running global max
        pltpu.VMEM((N, C + 1), jnp.float32),              # weighted acc | denom
    ]

    if head is None:
        kernel = gat_layer_kernel
        out_shape = jax.ShapeDtypeStruct((N, C), jnp.float32)
        out_spec = pl.BlockSpec((N, C), cst)
    else:
        pool, Wf1, bf1, Wf2, bf2 = head
        G = pool.shape[0]
        H = Wf1.shape[1]
        O = Wf2.shape[1]
        kernel = gat_layer_head_kernel
        inputs += [pool, Wf1, bf1, Wf2, bf2]
        in_specs += [
            pl.BlockSpec((G, N), cst),                    # mean-pool matrix
            pl.BlockSpec((C, H), cst),                    # fc1 W
            pl.BlockSpec((1, H), cst),                    # fc1 b
            pl.BlockSpec((H, O), cst),                    # fc2 W
            pl.BlockSpec((1, O), cst),                    # fc2 b
        ]
        out_shape = jax.ShapeDtypeStruct((G, O), jnp.float32)
        out_spec = pl.BlockSpec((G, O), cst)

    grid_spec = pltpu.PrefetchScalarGridSpec(
        num_scalar_prefetch=0,
        grid=(n_blocks,),
        in_specs=in_specs,
        out_specs=out_spec,
        scratch_shapes=scratch,
    )
    return pl.pallas_call(
        kernel,
        out_shape=out_shape,
        grid_spec=grid_spec,
        compiler_params=pltpu.CompilerParams(
            dimension_semantics=("arbitrary",),            # edge axis = reduction
            vmem_limit_bytes=_vmem_limit_bytes()),
    )(*inputs)


# ---------------------------------------------------------------------------
# Forward pass (glue: self-loops, padding, lin_edge, BN folding, pooling)
# ---------------------------------------------------------------------------
@functools.partial(jax.jit, static_argnames=("num_graphs", "edge_block"))
def energy_gnn_forward(x, edge_index, edge_attr, batch, params, num_graphs,
                       edge_block=512):
    assert edge_block % 128 == 0
    N = x.shape[0]
    src = edge_index[0].astype(jnp.int32)
    dst = edge_index[1].astype(jnp.int32)
    E0 = src.shape[0]

    # add_self_loops with fill_value='mean' (per-target mean of incoming attrs)
    ea_f = edge_attr.astype(jnp.float32)
    sums = jax.ops.segment_sum(ea_f, dst, num_segments=N)
    cnts = jax.ops.segment_sum(jnp.ones((E0,), jnp.float32), dst, num_segments=N)
    loop_attr = sums / jnp.maximum(cnts, 1.0)[:, None]
    node_ids = jnp.arange(N, dtype=jnp.int32)
    src_t = jnp.concatenate([src, node_ids])
    dst_t = jnp.concatenate([dst, node_ids])
    ea_t = jnp.concatenate([ea_f, loop_attr], axis=0)

    # pad edge list to a multiple of the edge tile; pad ids = -1 match no node
    E = E0 + N
    tE = min(edge_block, _round_up(E, 128))
    # keep the three [tE,N] f32 one-hot temporaries under ~12 MiB
    te_cap = max(128, ((12 * 1024 * 1024) // (12 * max(N, 1))) // 128 * 128)
    tE = min(tE, te_cap)
    E_pad = _round_up(E, tE)
    pad = E_pad - E
    src_p = jnp.concatenate([src_t, jnp.full((pad,), -1, jnp.int32)])
    dst_p = jnp.concatenate([dst_t, jnp.full((pad,), -1, jnp.int32)])
    ea_p = jnp.concatenate(
        [ea_t, jnp.zeros((pad, ea_t.shape[1]), jnp.float32)], axis=0)

    src_col = src_p[:, None]                  # [E_pad, 1]
    dst_col = dst_p[:, None]                  # [E_pad, 1]
    dst_row = dst_p[None, :]                  # [1, E_pad]

    (Wl1, bl1, Wr1, br1, We1, att1, bias1, g1, b1, rm1, rv1,
     Wl2, bl2, Wr2, br2, We2, att2, bias2, g2, b2, rm2, rv2,
     Wf1, bf1, Wf2, bf2) = params

    def prep(Wl, bl, Wr, br, We, att, bias, gamma, beta, rmean, rvar):
        Wlr = jnp.concatenate([Wl, Wr], axis=1)                 # [in, 2C]
        blr = jnp.concatenate([bl, br], axis=1)                 # [1, 2C]
        inv_std = 1.0 / jnp.sqrt(rvar + BN_EPS)
        scale = gamma * inv_std                                 # BN scale
        shift = beta + (bias - rmean) * scale                   # BN shift + conv bias
        vec = jnp.concatenate([att, scale, shift], axis=0)      # [3, C]
        ee = jnp.dot(ea_p, We)                                  # lin_edge, precomputed
        return Wlr, blr, vec, ee

    Wlr1, blr1, vec1, ee1 = prep(Wl1, bl1, Wr1, br1, We1, att1, bias1,
                                 g1, b1, rm1, rv1)
    Wlr2, blr2, vec2, ee2 = prep(Wl2, bl2, Wr2, br2, We2, att2, bias2,
                                 g2, b2, rm2, rv2)

    h1 = _run_gat(x.astype(jnp.float32), ee1, src_col, dst_col, dst_row,
                  Wlr1, blr1, vec1, tE=tE)
    # nn.Dropout(p=0.2) is identity in the eval-mode forward.

    # global_mean_pool matrix [G, N] (kept f32 for numerical parity)
    pool_oh = jax.nn.one_hot(batch, num_graphs, dtype=jnp.float32).T
    pool = pool_oh / jnp.maximum(jnp.sum(pool_oh, axis=1, keepdims=True), 1.0)

    # layer 2 + pooled MLP head fused into one pallas_call
    return _run_gat(h1, ee2, src_col, dst_col, dst_row, Wlr2, blr2, vec2,
                    tE=tE, head=(pool, Wf1, bf1, Wf2, bf2))


# ---------------------------------------------------------------------------
# Parameter init (mirrors the PyTorch module's parameter set, eval mode)
# ---------------------------------------------------------------------------
def init_params(key, input_dim, hidden_dim, output_dim, edge_dim, heads=1):
    assert heads == 1, "kernel implements the module default heads=1"
    C = hidden_dim * heads
    ks = list(jax.random.split(key, 10))

    def w(k, shape, scale=0.1):
        return (scale * jax.random.normal(k, shape)).astype(jnp.float32)

    def gat(kws, in_dim):
        k1, k2, k3, k4 = kws
        return [
            w(k1, (in_dim, C)), jnp.zeros((1, C), jnp.float32),   # lin_l W, b
            w(k2, (in_dim, C)), jnp.zeros((1, C), jnp.float32),   # lin_r W, b
            w(k3, (edge_dim, C)),                                 # lin_edge W (no bias)
            w(k4, (1, C)),                                        # att
            jnp.zeros((1, C), jnp.float32),                       # GAT output bias
            jnp.ones((1, C), jnp.float32),                        # BN gamma
            jnp.zeros((1, C), jnp.float32),                       # BN beta
            jnp.zeros((1, C), jnp.float32),                       # BN running_mean
            jnp.ones((1, C), jnp.float32),                        # BN running_var
        ]

    params = []
    params += gat(ks[0:4], input_dim)            # conv1 + norm1
    params += gat(ks[4:8], C)                    # conv2 + norm2
    params += [w(ks[8], (C, hidden_dim)), jnp.zeros((1, hidden_dim), jnp.float32)]
    params += [w(ks[9], (hidden_dim, output_dim)),
               jnp.zeros((1, output_dim), jnp.float32)]
    return tuple(params)


if __name__ == "__main__":
    key = jax.random.PRNGKey(0)
    k_x, k_e, k_p = jax.random.split(key, 3)

    # Small synthetic batch: 2 graphs x 8 nodes (bidirectional ring each).
    input_dim, hidden_dim, output_dim, edge_dim = 8, 32, 1, 4
    nodes_per_graph, num_graphs = 8, 2
    N = nodes_per_graph * num_graphs

    src_list, dst_list = [], []
    for g in range(num_graphs):
        base = g * nodes_per_graph
        for i in range(nodes_per_graph):
            a, b = base + i, base + (i + 1) % nodes_per_graph
            src_list += [a, b]
            dst_list += [b, a]
    edge_index = jnp.array([src_list, dst_list], dtype=jnp.int32)        # [2, 32]
    E = edge_index.shape[1]

    x = jax.random.normal(k_x, (N, input_dim), dtype=jnp.float32)        # [16, 8]
    edge_attr = jax.random.normal(k_e, (E, edge_dim), dtype=jnp.float32)  # [32, 4]
    batch = jnp.repeat(jnp.arange(num_graphs, dtype=jnp.int32), nodes_per_graph)

    params = init_params(k_p, input_dim, hidden_dim, output_dim, edge_dim, heads=1)

    out = energy_gnn_forward(x, edge_index, edge_attr, batch, params,
                             num_graphs=num_graphs)
    out = jax.block_until_ready(out)
    assert out.shape == (num_graphs, output_dim)
    assert bool(jnp.all(jnp.isfinite(out)))
    print("KERNEL_OK")
</pallas_src>

<mosaic_0001>
module attributes {stable_mosaic.version = 11 : i64} {
  func.func @gat_layer_kernel(%arg0: i32, %arg1: memref<16x8xf32, #tpu.memory_space<vmem>>, %arg2: memref<128x32xf32, #tpu.memory_space<vmem>>, %arg3: memref<128x1xi32, #tpu.memory_space<vmem>>, %arg4: memref<128x1xi32, #tpu.memory_space<vmem>>, %arg5: memref<1x128xi32, #tpu.memory_space<vmem>>, %arg6: memref<8x64xf32, #tpu.memory_space<vmem>>, %arg7: memref<1x64xf32, #tpu.memory_space<vmem>>, %arg8: memref<3x32xf32, #tpu.memory_space<vmem>>, %arg9: memref<16x32xf32, #tpu.memory_space<vmem>>, %arg10: memref<16x32xf32, #tpu.memory_space<vmem>>, %arg11: memref<16x32xf32, #tpu.memory_space<vmem>>, %arg12: memref<1xf32, #tpu.memory_space<smem>>, %arg13: memref<16x33xf32, #tpu.memory_space<vmem>>) attributes {dimension_semantics = [#tpu.dimension_semantics<arbitrary>], iteration_bounds = array<i64: 1>, scalar_prefetch = 0 : i64, scratch_operands = 4 : i64, tpu.core_type = #tpu.core_type<tc>, window_params = [{pipeline_mode = #tpu.pipeline_mode<synchronous>, transform_indices = @transform_0, window_bounds = array<i64: 16, 8>}, {transform_indices = @transform_1, window_bounds = array<i64: 128, 32>}, {transform_indices = @transform_2, window_bounds = array<i64: 128, 1>}, {transform_indices = @transform_3, window_bounds = array<i64: 128, 1>}, {transform_indices = @transform_4, window_bounds = array<i64: 1, 128>}, {pipeline_mode = #tpu.pipeline_mode<synchronous>, transform_indices = @transform_5, window_bounds = array<i64: 8, 64>}, {pipeline_mode = #tpu.pipeline_mode<synchronous>, transform_indices = @transform_6, window_bounds = array<i64: 1, 64>}, {pipeline_mode = #tpu.pipeline_mode<synchronous>, transform_indices = @transform_7, window_bounds = array<i64: 3, 32>}, {pipeline_mode = #tpu.pipeline_mode<synchronous>, transform_indices = @transform_8, window_bounds = array<i64: 16, 32>}]} {
    %c0_i32 = arith.constant 0 : i32
    %0 = arith.cmpi eq, %arg0, %c0_i32 : i32
    %1 = arith.extui %0 : i1 to i32
    %c0_i32_0 = arith.constant 0 : i32
    %2 = arith.cmpi ne, %1, %c0_i32_0 : i32
    scf.if %2 {
      %c0_31 = arith.constant 0 : index
      %c0_32 = arith.constant 0 : index
      %65 = vector.load %arg1[%c0_31, %c0_32] : memref<16x8xf32, #tpu.memory_space<vmem>>, vector<16x8xf32>
      %c0_33 = arith.constant 0 : index
      %c0_34 = arith.constant 0 : index
      %66 = vector.load %arg6[%c0_33, %c0_34] : memref<8x64xf32, #tpu.memory_space<vmem>>, vector<8x64xf32>
      %cst_35 = arith.constant dense<0.000000e+00> : vector<16x64xf32>
      %67 = tpu.matmul %65, %66, %cst_35 {dimension_numbers = #tpu.dot_dimension_numbers<[1], [0], [0], [1], [0, 0, 1, 1], [], []>} : vector<16x8xf32>, vector<8x64xf32>, vector<16x64xf32> -> vector<16x64xf32>
      %c0_36 = arith.constant 0 : index
      %c0_37 = arith.constant 0 : index
      %68 = vector.load %arg7[%c0_36, %c0_37] : memref<1x64xf32, #tpu.memory_space<vmem>>, vector<1x64xf32>
      %69 = vector.broadcast %68 : vector<1x64xf32> to vector<16x64xf32>
      %70 = arith.addf %67, %69 : vector<16x64xf32>
      %71 = vector.extract_strided_slice %70 {offsets = [0, 0], sizes = [16, 32], strides = [1, 1]} : vector<16x64xf32> to vector<16x32xf32>
      %c0_38 = arith.constant 0 : index
      %c0_39 = arith.constant 0 : index
      %72 = vector.load %arg10[%c0_38, %c0_39] : memref<16x32xf32, #tpu.memory_space<vmem>>, vector<16x32xf32>
      tpu.vector_store %arg10[%c0_38, %c0_39], %71 {strides = array<i32>} : memref<16x32xf32, #tpu.memory_space<vmem>>, vector<16x32xf32>,
      %73 = vector.extract_strided_slice %70 {offsets = [0, 32], sizes = [16, 32], strides = [1, 1]} : vector<16x64xf32> to vector<16x32xf32>
      %c0_40 = arith.constant 0 : index
      %c0_41 = arith.constant 0 : index
      %74 = vector.load %arg11[%c0_40, %c0_41] : memref<16x32xf32, #tpu.memory_space<vmem>>, vector<16x32xf32>
      tpu.vector_store %arg11[%c0_40, %c0_41], %73 {strides = array<i32>} : memref<16x32xf32, #tpu.memory_space<vmem>>, vector<16x32xf32>,
      %cst_42 = arith.constant -1.000000e+30 : f32
      %c0_43 = arith.constant 0 : index
      %75 = memref.load %arg12[%c0_43] : memref<1xf32, #tpu.memory_space<smem>>
      memref.store %cst_42, %arg12[%c0_43] : memref<1xf32, #tpu.memory_space<smem>>
      %cst_44 = arith.constant 0.000000e+00 : f32
      %76 = vector.broadcast %cst_44 : f32 to vector<16x33xf32>
      %c0_45 = arith.constant 0 : index
      %c0_46 = arith.constant 0 : index
      %77 = vector.load %arg13[%c0_45, %c0_46] : memref<16x33xf32, #tpu.memory_space<vmem>>, vector<16x33xf32>
      tpu.vector_store %arg13[%c0_45, %c0_46], %76 {strides = array<i32>} : memref<16x33xf32, #tpu.memory_space<vmem>>, vector<16x33xf32>,
    } else {
    }
    %c0 = arith.constant 0 : index
    %c0_1 = arith.constant 0 : index
    %3 = vector.load %arg8[%c0, %c0_1] : memref<3x32xf32, #tpu.memory_space<vmem>>, vector<1x32xf32>
    %c0_2 = arith.constant 0 : index
    %c0_3 = arith.constant 0 : index
    %4 = vector.load %arg3[%c0_2, %c0_3] : memref<128x1xi32, #tpu.memory_space<vmem>>, vector<128x1xi32>
    %c0_4 = arith.constant 0 : index
    %c0_5 = arith.constant 0 : index
    %5 = vector.load %arg4[%c0_4, %c0_5] : memref<128x1xi32, #tpu.memory_space<vmem>>, vector<128x1xi32>
    %c0_6 = arith.constant 0 : index
    %c0_7 = arith.constant 0 : index
    %6 = vector.load %arg5[%c0_6, %c0_7] : memref<1x128xi32, #tpu.memory_space<vmem>>, vector<1x128xi32>
    %7 = tpu.iota {dimensions = array<i32: 1>} : vector<128x16xi32>
    %8 = tpu.iota {dimensions = array<i32: 0>} : vector<16x128xi32>
    %9 = vector.broadcast %4 : vector<128x1xi32> to vector<128x16xi32>
    %10 = arith.cmpi eq, %9, %7 : vector<128x16xi32>
    %11 = arith.extui %10 : vector<128x16xi1> to vector<128x16xi32>
    %12 = arith.sitofp %11 : vector<128x16xi32> to vector<128x16xf32>
    %13 = vector.broadcast %5 : vector<128x1xi32> to vector<128x16xi32>
    %14 = arith.cmpi eq, %13, %7 : vector<128x16xi32>
    %15 = arith.extui %14 : vector<128x16xi1> to vector<128x16xi32>
    %16 = arith.sitofp %15 : vector<128x16xi32> to vector<128x16xf32>
    %17 = vector.broadcast %6 : vector<1x128xi32> to vector<16x128xi32>
    %18 = arith.cmpi eq, %17, %8 : vector<16x128xi32>
    %19 = arith.extui %18 : vector<16x128xi1> to vector<16x128xi32>
    %20 = arith.sitofp %19 : vector<16x128xi32> to vector<16x128xf32>
    %c0_i32_8 = arith.constant 0 : i32
    %21 = vector.broadcast %c0_i32_8 : i32 to vector<128x1xi32>
    %22 = arith.cmpi sge, %5, %21 : vector<128x1xi32>
    %c0_9 = arith.constant 0 : index
    %c0_10 = arith.constant 0 : index
    %23 = vector.load %arg10[%c0_9, %c0_10] : memref<16x32xf32, #tpu.memory_space<vmem>>, vector<16x32xf32>
    %cst = arith.constant dense<0.000000e+00> : vector<128x32xf32>
    %24 = tpu.matmul %12, %23, %cst {dimension_numbers = #tpu.dot_dimension_numbers<[1], [0], [0], [1], [0, 0, 1, 1], [], []>} : vector<128x16xf32>, vector<16x32xf32>, vector<128x32xf32> -> vector<128x32xf32>
    %c0_11 = arith.constant 0 : index
    %c0_12 = arith.constant 0 : index
    %25 = vector.load %arg11[%c0_11, %c0_12] : memref<16x32xf32, #tpu.memory_space<vmem>>, vector<16x32xf32>
    %cst_13 = arith.constant dense<0.000000e+00> : vector<128x32xf32>
    %26 = tpu.matmul %16, %25, %cst_13 {dimension_numbers = #tpu.dot_dimension_numbers<[1], [0], [0], [1], [0, 0, 1, 1], [], []>} : vector<128x16xf32>, vector<16x32xf32>, vector<128x32xf32> -> vector<128x32xf32>
    %27 = arith.addf %24, %26 : vector<128x32xf32>
    %c0_14 = arith.constant 0 : index
    %c0_15 = arith.constant 0 : index
    %28 = vector.load %arg2[%c0_14, %c0_15] : memref<128x32xf32, #tpu.memory_space<vmem>>, vector<128x32xf32>
    %29 = arith.addf %27, %28 : vector<128x32xf32>
    %cst_16 = arith.constant 0.000000e+00 : f32
    %30 = vector.broadcast %cst_16 : f32 to vector<128x32xf32>
    %31 = arith.cmpf ogt, %29, %30 : vector<128x32xf32>
    %cst_17 = arith.constant 2.000000e-01 : f32
    %32 = vector.broadcast %cst_17 : f32 to vector<128x32xf32>
    %33 = arith.mulf %32, %29 : vector<128x32xf32>
    %34 = arith.select %31, %29, %33 : vector<128x32xi1>, vector<128x32xf32>
    %35 = vector.broadcast %3 : vector<1x32xf32> to vector<128x32xf32>
    %36 = arith.mulf %34, %35 : vector<128x32xf32>
    %cst_18 = arith.constant dense<0.000000e+00> : vector<128xf32>
    %37 = vector.multi_reduction <add>, %36, %cst_18 [1] : vector<128x32xf32> to vector<128xf32>
    %38 = vector.shape_cast %37 : vector<128xf32> to vector<128x1xf32>
    %cst_19 = arith.constant -1.000000e+30 : f32
    %39 = vector.broadcast %cst_19 : f32 to vector<128x1xf32>
    %40 = arith.select %22, %38, %39 : vector<128x1xi1>, vector<128x1xf32>
    %41 = vector.shape_cast %40 : vector<128x1xf32> to vector<1x128x1xf32>
    %cst_20 = arith.constant dense<0xFF800000> : vector<1xf32>
    %42 = vector.multi_reduction <maximumf>, %41, %cst_20 [1, 2] : vector<1x128x1xf32> to vector<1xf32>
    %43 = vector.shape_cast %42 : vector<1xf32> to vector<1x1x1xf32>
    %44 = vector.extract %43[0, 0, 0] : f32 from vector<1x1x1xf32>
    %c0_21 = arith.constant 0 : index
    %45 = memref.load %arg12[%c0_21] : memref<1xf32, #tpu.memory_space<smem>>
    %46 = arith.maximumf %45, %44 : f32
    %47 = arith.cmpf ogt, %44, %45 : f32
    %48 = arith.extui %47 : i1 to i32
    %c0_i32_22 = arith.constant 0 : i32
    %49 = arith.cmpi ne, %48, %c0_i32_22 : i32
    scf.if %49 {
      %65 = arith.subf %45, %46 : f32
      %66 = vector.broadcast %65 : f32 to vector<1x1xf32>
      %67 = math.exp %66 : vector<1x1xf32>
      %c0_31 = arith.constant 0 : index
      %c0_32 = arith.constant 0 : index
      %68 = vector.load %arg13[%c0_31, %c0_32] : memref<16x33xf32, #tpu.memory_space<vmem>>, vector<16x33xf32>
      %69 = vector.broadcast %67 : vector<1x1xf32> to vector<16x33xf32>
      %70 = arith.mulf %68, %69 : vector<16x33xf32>
      %c0_33 = arith.constant 0 : index
      %c0_34 = arith.constant 0 : index
      %71 = vector.load %arg13[%c0_33, %c0_34] : memref<16x33xf32, #tpu.memory_space<vmem>>, vector<16x33xf32>
      tpu.vector_store %arg13[%c0_33, %c0_34], %70 {strides = array<i32>} : memref<16x33xf32, #tpu.memory_space<vmem>>, vector<16x33xf32>,
      %c0_35 = arith.constant 0 : index
      %72 = memref.load %arg12[%c0_35] : memref<1xf32, #tpu.memory_space<smem>>
      memref.store %46, %arg12[%c0_35] : memref<1xf32, #tpu.memory_space<smem>>
    } else {
    }
    %50 = vector.broadcast %46 : f32 to vector<128x1xf32>
    %51 = arith.subf %38, %50 : vector<128x1xf32>
    %52 = math.exp %51 : vector<128x1xf32>
    %cst_23 = arith.constant 0.000000e+00 : f32
    %53 = vector.broadcast %cst_23 : f32 to vector<128x1xf32>
    %54 = arith.select %22, %52, %53 : vector<128x1xi1>, vector<128x1xf32>
    %55 = vector.broadcast %54 : vector<128x1xf32> to vector<128x32xf32>
    %56 = arith.mulf %55, %24 : vector<128x32xf32>
    %57 = tpu.concatenate %56, %54 in 1 : vector<128x32xf32>, vector<128x1xf32> -> vector<128x33xf32>
    %c0_24 = arith.constant 0 : index
    %c0_25 = arith.constant 0 : index
    %58 = vector.load %arg13[%c0_24, %c0_25] : memref<16x33xf32, #tpu.memory_space<vmem>>, vector<16x33xf32>
    %cst_26 = arith.constant dense<0.000000e+00> : vector<16x33xf32>
    %59 = tpu.matmul %20, %57, %cst_26 {dimension_numbers = #tpu.dot_dimension_numbers<[1], [0], [0], [1], [0, 0, 1, 1], [], []>} : vector<16x128xf32>, vector<128x33xf32>, vector<16x33xf32> -> vector<16x33xf32>
    %60 = arith.addf %58, %59 : vector<16x33xf32>
    %c0_27 = arith.constant 0 : index
    %c0_28 = arith.constant 0 : index
    %61 = vector.load %arg13[%c0_27, %c0_28] : memref<16x33xf32, #tpu.memory_space<vmem>>, vector<16x33xf32>
    tpu.vector_store %arg13[%c0_27, %c0_28], %60 {strides = array<i32>} : memref<16x33xf32, #tpu.memory_space<vmem>>, vector<16x33xf32>,
    %c0_i32_29 = arith.constant 0 : i32
    %62 = arith.cmpi eq, %arg0, %c0_i32_29 : i32
    %63 = arith.extui %62 : i1 to i32
    %c0_i32_30 = arith.constant 0 : i32
    %64 = arith.cmpi ne, %63, %c0_i32_30 : i32
    scf.if %64 {
      %c0_31 = arith.constant 0 : index
      %c0_32 = arith.constant 0 : index
      %65 = vector.load %arg13[%c0_31, %c0_32] : memref<16x33xf32, #tpu.memory_space<vmem>>, vector<16x33xf32>
      %66 = vector.extract_strided_slice %65 {offsets = [0, 0], sizes = [16, 32], strides = [1, 1]} : vector<16x33xf32> to vector<16x32xf32>
      %67 = vector.extract_strided_slice %65 {offsets = [0, 32], sizes = [16, 1], strides = [1, 1]} : vector<16x33xf32> to vector<16x1xf32>
      %c1 = arith.constant 1 : index
      %c0_33 = arith.constant 0 : index
      %68 = vector.load %arg8[%c1, %c0_33] : memref<3x32xf32, #tpu.memory_space<vmem>>, vector<1x32xf32>
      %c2 = arith.constant 2 : index
      %c0_34 = arith.constant 0 : index
      %69 = vector.load %arg8[%c2, %c0_34] : memref<3x32xf32, #tpu.memory_space<vmem>>, vector<1x32xf32>
      %cst_35 = arith.constant 9.99999968E-21 : f32
      %70 = vector.broadcast %cst_35 : f32 to vector<16x1xf32>
      %71 = arith.maximumf %67, %70 : vector<16x1xf32>
      %72 = vector.broadcast %71 : vector<16x1xf32> to vector<16x32xf32>
      %73 = arith.divf %66, %72 : vector<16x32xf32>
      %74 = vector.broadcast %68 : vector<1x32xf32> to vector<16x32xf32>
      %75 = arith.mulf %73, %74 : vector<16x32xf32>
      %76 = vector.broadcast %69 : vector<1x32xf32> to vector<16x32xf32>
      %77 = arith.addf %75, %76 : vector<16x32xf32>
      %cst_36 = arith.constant 0.000000e+00 : f32
      %78 = vector.broadcast %cst_36 : f32 to vector<16x32xf32>
      %79 = arith.maximumf %77, %78 : vector<16x32xf32>
      %c0_37 = arith.constant 0 : index
      %c0_38 = arith.constant 0 : index
      %80 = vector.load %arg9[%c0_37, %c0_38] : memref<16x32xf32, #tpu.memory_space<vmem>>, vector<16x32xf32>
      tpu.vector_store %arg9[%c0_37, %c0_38], %79 {strides = array<i32>} : memref<16x32xf32, #tpu.memory_space<vmem>>, vector<16x32xf32>,
    } else {
    }
    return
  }
  func.func @transform_0(%arg0: i32) -> (i32, i32) {
    %c0_i32 = arith.constant 0 : i32
    %c0_i32_0 = arith.constant 0 : i32
    %c0_i32_1 = arith.constant 0 : i32
    return %c0_i32, %c0_i32_0 : i32, i32
  }
  func.func @transform_1(%arg0: i32) -> (i32, i32) {
    %c0_i32 = arith.constant 0 : i32
    %c0_i32_0 = arith.constant 0 : i32
    return %arg0, %c0_i32 : i32, i32
  }
  func.func @transform_2(%arg0: i32) -> (i32, i32) {
    %c0_i32 = arith.constant 0 : i32
    %c0_i32_0 = arith.constant 0 : i32
    return %arg0, %c0_i32 : i32, i32
  }
  func.func @transform_3(%arg0: i32) -> (i32, i32) {
    %c0_i32 = arith.constant 0 : i32
    %c0_i32_0 = arith.constant 0 : i32
    return %arg0, %c0_i32 : i32, i32
  }
  func.func @transform_4(%arg0: i32) -> (i32, i32) {
    %c0_i32 = arith.constant 0 : i32
    %c0_i32_0 = arith.constant 0 : i32
    return %c0_i32, %arg0 : i32, i32
  }
  func.func @transform_5(%arg0: i32) -> (i32, i32) {
    %c0_i32 = arith.constant 0 : i32
    %c0_i32_0 = arith.constant 0 : i32
    %c0_i32_1 = arith.constant 0 : i32
    return %c0_i32, %c0_i32_0 : i32, i32
  }
  func.func @transform_6(%arg0: i32) -> (i32, i32) {
    %c0_i32 = arith.constant 0 : i32
    %c0_i32_0 = arith.constant 0 : i32
    %c0_i32_1 = arith.constant 0 : i32
    return %c0_i32, %c0_i32_0 : i32, i32
  }
  func.func @transform_7(%arg0: i32) -> (i32, i32) {
    %c0_i32 = arith.constant 0 : i32
    %c0_i32_0 = arith.constant 0 : i32
    %c0_i32_1 = arith.constant 0 : i32
    return %c0_i32, %c0_i32_0 : i32, i32
  }
  func.func @transform_8(%arg0: i32) -> (i32, i32) {
    %c0_i32 = arith.constant 0 : i32
    %c0_i32_0 = arith.constant 0 : i32
    %c0_i32_1 = arith.constant 0 : i32
    return %c0_i32, %c0_i32_0 : i32, i32
  }
}

module attributes {stable_mosaic.version = 11 : i64} {
  func.func @gat_layer_head_kernel(%arg0: i32, %arg1: memref<16x32xf32, #tpu.memory_space<vmem>>, %arg2: memref<128x32xf32, #tpu.memory_space<vmem>>, %arg3: memref<128x1xi32, #tpu.memory_space<vmem>>, %arg4: memref<128x1xi32, #tpu.memory_space<vmem>>, %arg5: memref<1x128xi32, #tpu.memory_space<vmem>>, %arg6: memref<32x64xf32, #tpu.memory_space<vmem>>, %arg7: memref<1x64xf32, #tpu.memory_space<vmem>>, %arg8: memref<3x32xf32, #tpu.memory_space<vmem>>, %arg9: memref<2x16xf32, #tpu.memory_space<vmem>>, %arg10: memref<32x32xf32, #tpu.memory_space<vmem>>, %arg11: memref<1x32xf32, #tpu.memory_space<vmem>>, %arg12: memref<32x1xf32, #tpu.memory_space<vmem>>, %arg13: memref<1x1xf32, #tpu.memory_space<vmem>>, %arg14: memref<2x1xf32, #tpu.memory_space<vmem>>, %arg15: memref<16x32xf32, #tpu.memory_space<vmem>>, %arg16: memref<16x32xf32, #tpu.memory_space<vmem>>, %arg17: memref<1xf32, #tpu.memory_space<smem>>, %arg18: memref<16x33xf32, #tpu.memory_space<vmem>>) attributes {dimension_semantics = [#tpu.dimension_semantics<arbitrary>], iteration_bounds = array<i64: 1>, scalar_prefetch = 0 : i64, scratch_operands = 4 : i64, tpu.core_type = #tpu.core_type<tc>, window_params = [{pipeline_mode = #tpu.pipeline_mode<synchronous>, transform_indices = @transform_0, window_bounds = array<i64: 16, 32>}, {transform_indices = @transform_1, window_bounds = array<i64: 128, 32>}, {transform_indices = @transform_2, window_bounds = array<i64: 128, 1>}, {transform_indices = @transform_3, window_bounds = array<i64: 128, 1>}, {transform_indices = @transform_4, window_bounds = array<i64: 1, 128>}, {pipeline_mode = #tpu.pipeline_mode<synchronous>, transform_indices = @transform_5, window_bounds = array<i64: 32, 64>}, {pipeline_mode = #tpu.pipeline_mode<synchronous>, transform_indices = @transform_6, window_bounds = array<i64: 1, 64>}, {pipeline_mode = #tpu.pipeline_mode<synchronous>, transform_indices = @transform_7, window_bounds = array<i64: 3, 32>}, {pipeline_mode = #tpu.pipeline_mode<synchronous>, transform_indices = @transform_8, window_bounds = array<i64: 2, 16>}, {pipeline_mode = #tpu.pipeline_mode<synchronous>, transform_indices = @transform_9, window_bounds = array<i64: 32, 32>}, {pipeline_mode = #tpu.pipeline_mode<synchronous>, transform_indices = @transform_10, window_bounds = array<i64: 1, 32>}, {pipeline_mode = #tpu.pipeline_mode<synchronous>, transform_indices = @transform_11, window_bounds = array<i64: 32, 1>}, {pipeline_mode = #tpu.pipeline_mode<synchronous>, transform_indices = @transform_12, window_bounds = array<i64: 1, 1>}, {pipeline_mode = #tpu.pipeline_mode<synchronous>, transform_indices = @transform_13, window_bounds = array<i64: 2, 1>}]} {
    %c0_i32 = arith.constant 0 : i32
    %0 = arith.cmpi eq, %arg0, %c0_i32 : i32
    %1 = arith.extui %0 : i1 to i32
    %c0_i32_0 = arith.constant 0 : i32
    %2 = arith.cmpi ne, %1, %c0_i32_0 : i32
    scf.if %2 {
      %c0_31 = arith.constant 0 : index
      %c0_32 = arith.constant 0 : index
      %65 = vector.load %arg1[%c0_31, %c0_32] : memref<16x32xf32, #tpu.memory_space<vmem>>, vector<16x32xf32>
      %c0_33 = arith.constant 0 : index
      %c0_34 = arith.constant 0 : index
      %66 = vector.load %arg6[%c0_33, %c0_34] : memref<32x64xf32, #tpu.memory_space<vmem>>, vector<32x64xf32>
      %cst_35 = arith.constant dense<0.000000e+00> : vector<16x64xf32>
      %67 = tpu.matmul %65, %66, %cst_35 {dimension_numbers = #tpu.dot_dimension_numbers<[1], [0], [0], [1], [0, 0, 1, 1], [], []>} : vector<16x32xf32>, vector<32x64xf32>, vector<16x64xf32> -> vector<16x64xf32>
      %c0_36 = arith.constant 0 : index
      %c0_37 = arith.constant 0 : index
      %68 = vector.load %arg7[%c0_36, %c0_37] : memref<1x64xf32, #tpu.memory_space<vmem>>, vector<1x64xf32>
      %69 = vector.broadcast %68 : vector<1x64xf32> to vector<16x64xf32>
      %70 = arith.addf %67, %69 : vector<16x64xf32>
      %71 = vector.extract_strided_slice %70 {offsets = [0, 0], sizes = [16, 32], strides = [1, 1]} : vector<16x64xf32> to vector<16x32xf32>
      %c0_38 = arith.constant 0 : index
      %c0_39 = arith.constant 0 : index
      %72 = vector.load %arg15[%c0_38, %c0_39] : memref<16x32xf32, #tpu.memory_space<vmem>>, vector<16x32xf32>
      tpu.vector_store %arg15[%c0_38, %c0_39], %71 {strides = array<i32>} : memref<16x32xf32, #tpu.memory_space<vmem>>, vector<16x32xf32>,
      %73 = vector.extract_strided_slice %70 {offsets = [0, 32], sizes = [16, 32], strides = [1, 1]} : vector<16x64xf32> to vector<16x32xf32>
      %c0_40 = arith.constant 0 : index
      %c0_41 = arith.constant 0 : index
      %74 = vector.load %arg16[%c0_40, %c0_41] : memref<16x32xf32, #tpu.memory_space<vmem>>, vector<16x32xf32>
      tpu.vector_store %arg16[%c0_40, %c0_41], %73 {strides = array<i32>} : memref<16x32xf32, #tpu.memory_space<vmem>>, vector<16x32xf32>,
      %cst_42 = arith.constant -1.000000e+30 : f32
      %c0_43 = arith.constant 0 : index
      %75 = memref.load %arg17[%c0_43] : memref<1xf32, #tpu.memory_space<smem>>
      memref.store %cst_42, %arg17[%c0_43] : memref<1xf32, #tpu.memory_space<smem>>
      %cst_44 = arith.constant 0.000000e+00 : f32
      %76 = vector.broadcast %cst_44 : f32 to vector<16x33xf32>
      %c0_45 = arith.constant 0 : index
      %c0_46 = arith.constant 0 : index
      %77 = vector.load %arg18[%c0_45, %c0_46] : memref<16x33xf32, #tpu.memory_space<vmem>>, vector<16x33xf32>
      tpu.vector_store %arg18[%c0_45, %c0_46], %76 {strides = array<i32>} : memref<16x33xf32, #tpu.memory_space<vmem>>, vector<16x33xf32>,
    } else {
    }
    %c0 = arith.constant 0 : index
    %c0_1 = arith.constant 0 : index
    %3 = vector.load %arg8[%c0, %c0_1] : memref<3x32xf32, #tpu.memory_space<vmem>>, vector<1x32xf32>
    %c0_2 = arith.constant 0 : index
    %c0_3 = arith.constant 0 : index
    %4 = vector.load %arg3[%c0_2, %c0_3] : memref<128x1xi32, #tpu.memory_space<vmem>>, vector<128x1xi32>
    %c0_4 = arith.constant 0 : index
    %c0_5 = arith.constant 0 : index
    %5 = vector.load %arg4[%c0_4, %c0_5] : memref<128x1xi32, #tpu.memory_space<vmem>>, vector<128x1xi32>
    %c0_6 = arith.constant 0 : index
    %c0_7 = arith.constant 0 : index
    %6 = vector.load %arg5[%c0_6, %c0_7] : memref<1x128xi32, #tpu.memory_space<vmem>>, vector<1x128xi32>
    %7 = tpu.iota {dimensions = array<i32: 1>} : vector<128x16xi32>
    %8 = tpu.iota {dimensions = array<i32: 0>} : vector<16x128xi32>
    %9 = vector.broadcast %4 : vector<128x1xi32> to vector<128x16xi32>
    %10 = arith.cmpi eq, %9, %7 : vector<128x16xi32>
    %11 = arith.extui %10 : vector<128x16xi1> to vector<128x16xi32>
    %12 = arith.sitofp %11 : vector<128x16xi32> to vector<128x16xf32>
    %13 = vector.broadcast %5 : vector<128x1xi32> to vector<128x16xi32>
    %14 = arith.cmpi eq, %13, %7 : vector<128x16xi32>
    %15 = arith.extui %14 : vector<128x16xi1> to vector<128x16xi32>
    %16 = arith.sitofp %15 : vector<128x16xi32> to vector<128x16xf32>
    %17 = vector.broadcast %6 : vector<1x128xi32> to vector<16x128xi32>
    %18 = arith.cmpi eq, %17, %8 : vector<16x128xi32>
    %19 = arith.extui %18 : vector<16x128xi1> to vector<16x128xi32>
    %20 = arith.sitofp %19 : vector<16x128xi32> to vector<16x128xf32>
    %c0_i32_8 = arith.constant 0 : i32
    %21 = vector.broadcast %c0_i32_8 : i32 to vector<128x1xi32>
    %22 = arith.cmpi sge, %5, %21 : vector<128x1xi32>
    %c0_9 = arith.constant 0 : index
    %c0_10 = arith.constant 0 : index
    %23 = vector.load %arg15[%c0_9, %c0_10] : memref<16x32xf32, #tpu.memory_space<vmem>>, vector<16x32xf32>
    %cst = arith.constant dense<0.000000e+00> : vector<128x32xf32>
    %24 = tpu.matmul %12, %23, %cst {dimension_numbers = #tpu.dot_dimension_numbers<[1], [0], [0], [1], [0, 0, 1, 1], [], []>} : vector<128x16xf32>, vector<16x32xf32>, vector<128x32xf32> -> vector<128x32xf32>
    %c0_11 = arith.constant 0 : index
    %c0_12 = arith.constant 0 : index
    %25 = vector.load %arg16[%c0_11, %c0_12] : memref<16x32xf32, #tpu.memory_space<vmem>>, vector<16x32xf32>
    %cst_13 = arith.constant dense<0.000000e+00> : vector<128x32xf32>
    %26 = tpu.matmul %16, %25, %cst_13 {dimension_numbers = #tpu.dot_dimension_numbers<[1], [0], [0], [1], [0, 0, 1, 1], [], []>} : vector<128x16xf32>, vector<16x32xf32>, vector<128x32xf32> -> vector<128x32xf32>
    %27 = arith.addf %24, %26 : vector<128x32xf32>
    %c0_14 = arith.constant 0 : index
    %c0_15 = arith.constant 0 : index
    %28 = vector.load %arg2[%c0_14, %c0_15] : memref<128x32xf32, #tpu.memory_space<vmem>>, vector<128x32xf32>
    %29 = arith.addf %27, %28 : vector<128x32xf32>
    %cst_16 = arith.constant 0.000000e+00 : f32
    %30 = vector.broadcast %cst_16 : f32 to vector<128x32xf32>
    %31 = arith.cmpf ogt, %29, %30 : vector<128x32xf32>
    %cst_17 = arith.constant 2.000000e-01 : f32
    %32 = vector.broadcast %cst_17 : f32 to vector<128x32xf32>
    %33 = arith.mulf %32, %29 : vector<128x32xf32>
    %34 = arith.select %31, %29, %33 : vector<128x32xi1>, vector<128x32xf32>
    %35 = vector.broadcast %3 : vector<1x32xf32> to vector<128x32xf32>
    %36 = arith.mulf %34, %35 : vector<128x32xf32>
    %cst_18 = arith.constant dense<0.000000e+00> : vector<128xf32>
    %37 = vector.multi_reduction <add>, %36, %cst_18 [1] : vector<128x32xf32> to vector<128xf32>
    %38 = vector.shape_cast %37 : vector<128xf32> to vector<128x1xf32>
    %cst_19 = arith.constant -1.000000e+30 : f32
    %39 = vector.broadcast %cst_19 : f32 to vector<128x1xf32>
    %40 = arith.select %22, %38, %39 : vector<128x1xi1>, vector<128x1xf32>
    %41 = vector.shape_cast %40 : vector<128x1xf32> to vector<1x128x1xf32>
    %cst_20 = arith.constant dense<0xFF800000> : vector<1xf32>
    %42 = vector.multi_reduction <maximumf>, %41, %cst_20 [1, 2] : vector<1x128x1xf32> to vector<1xf32>
    %43 = vector.shape_cast %42 : vector<1xf32> to vector<1x1x1xf32>
    %44 = vector.extract %43[0, 0, 0] : f32 from vector<1x1x1xf32>
    %c0_21 = arith.constant 0 : index
    %45 = memref.load %arg17[%c0_21] : memref<1xf32, #tpu.memory_space<smem>>
    %46 = arith.maximumf %45, %44 : f32
    %47 = arith.cmpf ogt, %44, %45 : f32
    %48 = arith.extui %47 : i1 to i32
    %c0_i32_22 = arith.constant 0 : i32
    %49 = arith.cmpi ne, %48, %c0_i32_22 : i32
    scf.if %49 {
      %65 = arith.subf %45, %46 : f32
      %66 = vector.broadcast %65 : f32 to vector<1x1xf32>
      %67 = math.exp %66 : vector<1x1xf32>
      %c0_31 = arith.constant 0 : index
      %c0_32 = arith.constant 0 : index
      %68 = vector.load %arg18[%c0_31, %c0_32] : memref<16x33xf32, #tpu.memory_space<vmem>>, vector<16x33xf32>
      %69 = vector.broadcast %67 : vector<1x1xf32> to vector<16x33xf32>
      %70 = arith.mulf %68, %69 : vector<16x33xf32>
      %c0_33 = arith.constant 0 : index
      %c0_34 = arith.constant 0 : index
      %71 = vector.load %arg18[%c0_33, %c0_34] : memref<16x33xf32, #tpu.memory_space<vmem>>, vector<16x33xf32>
      tpu.vector_store %arg18[%c0_33, %c0_34], %70 {strides = array<i32>} : memref<16x33xf32, #tpu.memory_space<vmem>>, vector<16x33xf32>,
      %c0_35 = arith.constant 0 : index
      %72 = memref.load %arg17[%c0_35] : memref<1xf32, #tpu.memory_space<smem>>
      memref.store %46, %arg17[%c0_35] : memref<1xf32, #tpu.memory_space<smem>>
    } else {
    }
    %50 = vector.broadcast %46 : f32 to vector<128x1xf32>
    %51 = arith.subf %38, %50 : vector<128x1xf32>
    %52 = math.exp %51 : vector<128x1xf32>
    %cst_23 = arith.constant 0.000000e+00 : f32
    %53 = vector.broadcast %cst_23 : f32 to vector<128x1xf32>
    %54 = arith.select %22, %52, %53 : vector<128x1xi1>, vector<128x1xf32>
    %55 = vector.broadcast %54 : vector<128x1xf32> to vector<128x32xf32>
    %56 = arith.mulf %55, %24 : vector<128x32xf32>
    %57 = tpu.concatenate %56, %54 in 1 : vector<128x32xf32>, vector<128x1xf32> -> vector<128x33xf32>
    %c0_24 = arith.constant 0 : index
    %c0_25 = arith.constant 0 : index
    %58 = vector.load %arg18[%c0_24, %c0_25] : memref<16x33xf32, #tpu.memory_space<vmem>>, vector<16x33xf32>
    %cst_26 = arith.constant dense<0.000000e+00> : vector<16x33xf32>
    %59 = tpu.matmul %20, %57, %cst_26 {dimension_numbers = #tpu.dot_dimension_numbers<[1], [0], [0], [1], [0, 0, 1, 1], [], []>} : vector<16x128xf32>, vector<128x33xf32>, vector<16x33xf32> -> vector<16x33xf32>
    %60 = arith.addf %58, %59 : vector<16x33xf32>
    %c0_27 = arith.constant 0 : index
    %c0_28 = arith.constant 0 : index
    %61 = vector.load %arg18[%c0_27, %c0_28] : memref<16x33xf32, #tpu.memory_space<vmem>>, vector<16x33xf32>
    tpu.vector_store %arg18[%c0_27, %c0_28], %60 {strides = array<i32>} : memref<16x33xf32, #tpu.memory_space<vmem>>, vector<16x33xf32>,
    %c0_i32_29 = arith.constant 0 : i32
    %62 = arith.cmpi eq, %arg0, %c0_i32_29 : i32
    %63 = arith.extui %62 : i1 to i32
    %c0_i32_30 = arith.constant 0 : i32
    %64 = arith.cmpi ne, %63, %c0_i32_30 : i32
    scf.if %64 {
      %c0_31 = arith.constant 0 : index
      %c0_32 = arith.constant 0 : index
      %65 = vector.load %arg18[%c0_31, %c0_32] : memref<16x33xf32, #tpu.memory_space<vmem>>, vector<16x33xf32>
      %66 = vector.extract_strided_slice %65 {offsets = [0, 0], sizes = [16, 32], strides = [1, 1]} : vector<16x33xf32> to vector<16x32xf32>
      %67 = vector.extract_strided_slice %65 {offsets = [0, 32], sizes = [16, 1], strides = [1, 1]} : vector<16x33xf32> to vector<16x1xf32>
      %c1 = arith.constant 1 : index
      %c0_33 = arith.constant 0 : index
      %68 = vector.load %arg8[%c1, %c0_33] : memref<3x32xf32, #tpu.memory_space<vmem>>, vector<1x32xf32>
      %c2 = arith.constant 2 : index
      %c0_34 = arith.constant 0 : index
      %69 = vector.load %arg8[%c2, %c0_34] : memref<3x32xf32, #tpu.memory_space<vmem>>, vector<1x32xf32>
      %cst_35 = arith.constant 9.99999968E-21 : f32
      %70 = vector.broadcast %cst_35 : f32 to vector<16x1xf32>
      %71 = arith.maximumf %67, %70 : vector<16x1xf32>
      %72 = vector.broadcast %71 : vector<16x1xf32> to vector<16x32xf32>
      %73 = arith.divf %66, %72 : vector<16x32xf32>
      %74 = vector.broadcast %68 : vector<1x32xf32> to vector<16x32xf32>
      %75 = arith.mulf %73, %74 : vector<16x32xf32>
      %76 = vector.broadcast %69 : vector<1x32xf32> to vector<16x32xf32>
      %77 = arith.addf %75, %76 : vector<16x32xf32>
      %cst_36 = arith.constant 0.000000e+00 : f32
      %78 = vector.broadcast %cst_36 : f32 to vector<16x32xf32>
      %79 = arith.maximumf %77, %78 : vector<16x32xf32>
      %c0_37 = arith.constant 0 : index
      %c0_38 = arith.constant 0 : index
      %80 = vector.load %arg9[%c0_37, %c0_38] : memref<2x16xf32, #tpu.memory_space<vmem>>, vector<2x16xf32>
      %cst_39 = arith.constant dense<0.000000e+00> : vector<2x32xf32>
      %81 = tpu.matmul %80, %79, %cst_39 {dimension_numbers = #tpu.dot_dimension_numbers<[1], [0], [0], [1], [0, 0, 1, 1], [], []>} : vector<2x16xf32>, vector<16x32xf32>, vector<2x32xf32> -> vector<2x32xf32>
      %c0_40 = arith.constant 0 : index
      %c0_41 = arith.constant 0 : index
      %82 = vector.load %arg10[%c0_40, %c0_41] : memref<32x32xf32, #tpu.memory_space<vmem>>, vector<32x32xf32>
      %cst_42 = arith.constant dense<0.000000e+00> : vector<2x32xf32>
      %83 = tpu.matmul %81, %82, %cst_42 {dimension_numbers = #tpu.dot_dimension_numbers<[1], [0], [0], [1], [0, 0, 1, 1], [], []>} : vector<2x32xf32>, vector<32x32xf32>, vector<2x32xf32> -> vector<2x32xf32>
      %c0_43 = arith.constant 0 : index
      %c0_44 = arith.constant 0 : index
      %84 = vector.load %arg11[%c0_43, %c0_44] : memref<1x32xf32, #tpu.memory_space<vmem>>, vector<1x32xf32>
      %85 = vector.broadcast %84 : vector<1x32xf32> to vector<2x32xf32>
      %86 = arith.addf %83, %85 : vector<2x32xf32>
      %cst_45 = arith.constant 0.000000e+00 : f32
      %87 = vector.broadcast %cst_45 : f32 to vector<2x32xf32>
      %88 = arith.maximumf %86, %87 : vector<2x32xf32>
      %c0_46 = arith.constant 0 : index
      %c0_47 = arith.constant 0 : index
      %89 = vector.load %arg12[%c0_46, %c0_47] : memref<32x1xf32, #tpu.memory_space<vmem>>, vector<32x1xf32>
      %cst_48 = arith.constant dense<0.000000e+00> : vector<2x1xf32>
      %90 = tpu.matmul %88, %89, %cst_48 {dimension_numbers = #tpu.dot_dimension_numbers<[1], [0], [0], [1], [0, 0, 1, 1], [], []>} : vector<2x32xf32>, vector<32x1xf32>, vector<2x1xf32> -> vector<2x1xf32>
      %c0_49 = arith.constant 0 : index
      %c0_50 = arith.constant 0 : index
      %91 = vector.load %arg13[%c0_49, %c0_50] : memref<1x1xf32, #tpu.memory_space<vmem>>, vector<1x1xf32>
      %92 = vector.broadcast %91 : vector<1x1xf32> to vector<2x1xf32>
      %93 = arith.addf %90, %92 : vector<2x1xf32>
      %c0_51 = arith.constant 0 : index
      %c0_52 = arith.constant 0 : index
      %94 = vector.load %arg14[%c0_51, %c0_52] : memref<2x1xf32, #tpu.memory_space<vmem>>, vector<2x1xf32>
      tpu.vector_store %arg14[%c0_51, %c0_52], %93 {strides = array<i32>} : memref<2x1xf32, #tpu.memory_space<vmem>>, vector<2x1xf32>,
    } else {
    }
    return
  }
  func.func @transform_0(%arg0: i32) -> (i32, i32) {
    %c0_i32 = arith.constant 0 : i32
    %c0_i32_0 = arith.constant 0 : i32
    %c0_i32_1 = arith.constant 0 : i32
    return %c0_i32, %c0_i32_0 : i32, i32
  }
  func.func @transform_1(%arg0: i32) -> (i32, i32) {
    %c0_i32 = arith.constant 0 : i32
    %c0_i32_0 = arith.constant 0 : i32
    return %arg0, %c0_i32 : i32, i32
  }
  func.func @transform_2(%arg0: i32) -> (i32, i32) {
    %c0_i32 = arith.constant 0 : i32
    %c0_i32_0 = arith.constant 0 : i32
    return %arg0, %c0_i32 : i32, i32
  }
  func.func @transform_3(%arg0: i32) -> (i32, i32) {
    %c0_i32 = arith.constant 0 : i32
    %c0_i32_0 = arith.constant 0 : i32
    return %arg0, %c0_i32 : i32, i32
  }
  func.func @transform_4(%arg0: i32) -> (i32, i32) {
    %c0_i32 = arith.constant 0 : i32
    %c0_i32_0 = arith.constant 0 : i32
    return %c0_i32, %arg0 : i32, i32
  }
  func.func @transform_5(%arg0: i32) -> (i32, i32) {
    %c0_i32 = arith.constant 0 : i32
    %c0_i32_0 = arith.constant 0 : i32
    %c0_i32_1 = arith.constant 0 : i32
    return %c0_i32, %c0_i32_0 : i32, i32
  }
  func.func @transform_6(%arg0: i32) -> (i32, i32) {
    %c0_i32 = arith.constant 0 : i32
    %c0_i32_0 = arith.constant 0 : i32
    %c0_i32_1 = arith.constant 0 : i32
    return %c0_i32, %c0_i32_0 : i32, i32
  }
  func.func @transform_7(%arg0: i32) -> (i32, i32) {
    %c0_i32 = arith.constant 0 : i32
    %c0_i32_0 = arith.constant 0 : i32
    %c0_i32_1 = arith.constant 0 : i32
    return %c0_i32, %c0_i32_0 : i32, i32
  }
  func.func @transform_8(%arg0: i32) -> (i32, i32) {
    %c0_i32 = arith.constant 0 : i32
    %c0_i32_0 = arith.constant 0 : i32
    %c0_i32_1 = arith.constant 0 : i32
    return %c0_i32, %c0_i32_0 : i32, i32
  }
  func.func @transform_9(%arg0: i32) -> (i32, i32) {
    %c0_i32 = arith.constant 0 : i32
    %c0_i32_0 = arith.constant 0 : i32
    %c0_i32_1 = arith.constant 0 : i32
    return %c0_i32, %c0_i32_0 : i32, i32
  }
  func.func @transform_10(%arg0: i32) -> (i32, i32) {
    %c0_i32 = arith.constant 0 : i32
    %c0_i32_0 = arith.constant 0 : i32
    %c0_i32_1 = arith.constant 0 : i32
    return %c0_i32, %c0_i32_0 : i32, i32
  }
  func.func @transform_11(%arg0: i32) -> (i32, i32) {
    %c0_i32 = arith.constant 0 : i32
    %c0_i32_0 = arith.constant 0 : i32
    %c0_i32_1 = arith.constant 0 : i32
    return %c0_i32, %c0_i32_0 : i32, i32
  }
  func.func @transform_12(%arg0: i32) -> (i32, i32) {
    %c0_i32 = arith.constant 0 : i32
    %c0_i32_0 = arith.constant 0 : i32
    %c0_i32_1 = arith.constant 0 : i32
    return %c0_i32, %c0_i32_0 : i32, i32
  }
  func.func @transform_13(%arg0: i32) -> (i32, i32) {
    %c0_i32 = arith.constant 0 : i32
    %c0_i32_0 = arith.constant 0 : i32
    %c0_i32_1 = arith.constant 0 : i32
    return %c0_i32, %c0_i32_0 : i32, i32
  }
}

</mosaic_0001>

<bundles_post_ra>
// kernel: energy_gnn_forward.2
= control target key start
LH: loop header
LB: loop body
LE: loop exit
PB: predicated region body
PF: predicated region fallthrough
CT: control target
= control target key end

     0   :  { %vm40_vm0 = vcmask 64512   ;;  %v2029_v2 = vmov 0   ;;  %vm2028_vm1 = vcmask 261120   ;;  %vm85_vm2 = vcmask 269312   ;;  %s2019_s5 = inlined_call_operand.vmem [shape: f32[8,64], index: 5, kind: input, shape index: {}]   ;;  %s2020_s8 = inlined_call_operand.vmem [shape: f32[16,32], index: 8, kind: output, shape index: {}]   ;;  %s2021_s0 = inlined_call_operand.vmem [shape: f32[16,8], index: 0, kind: input, shape index: {}]   ;;  %s2022_s3 = inlined_call_operand.vmem [shape: s32[128,1], index: 3, kind: input, shape index: {}]   ;;  %s2023_s6 = inlined_call_operand.vmem [shape: f32[1,64], index: 6, kind: input, shape index: {}]   ;;  %s2024_s2 = inlined_call_operand.vmem [shape: s32[128,1], index: 2, kind: input, shape index: {}]   ;;  %s2025_s4 = inlined_call_operand.vmem [shape: s32[1,128], index: 4, kind: input, shape index: {}]   ;;  %s2026_s7 = inlined_call_operand.vmem [shape: f32[3,32], index: 7, kind: input, shape index: {}]   ;;  %s2027_s1 = inlined_call_operand.vmem [shape: f32[128,32], index: 1, kind: input, shape index: {}]  }
   0x1   :  { %v35_v0 = vld [vmem:[%s2019_s5] sm:$0xff]  ;;  %1212 = vset.pattern.permute.xlu1 %v2029_v2  ;;  %1213 = vset.pattern.permute.xlu2 %v2029_v2  ;;  %v1374_v4 = vld [vmem:[%s2022_s3 + $0x8] sm:$0xff]  ;;  %v96_v6 = vld [vmem:[%s2024_s2 + $0x38] sm:$0xff]  ;;  %v1304_v30 = vmov 0.0   ;;  %v122_v44 = vlaneseq  ;;  %vm344_vm5 = vcmask 130048  }
   0x2   :  { %v33_v1 = vld [vmem:[%s2021_s0] sm:$0xff]  ;;  %62 = vmatpush.msra.mxu0 %v35_v0  ;;  %1214 = vset.pattern.permute.xlu0 %v2029_v2  ;;  %v34_v5 = vld [vmem:[%s2021_s0 + $0x8] sm:$0xff]  ;;  %v1402_v11 = vld [vmem:[%s2022_s3 + $0x18] sm:$0xff]  ;;  %86 = vst.msk [vmem:[#allocation5] sm:$0xff] %vm85_vm2, %v1304_v30 }
   0x3   :  { %v1366_v3 = vld [vmem:[%s2022_s3] sm:$0xff]  ;;  %1129 = vmatmul.msk.f32.vlgmr.msra.gmra.mxu0 %vm40_vm0, %v33_v1  ;;  %227 = vperm.xlu2 %1213, %v1374_v4   ;;  %v1390_v8 = vld [vmem:[%s2022_s3 + $0x48] sm:$0xff]  ;;  %v99_v13 = vld [vmem:[%s2024_s2 + $0x50] sm:$0xff]  ;;  %87 = vst.msk [vmem:[#allocation5 + $0x8] sm:$0xff] %vm85_vm2, %v1304_v30  ;;  %v1507_v47 = vand.u32 127, %v122_v44  ;;  %v1516_v53 = vshrl.u32 %v122_v44, 7 }
   0x4   :  { %224 = vperm.xlu1 %1212, %v1366_v3   ;;  %v97_v7 = vld [vmem:[%s2024_s2 + $0x40] sm:$0xff]  ;;  %v98_v10 = vld [vmem:[%s2024_s2 + $0x48] sm:$0xff]  ;;  %v1414_v14 = vld [vmem:[%s2022_s3 + $0x58] sm:$0xff] }
   0x5   :  { %v89_v9 = vld [vmem:[%s2024_s2] sm:$0xff]  ;;  %v90_v12 = vld [vmem:[%s2024_s2 + $0x8] sm:$0xff]  ;;  %v91_v15 = vld [vmem:[%s2024_s2 + $0x10] sm:$0xff]  ;;  %2045 = vst [vmem:[#allocation6_spill] sm:$0xff] %v1516_v53  ;;  %v1526_v56 = vadd.s32 8, %v1516_v53  ;;  %vm337_vm9 = vcmp.ge.s32.totalorder %v1414_v14, 0 }
   0x6   :  { %v1423_v16 = vld [vmem:[%s2022_s3 + $0x28] sm:$0xff]  ;;  %v101_v17 = vld [vmem:[%s2024_s2 + $0x60] sm:$0xff]  ;;  %v1435_v19 = vld [vmem:[%s2022_s3 + $0x70] sm:$0xff] }
   0x7   :  { %v93_v18 = vld [vmem:[%s2024_s2 + $0x20] sm:$0xff]  ;;  %v104_v22 = vld [vmem:[%s2024_s2 + $0x78] sm:$0xff]  ;;  %v1456_v23 = vld [vmem:[%s2022_s3 + $0x30] sm:$0xff]  ;;  %2047 = vst [vmem:[#allocation8_spill] sm:$0xff] %v1526_v56 }
   0x8   :  { %v1441_v20 = vld [vmem:[%s2022_s3 + $0x40] sm:$0xff]  ;;  %v102_v24 = vld [vmem:[%s2024_s2 + $0x68] sm:$0xff]  ;;  %v1472_v29 = vld [vmem:[%s2022_s3 + $0x78] sm:$0xff] }
   0x9   :  { %v1447_v21 = vld [vmem:[%s2022_s3 + $0x60] sm:$0xff]  ;;  %v94_v25 = vld [vmem:[%s2024_s2 + $0x28] sm:$0xff]  ;;  %v1487_v37 = vld [vmem:[%s2022_s3 + $0x10] sm:$0xff] }
   0xa   :  { %v1215_v26 = vld [vmem:[%s2023_s6] ss:$0 sm:$0xff]  ;;  %s1305_s6 = smov 96   ;;  %v1493_v40 = vld [vmem:[%s2022_s3 + $0x50] sm:$0xff]  ;;  %v100_v45 = vld [vmem:[%s2024_s2 + $0x58] sm:$0xff]  ;;  %vm338_vm6 = vcmp.ge.s32.totalorder %v1447_v21, 0 }
   0xb   :  { %1130 = vmatmul.msk.f32.gmra.mxu0 %vm40_vm0, %v34_v5  ;;  %152 = vperm.xlu2 %1213, %v97_v7   ;;  %v1499_v42 = vld [vmem:[%s2022_s3 + $0x20] sm:$0xff]  ;;  %v92_v49 = vld [vmem:[%s2024_s2 + $0x18] sm:$0xff]  ;;  %v1537_v57 = vld [vmem:[%s2022_s3 + $0x68] sm:$0xff] }
   0xc   :  { %149 = vperm.xlu1 %1212, %v96_v6   ;;  %v1521_v54 = vld [vmem:[%s2025_s4] ss:$0 sm:$0xff]  ;;  %v1549_v61 = vld [vmem:[%s2022_s3 + $0x38] sm:$0xff]  ;;  %v103_v0 = vld [vmem:[%s2024_s2 + $0x70] sm:$0xff] }
   0xd   :  { %2046 = vst [vmem:[#allocation7_spill] sm:$0xff] %v1521_v54  ;;  %v95_v5 = vld [vmem:[%s2024_s2 + $0x30] sm:$0xff] }
  0x13   :  { %128 = vperm.xlu2 %1213, %v89_v9  }
  0x14   :  { %251 = vperm.xlu1 %1212, %v1390_v8  }
  0x1b   :  { %233 = vperm.xlu2 %1213, %v1402_v11  }
  0x1c   :  { %155 = vperm.xlu1 %1212, %v98_v10  }
  0x23   :  { %158 = vperm.xlu2 %1213, %v99_v13  }
  0x24   :  { %131 = vperm.xlu1 %1212, %v90_v12  }
  0x2b   :  { %134 = vperm.xlu2 %1213, %v91_v15  }
  0x2c   :  { %257 = vperm.xlu1 %1212, %v1414_v14  }
  0x33   :  { %260 = vperm.xlu2 %1213, %v1447_v21  }
  0x34   :  { %239 = vperm.xlu1 %1212, %v1423_v16  }
  0x3b   :  { %242 = vperm.xlu2 %1213, %v1456_v23  }
  0x3c   :  { %164 = vperm.xlu1 %1212, %v101_v17  }
  0x43   :  { %167 = vperm.xlu2 %1213, %v102_v24  }
  0x44   :  { %140 = vperm.xlu1 %1212, %v93_v18  }
  0x4b   :  { %143 = vperm.xlu2 %1213, %v94_v25  }
  0x4c   :  { %266 = vperm.xlu1 %1212, %v1435_v19  }
  0x53   :  { %269 = vperm.xlu2 %1213, %v1472_v29  }
  0x54   :  { %248 = vperm.xlu1 %1212, %v1441_v20  }
  0x5c   :  { %173 = vperm.xlu1 %1212, %v104_v22  }
  0x5d   :  { %v1480_v35 = vpop.permute.xlu2 %227 }
  0x5e   :  { %vm272_vm15 = vcmp.eq.s32.totalorder %v1480_v35, %v1507_v47 }
  0x5f   :  { %v1148_v22 = vsel %vm272_vm15, 1.0, %v1304_v30 }
  0x65   :  { %v153_v38 = vpop.permute.xlu2 %152 }
  0x66   :  { %vm183_vm7 = vcmp.eq.s32.totalorder %v153_v38, %v1507_v47 }
  0x67   :  { %v1139_v58 = vsel %vm183_vm7, 1.0, %v1304_v30 }
  0x6d   :  { %v129_v41 = vpop.permute.xlu2 %128 }
  0x6e   :  { %vm175_vm4 = vcmp.eq.s32.totalorder %v129_v41, %v1507_v47 }
  0x6f   :  { %v1131_v51 = vsel %vm175_vm4, 1.0, %v1304_v30 }
  0x75   :  { %v1505_v46 = vpop.permute.xlu2 %233 }
  0x76   :  { %v1482_v36 = vpop.permute.xlu1 %224  ;;  %vm274_vm7 = vcmp.eq.s32.totalorder %v1505_v46, %v1507_v47 }
  0x77   :  { %vm271_vm13 = vcmp.eq.s32.totalorder %v1482_v36, %v1507_v47  ;;  %v1150_v35 = vsel %vm274_vm7, 1.0, %v1304_v30 }
  0x78   :  { %v1147_v15 = vsel %vm271_vm13, 1.0, %v1304_v30 }
  0x7d   :  { %v159_v52 = vpop.permute.xlu2 %158 }
  0x7e   :  { %v150_v39 = vpop.permute.xlu1 %149  ;;  %vm185_vm12 = vcmp.eq.s32.totalorder %v159_v52, %v1507_v47 }
  0x7f   :  { %vm182_vm3 = vcmp.eq.s32.totalorder %v150_v39, %v1507_v47  ;;  %v1141_v1 = vsel %vm185_vm12, 1.0, %v1304_v30 }
  0x80   :  { %v64_v27 = vpop.f32.mrf.mxu0  ;;  %v1138_v50 = vsel %vm182_vm3, 1.0, %v1304_v30 }
  0x81   :  { %v65_v28 = vadd.f32 %v1215_v26, %v64_v27 }
  0x83   :  { %71 = vst.msk [vmem:[#allocation2] sm:$0xff] %vm2028_vm1, %v65_v28 }
  0x85   :  { %v135_v60 = vpop.permute.xlu2 %134 }
  0x86   :  { %v252_v43 = vpop.permute.xlu1 %251  ;;  %vm177_vm11 = vcmp.eq.s32.totalorder %v135_v60, %v1507_v47 }
  0x87   :  { %v1133_v63 = vsel %vm177_vm11, 1.0, %v1304_v30  ;;  %vm280_vm14 = vcmp.eq.s32.totalorder %v252_v43, %v1507_v47 }
  0x88   :  { %v67_v31 = vpop.f32.mrf.mxu0  ;;  %v1156_v17 = vsel %vm280_vm14, 1.0, %v1304_v30 }
  0x89   :  { %v68_v32 = vadd.f32 %v1215_v26, %v67_v31 }
  0x8a   :  { %v342_v34 = vld [vmem:[#allocation2] sm:$0xff] }
  0x8b   :  { %72 = vst.msk [vmem:[#allocation2 + $0x8] sm:$0xff] %vm2028_vm1, %v68_v32  ;;  %77 = vrot.lane.b32.xlu0 %v68_v32, %s1305_s6 }
  0x8d   :  { %v261_v26 = vpop.permute.xlu2 %260 }
  0x8e   :  { %v156_v48 = vpop.permute.xlu1 %155 }
  0x8f   :  { %vm184_vm10 = vcmp.eq.s32.totalorder %v156_v48, %v1507_v47 }
  0x90   :  { %v1140_v62 = vsel %vm184_vm10, 1.0, %v1304_v30 }
  0x92   :  { %v343_v33 = vld [vmem:[#allocation2 + $0x8] sm:$0xff] }
  0x93   :  { %407 = vmatpush.msrb.mxu0 %v343_v33  ;;  %1199 = vmatpush.msra.mxu1 %v343_v33 }
  0x94   :  { %75 = vrot.lane.b32.xlu0 %v65_v28, %s1305_s6 }
  0x95   :  { %408 = vmatpush.msrb.mxu0 %v342_v34  ;;  %1200 = vmatpush.msra.mxu1 %v342_v34  ;;  %v243_v33 = vpop.permute.xlu2 %242 }
  0x96   :  { %1172 = vmatmul.msk.f32.vlgmr.msra.gmra.mxu1 %vm344_vm5, %v1138_v50  ;;  %1165 = vmatmul.msk.f32.vlgmr.msrb.gmra.mxu0 %vm344_vm5, %v1131_v51  ;;  %v132_v55 = vpop.permute.xlu1 %131 }
  0x97   :  { %vm176_vm8 = vcmp.eq.s32.totalorder %v132_v55, %v1507_v47 }
  0x98   :  { %v1132_v59 = vsel %vm176_vm8, 1.0, %v1304_v30  ;;  %vm283_vm8 = vcmp.eq.s32.totalorder %v261_v26, %v1507_v47 }
  0x99   :  { %v1159_v36 = vsel %vm283_vm8, 1.0, %v1304_v30 }
  0x9c   :  { %230 = vperm.xlu0 %1214, %v1487_v37  }
  0x9d   :  { %v168_v43 = vpop.permute.xlu2 %167 }
  0x9e   :  { %1173 = vmatmul.msk.f32.gmra.mxu1 %vm344_vm5, %v1139_v58  ;;  %1166 = vmatmul.msk.f32.gmra.mxu0 %vm344_vm5, %v1132_v59  ;;  %v258_v10 = vpop.permute.xlu1 %257 }
  0x9f   :  { %vm282_vm4 = vcmp.eq.s32.totalorder %v258_v10, %v1507_v47 }
  0xa0   :  { %v1158_v31 = vsel %vm282_vm4, 1.0, %v1304_v30  ;;  %vm277_vm4 = vcmp.eq.s32.totalorder %v243_v33, %v1507_v47 }
  0xa1   :  { %v1153_v60 = vsel %vm277_vm4, 1.0, %v1304_v30 }
  0xa4   :  { %254 = vperm.xlu0 %1214, %v1493_v40  }
  0xa5   :  { %v144_v58 = vpop.permute.xlu2 %143 }
  0xa6   :  { %1174 = vmatmul.msk.f32.gmra.mxu1 %vm344_vm5, %v1140_v62  ;;  %1167 = vmatmul.msk.f32.gmra.mxu0 %vm344_vm5, %v1133_v63  ;;  %v240_v24 = vpop.permute.xlu1 %239  ;;  %vm180_vm7 = vcmp.eq.s32.totalorder %v144_v58, %v1507_v47 }
  0xa7   :  { %vm276_vm14 = vcmp.eq.s32.totalorder %v240_v24, %v1507_v47  ;;  %v1136_v63 = vsel %vm180_vm7, 1.0, %v1304_v30 }
  0xa8   :  { %v1152_v50 = vsel %vm276_vm14, 1.0, %v1304_v30 }
  0xac   :  { %236 = vperm.xlu0 %1214, %v1499_v42  }
  0xae   :  { %1175 = vmatmul.msk.f32.gmra.mxu1 %vm344_vm5, %v1141_v1  ;;  %v165_v32 = vpop.permute.xlu1 %164  ;;  %v270_v1 = vpop.permute.xlu2 %269 }
  0xaf   :  { %vm187_vm12 = vcmp.eq.s32.totalorder %v165_v32, %v1507_v47 }
  0xb4   :  { %161 = vperm.xlu0 %1214, %v100_v45   ;;  %v1143_v45 = vsel %vm187_vm12, 1.0, %v1304_v30 }
  0xb6   :  { %v141_v39 = vpop.permute.xlu1 %140 }
  0xb7   :  { %vm179_vm15 = vcmp.eq.s32.totalorder %v141_v39, %v1507_v47 }
  0xb8   :  { %v1135_v51 = vsel %vm179_vm15, 1.0, %v1304_v30 }
  0xbc   :  { %137 = vperm.xlu0 %1214, %v92_v49  }
  0xbe   :  { %v267_v48 = vpop.permute.xlu1 %266 }
  0xbf   :  { %vm285_vm8 = vcmp.eq.s32.totalorder %v267_v48, %v1507_v47 }
  0xc4   :  { %263 = vperm.xlu0 %1214, %v1537_v57  }
  0xc6   :  { %v249_v62 = vpop.permute.xlu1 %248 }
  0xcc   :  { %245 = vperm.xlu0 %1214, %v1549_v61  }
  0xce   :  { %v174_v10 = vpop.permute.xlu1 %173 }
  0xcf   :  { %vm190_vm14 = vcmp.eq.s32.totalorder %v174_v10, %v1507_v47 }
  0xd4   :  { %170 = vperm.xlu0 %1214, %v103_v0   ;;  %v1161_v0 = vsel %vm285_vm8, 1.0, %v1304_v30 }
  0xdc   :  { %146 = vperm.xlu0 %1214, %v95_v5  }
  0xfd   :  { %v78_v6 = vpop.permute.xlu0 %77 }
  0xfe   :  { %82 = vst.msk [vmem:[#allocation3 + $0x8] sm:$0xff] %vm2028_vm1, %v78_v6 }
 0x105   :  { %v459_v7 = vld [vmem:[#allocation3 + $0x8] sm:$0xff] }
 0x106   :  { %v76_v9 = vpop.permute.xlu0 %75  ;;  %522 = vmatpush.msra.mxu2 %v459_v7  ;;  %1201 = vmatpush.msra.mxu3 %v459_v7 }
 0x107   :  { %81 = vst.msk [vmem:[#allocation3] sm:$0xff] %vm2028_vm1, %v76_v9 }
 0x10e   :  { %v231_v12 = vpop.permute.xlu0 %230  ;;  %v458_v13 = vld [vmem:[#allocation3] sm:$0xff] }
 0x10f   :  { %523 = vmatpush.msra.mxu2 %v458_v13  ;;  %1202 = vmatpush.msra.mxu3 %v458_v13  ;;  %vm273_vm3 = vcmp.eq.s32.totalorder %v231_v12, %v1507_v47 }
 0x110   :  { %1181 = vmatmul.msk.f32.vlgmr.msra.gmra.mxu2 %vm344_vm5, %v1147_v15  ;;  %1190 = vmatmul.msk.f32.vlgmr.msra.gmra.mxu3 %vm344_vm5, %v1156_v17  ;;  %v1149_v28 = vsel %vm273_vm3, 1.0, %v1304_v30  ;;  %v1146_v15 = vsel %vm190_vm14, 1.0, %v1304_v30 }
 0x113   :  { %v1649_v24 = vpop.f32.mrf.mxu0 }
 0x114   :  { %2049 = vst [vmem:[#allocation10_spill] sm:$0xff] %v1649_v24 }
 0x116   :  { %v255_v18 = vpop.permute.xlu0 %254 }
 0x117   :  { %vm281_vm0 = vcmp.eq.s32.totalorder %v255_v18, %v1507_v47  ;;  %v1645_v18 = vpop.f32.mrf.mxu1 }
 0x118   :  { %v1157_v25 = vsel %vm281_vm0, 1.0, %v1304_v30  ;;  %1182 = vmatmul.msk.f32.gmra.mxu2 %vm344_vm5, %v1148_v22  ;;  %vm188_vm0 = vcmp.eq.s32.totalorder %v168_v43, %v1507_v47  ;;  %2048 = vst [vmem:[#allocation9_spill] sm:$0xff] %v1645_v18 }
 0x119   :  { %1191 = vmatmul.msk.f32.gmra.mxu3 %vm344_vm5, %v1157_v25  ;;  %v1144_v52 = vsel %vm188_vm0, 1.0, %v1304_v30 }
 0x11e   :  { %v237_v27 = vpop.permute.xlu0 %236 }
 0x11f   :  { %vm275_vm11 = vcmp.eq.s32.totalorder %v237_v27, %v1507_v47  ;;  %v1647_v22 = vpop.f32.mrf.mxu1  ;;  %v598_v27 = vld [vmem:[%s2027_s1 + $0x48] sm:$0xff] }
 0x120   :  { %1183 = vmatmul.msk.f32.gmra.mxu2 %vm344_vm5, %v1149_v28  ;;  %v1151_v44 = vsel %vm275_vm11, 1.0, %v1304_v30  ;;  %vm286_vm11 = vcmp.eq.s32.totalorder %v270_v1, %v1507_v47 }
 0x121   :  { %1192 = vmatmul.msk.f32.gmra.mxu3 %vm344_vm5, %v1158_v31  ;;  %v1162_v9 = vsel %vm286_vm11, 1.0, %v1304_v30 }
 0x126   :  { %v162_v34 = vpop.permute.xlu0 %161 }
 0x127   :  { %vm186_vm10 = vcmp.eq.s32.totalorder %v162_v34, %v1507_v47  ;;  %v1651_v25 = vpop.f32.mrf.mxu1  ;;  %v1664_v34 = vld [vmem:[%s2026_s7] ss:$0 sm:$0xff] }
 0x128   :  { %v1142_v38 = vsel %vm186_vm10, 1.0, %v1304_v30  ;;  %1184 = vmatmul.msk.f32.gmra.mxu2 %vm344_vm5, %v1150_v35 }
 0x129   :  { %1176 = vmatmul.msk.f32.gmra.mxu1 %vm344_vm5, %v1142_v38  ;;  %1193 = vmatmul.msk.f32.gmra.mxu3 %vm344_vm5, %v1159_v36  ;;  %v1666_v38 = vpop.f32.mrf.mxu0 }
 0x12a   :  { %2050 = vst [vmem:[#allocation11_spill] sm:$0xff] %v1666_v38 }
 0x12e   :  { %v138_v41 = vpop.permute.xlu0 %137 }
 0x12f   :  { %vm178_vm13 = vcmp.eq.s32.totalorder %v138_v41, %v1507_v47  ;;  %v1673_v48 = vpop.f32.mrf.mxu1 }
 0x130   :  { %v1134_v46 = vsel %vm178_vm13, 1.0, %v1304_v30  ;;  %1185 = vmatmul.msk.f32.gmra.mxu2 %vm344_vm5, %v1151_v44  ;;  %vm279_vm13 = vcmp.eq.s32.totalorder %v249_v62, %v1507_v47  ;;  %v590_v44 = vld [vmem:[%s2027_s1 + $0x8] sm:$0xff] }
 0x131   :  { %1168 = vmatmul.msk.f32.gmra.mxu0 %vm344_vm5, %v1134_v46  ;;  %1177 = vmatmul.msk.f32.gmra.mxu1 %vm344_vm5, %v1143_v45  ;;  %v1155_v13 = vsel %vm279_vm13, 1.0, %v1304_v30  ;;  %v1682_v1 = vpop.f32.mrf.mxu0 }
 0x132   :  { %2051 = vst [vmem:[#allocation12_spill] sm:$0xff] %v1682_v1 }
 0x136   :  { %v264_v49 = vpop.permute.xlu0 %263 }
 0x137   :  { %vm284_vm3 = vcmp.eq.s32.totalorder %v264_v49, %v1507_v47 }
 0x138   :  { %v1160_v55 = vsel %vm284_vm3, 1.0, %v1304_v30  ;;  %1186 = vmatmul.msk.f32.gmra.mxu2 %vm344_vm5, %v1152_v50 }
 0x139   :  { %1169 = vmatmul.msk.f32.gmra.mxu0 %vm344_vm5, %v1135_v51  ;;  %1178 = vmatmul.msk.f32.gmra.mxu1 %vm344_vm5, %v1144_v52  ;;  %v599_v51 = vld [vmem:[%s2027_s1 + $0x50] sm:$0xff] }
 0x13a   :  { %1194 = vmatmul.msk.f32.gmra.mxu3 %vm344_vm5, %v1160_v55 }
 0x13e   :  { %v246_v59 = vpop.permute.xlu0 %245 }
 0x13f   :  { %vm278_vm10 = vcmp.eq.s32.totalorder %v246_v59, %v1507_v47 }
 0x140   :  { %1187 = vmatmul.msk.f32.gmra.mxu2 %vm344_vm5, %v1153_v60  ;;  %v1154_v6 = vsel %vm278_vm10, 1.0, %v1304_v30 }
 0x141   :  { %1170 = vmatmul.msk.f32.gmra.mxu0 %vm344_vm5, %v1136_v63 }
 0x142   :  { %1195 = vmatmul.msk.f32.gmra.mxu3 %vm344_vm5, %v1161_v0 }
 0x146   :  { %v171_v5 = vpop.permute.xlu0 %170 }
 0x147   :  { %vm189_vm12 = vcmp.eq.s32.totalorder %v171_v5, %v1507_v47 }
 0x148   :  { %v1145_v7 = vsel %vm189_vm12, 1.0, %v1304_v30  ;;  %1188 = vmatmul.msk.f32.gmra.mxu2 %vm344_vm5, %v1154_v6  ;;  %v591_v6 = vld [vmem:[%s2027_s1 + $0x10] sm:$0xff] }
 0x149   :  { %1179 = vmatmul.msk.f32.gmra.mxu1 %vm344_vm5, %v1145_v7 }
 0x14a   :  { %1196 = vmatmul.msk.f32.gmra.mxu3 %vm344_vm5, %v1162_v9 }
 0x14e   :  { %v147_v12 = vpop.permute.xlu0 %146 }
 0x14f   :  { %vm181_vm15 = vcmp.eq.s32.totalorder %v147_v12, %v1507_v47  ;;  %v589_v47 = vld [vmem:[%s2027_s1] sm:$0xff] }
 0x150   :  { %v1137_v17 = vsel %vm181_vm15, 1.0, %v1304_v30  ;;  %1189 = vmatmul.msk.f32.gmra.mxu2 %vm344_vm5, %v1155_v13 }
 0x151   :  { %1171 = vmatmul.msk.f32.gmra.mxu0 %vm344_vm5, %v1137_v17  ;;  %1180 = vmatmul.msk.f32.gmra.mxu1 %vm344_vm5, %v1146_v15 }
 0x193   :  { %v525_v26 = vpop.f32.mrf.mxu2  ;;  %v552_v30 = vpop.f32.mrf.mxu3 }
 0x194   :  { %v573_v28 = vadd.f32 %v525_v26, %v1649_v24  ;;  %v582_v31 = vadd.f32 %v552_v30, %v1651_v25 }
 0x196   :  { %v605_v32 = vadd.f32 %v589_v47, %v573_v28  ;;  %v614_v33 = vadd.f32 %v598_v27, %v582_v31  ;;  %v600_v47 = vld [vmem:[%s2027_s1 + $0x58] sm:$0xff] }
 0x198   :  { %v637_v35 = vmul.f32 0.2, %v605_v32  ;;  %v646_v36 = vmul.f32 0.2, %v614_v33  ;;  %vm630_vm5 = vcmp.gt.f32.partialorder %v614_v33, 0.0  ;;  %vm621_vm0 = vcmp.gt.f32.partialorder %v605_v32, 0.0 }
 0x19a   :  { %v662_v39 = vsel %vm630_vm5, %v614_v33, %v646_v36  ;;  %v653_v41 = vsel %vm621_vm0, %v605_v32, %v637_v35 }
 0x19b   :  { %v528_v43 = vpop.f32.mrf.mxu2  ;;  %v679_v45 = vmul.f32 %v1664_v34, %v662_v39  ;;  %v670_v46 = vmul.f32 %v1664_v34, %v653_v41 }
 0x19c   :  { %v574_v49 = vadd.f32 %v528_v43, %v1666_v38  ;;  %v555_v50 = vpop.f32.mrf.mxu3 }
 0x19d   :  { %v583_v52 = vadd.f32 %v555_v50, %v1673_v48  ;;  %v714_v55 = vsel %vm2028_vm1, %v679_v45, 0.0  ;;  %v687_v58 = vsel %vm2028_vm1, %v670_v46, 0.0  ;;  %v601_v45 = vld [vmem:[%s2027_s1 + $0x60] sm:$0xff] }
 0x19e   :  { %v606_v59 = vadd.f32 %v590_v44, %v574_v49  ;;  %715 = vadd.xlane.f32.xlu1 %v714_v55  ;;  %688 = vadd.xlane.f32.xlu2 %v687_v58  ;;  %v592_v49 = vld [vmem:[%s2027_s1 + $0x18] sm:$0xff] }
 0x19f   :  { %v615_v60 = vadd.f32 %v599_v51, %v583_v52 }
 0x1a0   :  { %v638_v62 = vmul.f32 0.2, %v606_v59  ;;  %vm622_vm3 = vcmp.gt.f32.partialorder %v606_v59, 0.0 }
 0x1a1   :  { %v647_v63 = vmul.f32 0.2, %v615_v60  ;;  %vm631_vm4 = vcmp.gt.f32.partialorder %v615_v60, 0.0 }
 0x1a2   :  { %v654_v0 = vsel %vm622_vm3, %v606_v59, %v638_v62 }
 0x1a3   :  { %v531_v5 = vpop.f32.mrf.mxu2  ;;  %v671_v7 = vmul.f32 %v1664_v34, %v654_v0  ;;  %v663_v9 = vsel %vm631_vm4, %v615_v60, %v647_v63 }
 0x1a4   :  { %v575_v10 = vadd.f32 %v531_v5, %v1682_v1  ;;  %v558_v12 = vpop.f32.mrf.mxu3  ;;  %v680_v13 = vmul.f32 %v1664_v34, %v663_v9 }
 0x1a5   :  { %v690_v15 = vsel %vm2028_vm1, %v671_v7, 0.0  ;;  %v593_v7 = vld [vmem:[%s2027_s1 + $0x20] sm:$0xff] }
 0x1a6   :  { %v607_v17 = vadd.f32 %v591_v6, %v575_v10  ;;  %v1691_v26 = vpop.f32.mrf.mxu1  ;;  %691 = vadd.xlane.f32.xlu0 %v690_v15  ;;  %v717_v30 = vsel %vm2028_vm1, %v680_v13, 0.0 }
 0x1a7   :  { %v584_v27 = vadd.f32 %v558_v12, %v1691_v26  ;;  %718 = vadd.xlane.f32.xlu2 %v717_v30 }
 0x1a8   :  { %v639_v28 = vmul.f32 0.2, %v607_v17  ;;  %vm623_vm7 = vcmp.gt.f32.partialorder %v607_v17, 0.0 }
 0x1a9   :  { %v616_v31 = vadd.f32 %v600_v47, %v584_v27 }
 0x1aa   :  { %v655_v32 = vsel %vm623_vm7, %v607_v17, %v639_v28  ;;  %vm2031_vm7 = vcmp.ge.s32.totalorder %v1366_v3, 0 }
 0x1ab   :  { %v648_v33 = vmul.f32 0.2, %v616_v31  ;;  %v534_v35 = vpop.f32.mrf.mxu2  ;;  %v672_v36 = vmul.f32 %v1664_v34, %v655_v32  ;;  %vm632_vm8 = vcmp.gt.f32.partialorder %v616_v31, 0.0 }
 0x1ac   :  { %v561_v39 = vpop.f32.mrf.mxu3 }
 0x1ad   :  { %v693_v41 = vsel %vm2028_vm1, %v672_v36, 0.0  ;;  %v664_v43 = vsel %vm632_vm8, %v616_v31, %v648_v33  ;;  %v602_v31 = vld [vmem:[%s2027_s1 + $0x68] sm:$0xff]  ;;  %vm2039_vm8 = vcmp.ge.s32.totalorder %v1374_v4, 0 }
 0x1ae   :  { %v1700_v44 = vpop.f32.mrf.mxu1  ;;  %694 = vadd.xlane.f32.xlu1 %v693_v41  ;;  %v1705_v46 = vpop.f32.mrf.mxu0  ;;  %v681_v50 = vmul.f32 %v1664_v34, %v664_v43  ;;  %v594_v36 = vld [vmem:[%s2027_s1 + $0x28] sm:$0xff] }
 0x1af   :  { %2052 = vst [vmem:[#allocation13_spill] sm:$0xff] %v1705_v46  ;;  %v585_v51 = vadd.f32 %v561_v39, %v1700_v44  ;;  %v576_v52 = vadd.f32 %v534_v35, %v1705_v46 }
 0x1b0   :  { %v720_v55 = vsel %vm2028_vm1, %v681_v50, 0.0 }
 0x1b1   :  { %v617_v58 = vadd.f32 %v601_v45, %v585_v51  ;;  %v608_v59 = vadd.f32 %v592_v49, %v576_v52  ;;  %721 = vadd.xlane.f32.xlu0 %v720_v55 }
 0x1b3   :  { %v649_v60 = vmul.f32 0.2, %v617_v58  ;;  %v640_v62 = vmul.f32 0.2, %v608_v59  ;;  %v537_v63 = vpop.f32.mrf.mxu2  ;;  %vm633_vm10 = vcmp.gt.f32.partialorder %v617_v58, 0.0  ;;  %vm624_vm11 = vcmp.gt.f32.partialorder %v608_v59, 0.0 }
 0x1b5   :  { %v665_v0 = vsel %vm633_vm10, %v617_v58, %v649_v60  ;;  %v656_v5 = vsel %vm624_vm11, %v608_v59, %v640_v62  ;;  %vm330_vm10 = vcmp.ge.s32.totalorder %v1499_v42, 0  ;;  %vm335_vm11 = vcmp.ge.s32.totalorder %v1390_v8, 0 }
 0x1b6   :  { %v1714_v6 = vpop.f32.mrf.mxu0  ;;  %v682_v9 = vmul.f32 %v1664_v34, %v665_v0  ;;  %v673_v10 = vmul.f32 %v1664_v34, %v656_v5  ;;  %v1724_v27 = vpop.f32.mrf.mxu1 }
 0x1b7   :  { %2053 = vst [vmem:[#allocation14_spill] sm:$0xff] %v1714_v6  ;;  %v577_v12 = vadd.f32 %v537_v63, %v1714_v6  ;;  %v603_v63 = vld [vmem:[%s2027_s1 + $0x70] sm:$0xff] }
 0x1b8   :  { %v723_v13 = vsel %vm2028_vm1, %v682_v9, 0.0  ;;  %v696_v15 = vsel %vm2028_vm1, %v673_v10, 0.0 }
 0x1b9   :  { %v609_v17 = vadd.f32 %v593_v7, %v577_v12  ;;  %724 = vadd.xlane.f32.xlu1 %v723_v13  ;;  %697 = vadd.xlane.f32.xlu2 %v696_v15  ;;  %v596_v13 = vld [vmem:[%s2027_s1 + $0x38] sm:$0xff] }
 0x1bb   :  { %v641_v47 = vmul.f32 0.2, %v609_v17  ;;  %v540_v30 = vpop.f32.mrf.mxu2  ;;  %vm625_vm12 = vcmp.gt.f32.partialorder %v609_v17, 0.0 }
 0x1bd   :  { %v564_v28 = vpop.f32.mrf.mxu3  ;;  %v657_v32 = vsel %vm625_vm12, %v609_v17, %v641_v47  ;;  %vm331_vm12 = vcmp.ge.s32.totalorder %v1423_v16, 0 }
 0x1be   :  { %v586_v33 = vadd.f32 %v564_v28, %v1724_v27  ;;  %v1730_v35 = vpop.f32.mrf.mxu0  ;;  %v674_v39 = vmul.f32 %v1664_v34, %v657_v32 }
 0x1bf   :  { %2054 = vst [vmem:[#allocation15_spill] sm:$0xff] %v1730_v35  ;;  %v578_v41 = vadd.f32 %v540_v30, %v1730_v35 }
 0x1c0   :  { %v618_v43 = vadd.f32 %v602_v31, %v586_v33  ;;  %v699_v45 = vsel %vm2028_vm1, %v674_v39, 0.0  ;;  %v595_v31 = vld [vmem:[%s2027_s1 + $0x30] sm:$0xff]  ;;  %v604_v33 = vld [vmem:[%s2027_s1 + $0x78] sm:$0xff] }
 0x1c1   :  { %v610_v49 = vadd.f32 %v594_v36, %v578_v41  ;;  %700 = vadd.xlane.f32.xlu2 %v699_v45 }
 0x1c2   :  { %v650_v50 = vmul.f32 0.2, %v618_v43  ;;  %vm634_vm13 = vcmp.gt.f32.partialorder %v618_v43, 0.0 }
 0x1c3   :  { %v642_v51 = vmul.f32 0.2, %v610_v49  ;;  %v543_v52 = vpop.f32.mrf.mxu2  ;;  %vm626_vm14 = vcmp.gt.f32.partialorder %v610_v49, 0.0 }
 0x1c4   :  { %v666_v55 = vsel %vm634_vm13, %v618_v43, %v650_v50  ;;  %vm333_vm13 = vcmp.ge.s32.totalorder %v1549_v61, 0 }
 0x1c5   :  { %v567_v58 = vpop.f32.mrf.mxu3  ;;  %v658_v59 = vsel %vm626_vm14, %v610_v49, %v642_v51  ;;  %v683_v60 = vmul.f32 %v1664_v34, %v666_v55  ;;  %vm751_vm14 = vcmask 7168  }
 0x1c6   :  { %v1739_v62 = vpop.f32.mrf.mxu1  ;;  %v675_v0 = vmul.f32 %v1664_v34, %v658_v59  ;;  %v597_v59 = vld [vmem:[%s2027_s1 + $0x40] sm:$0xff]  ;;  %s1306_s1 = smov -1e+30  }
 0x1c7   :  { %v587_v5 = vadd.f32 %v567_v58, %v1739_v62  ;;  %84 = sst [smem:[#allocation4]] %s1306_s1 }
 0x1c8   :  { %v702_v7 = vsel %vm2028_vm1, %v675_v0, 0.0 }
 0x1c9   :  { %v619_v9 = vadd.f32 %v603_v63, %v587_v5  ;;  %703 = vadd.xlane.f32.xlu0 %v702_v7 }
 0x1cb   :  { %v651_v10 = vmul.f32 0.2, %v619_v9  ;;  %v546_v12 = vpop.f32.mrf.mxu2  ;;  %vm635_vm15 = vcmp.gt.f32.partialorder %v619_v9, 0.0 }
 0x1cc   :  { %v580_v15 = vadd.f32 %v546_v12, %v1645_v18 }
 0x1cd   :  { %v570_v17 = vpop.f32.mrf.mxu3  ;;  %v667_v47 = vsel %vm635_vm15, %v619_v9, %v651_v10  ;;  %vm328_vm15 = vcmp.ge.s32.totalorder %v1487_v37, 0 }
 0x1ce   :  { %v612_v30 = vadd.f32 %v596_v13, %v580_v15  ;;  %v1751_v28 = vpop.f32.mrf.mxu0  ;;  %v1756_v32 = vpop.f32.mrf.mxu1  ;;  %v684_v36 = vmul.f32 %v1664_v34, %v667_v47 }
 0x1cf   :  { %2055 = vst [vmem:[#allocation16_spill] sm:$0xff] %v1751_v28  ;;  %v579_v39 = vadd.f32 %v543_v52, %v1751_v28  ;;  %v588_v41 = vadd.f32 %v570_v17, %v1756_v32 }
 0x1d0   :  { %v644_v43 = vmul.f32 0.2, %v612_v30  ;;  %vm628_vm5 = vcmp.gt.f32.partialorder %v612_v30, 0.0 }
 0x1d1   :  { %v611_v45 = vadd.f32 %v595_v31, %v579_v39  ;;  %v620_v49 = vadd.f32 %v604_v33, %v588_v41  ;;  %v729_v39 = vsel %vm2028_vm1, %v684_v36, 0.0 }
 0x1d2   :  { %v660_v50 = vsel %vm628_vm5, %v612_v30, %v644_v43  ;;  %v726_v30 = vsel %vm2028_vm1, %v683_v60, 0.0  ;;  %vm329_vm5 = vcmp.ge.s32.totalorder %v1402_v11, 0 }
 0x1d3   :  { %v643_v51 = vmul.f32 0.2, %v611_v45  ;;  %v652_v55 = vmul.f32 0.2, %v620_v49  ;;  %v549_v58 = vpop.f32.mrf.mxu2  ;;  %v677_v63 = vmul.f32 %v1664_v34, %v660_v50  ;;  %vm627_vm0 = vcmp.gt.f32.partialorder %v611_v45, 0.0 }
 0x1d4   :  { %v581_v0 = vadd.f32 %v549_v58, %v1647_v22  ;;  %vm636_vm3 = vcmp.gt.f32.partialorder %v620_v49, 0.0 }
 0x1d5   :  { %v708_v52 = vsel %vm2028_vm1, %v677_v63, 0.0  ;;  %v659_v5 = vsel %vm627_vm0, %v611_v45, %v643_v51  ;;  %v668_v7 = vsel %vm636_vm3, %v620_v49, %v652_v55  ;;  %vm332_vm0 = vcmp.ge.s32.totalorder %v1456_v23, 0 }
 0x1d6   :  { %v613_v9 = vadd.f32 %v597_v59, %v581_v0  ;;  %709 = vadd.xlane.f32.xlu2 %v708_v52  ;;  %v676_v10 = vmul.f32 %v1664_v34, %v659_v5  ;;  %v685_v12 = vmul.f32 %v1664_v34, %v668_v7  ;;  %vm336_vm3 = vcmp.ge.s32.totalorder %v1493_v40, 0 }
 0x1d8   :  { %v645_v13 = vmul.f32 0.2, %v613_v9  ;;  %v705_v15 = vsel %vm2028_vm1, %v676_v10, 0.0  ;;  %vm629_vm4 = vcmp.gt.f32.partialorder %v613_v9, 0.0  ;;  %v732_v33 = vsel %vm2028_vm1, %v685_v12, 0.0 }
 0x1d9   :  { %706 = vadd.xlane.f32.xlu1 %v705_v15 }
 0x1da   :  { %v661_v17 = vsel %vm629_vm4, %v613_v9, %v645_v13  ;;  %vm334_vm4 = vcmp.ge.s32.totalorder %v1441_v20, 0 }
 0x1db   :  { %v678_v47 = vmul.f32 %v1664_v34, %v661_v17 }
 0x1dd   :  { %v711_v31 = vsel %vm2028_vm1, %v678_v47, 0.0  ;;  %vm339_vm1 = vcmp.ge.s32.totalorder %v1537_v57, 0 }
 0x1de   :  { %727 = vadd.xlane.f32.xlu2 %v726_v30  ;;  %712 = vadd.xlane.f32.xlu0 %v711_v31 }
 0x1e1   :  { %733 = vadd.xlane.f32.xlu1 %v732_v33 }
 0x1e6   :  { %730 = vadd.xlane.f32.xlu0 %v729_v39 }
 0x211   :  { %v1778_v41 = vpop.xlane.xlu2 %688  ;;  %v1782_v45 = vpop.xlane.xlu1 %715 }
 0x212   :  { %v735_v63 = vsel %vm2031_vm7, %v1778_v41, -1e+30  ;;  %v744_v9 = vsel %vm335_vm11, %v1782_v45, -1e+30  ;;  %vm341_vm7 = vcmp.ge.s32.totalorder %v1472_v29, 0 }
 0x213   :  { %v752_v12 = vsel %vm751_vm14, %v735_v63, -inf }
 0x219   :  { %v1786_v34 = vpop.xlane.xlu0 %691 }
 0x21a   :  { %v1780_v43 = vpop.xlane.xlu2 %718  ;;  %v736_v0 = vsel %vm2039_vm8, %v1786_v34, -1e+30  ;;  %vm340_vm8 = vcmp.ge.s32.totalorder %v1435_v19, 0 }
 0x21b   :  { %v753_v30 = vsel %vm751_vm14, %v736_v0, -inf  ;;  %v745_v0 = vsel %vm336_vm3, %v1780_v43, -1e+30 }
 0x221   :  { %v1788_v60 = vpop.xlane.xlu1 %694 }
 0x222   :  { %v737_v13 = vsel %vm328_vm15, %v1788_v60, -1e+30 }
 0x224   :  { %v1790_v50 = vpop.xlane.xlu0 %721 }
 0x22c   :  { %v1784_v49 = vpop.xlane.xlu2 %697  ;;  %v1794_v55 = vpop.xlane.xlu1 %724 }
 0x22d   :  { %v738_v15 = vsel %vm329_vm5, %v1784_v49, -1e+30 }
 0x234   :  { %v1792_v51 = vpop.xlane.xlu2 %700 }
 0x235   :  { %v739_v52 = vsel %vm330_vm10, %v1792_v51, -1e+30 }
 0x236   :  { %v756_v17 = vsel %vm751_vm14, %v739_v52, -inf }
 0x237   :  { %v757_v56 = vmax.f32 %v752_v12, %v756_v17  ;;  %v768_v17 = vsel %vm751_vm14, %v745_v0, -inf }
 0x23c   :  { %v1796_v36 = vpop.xlane.xlu0 %703 }
 0x23d   :  { %v740_v5 = vsel %vm331_vm12, %v1796_v36, -1e+30 }
 0x23e   :  { %v758_v31 = vsel %vm751_vm14, %v740_v5, -inf  ;;  %v754_v5 = vsel %vm751_vm14, %v737_v13, -inf }
 0x23f   :  { %v759_v54 = vmax.f32 %v753_v30, %v758_v31 }
 0x249   :  { %v1798_v58 = vpop.xlane.xlu2 %709 }
 0x24a   :  { %v742_v7 = vsel %vm333_vm13, %v1798_v58, -1e+30 }
 0x24b   :  { %v762_v33 = vsel %vm751_vm14, %v742_v7, -inf  ;;  %v755_v7 = vsel %vm751_vm14, %v738_v15, -inf  ;;  %v766_v15 = vsel %vm751_vm14, %v744_v9, -inf }
 0x24c   :  { %v1806_v59 = vpop.xlane.xlu1 %706  ;;  %v763_v24 = vmax.f32 %v755_v7, %v762_v33  ;;  %v767_v31 = vmax.f32 %v759_v54, %v766_v15 }
 0x24d   :  { %v741_v10 = vsel %vm332_vm0, %v1806_v59, -1e+30 }
 0x24e   :  { %v760_v63 = vsel %vm751_vm14, %v741_v10, -inf  ;;  %v746_v10 = vsel %vm337_vm9, %v1790_v50, -1e+30 }
 0x24f   :  { %v761_v38 = vmax.f32 %v754_v5, %v760_v63  ;;  %v770_v46 = vsel %vm751_vm14, %v746_v10, -inf }
 0x250   :  { %v771_v5 = vmax.f32 %v763_v24, %v770_v46 }
 0x251   :  { %v1844_v47 = vpop.xlane.xlu0 %712  ;;  %v1854_v2 = vpop.xlane.xlu2 %727  ;;  %v769_v6 = vmax.f32 %v761_v38, %v768_v17 }
 0x252   :  { %v743_v39 = vsel %vm334_vm4, %v1844_v47, -1e+30  ;;  %v748_v13 = vsel %vm339_vm1, %v1854_v2, -1e+30 }
 0x253   :  { %v764_v52 = vsel %vm751_vm14, %v743_v39, -inf  ;;  %v747_v39 = vsel %vm338_vm6, %v1794_v55, -1e+30  ;;  %v774_v33 = vsel %vm751_vm14, %v748_v13, -inf }
 0x254   :  { %v1863_v53 = vpop.xlane.xlu1 %733  ;;  %v765_v1 = vmax.f32 %v757_v56, %v764_v52  ;;  %v772_v30 = vsel %vm751_vm14, %v747_v39, -inf  ;;  %v775_v35 = vmax.f32 %v767_v31, %v774_v33 }
 0x255   :  { %v750_v12 = vsel %vm341_vm7, %v1863_v53, -1e+30 }
 0x256   :  { %v778_v63 = vsel %vm751_vm14, %v750_v12, -inf  ;;  %v773_v52 = vmax.f32 %v765_v1, %v772_v30 }
 0x257   :  { %v779_v0 = vmax.f32 %v771_v5, %v778_v63 }
 0x258   :  { %v780_v10 = vmax.f32 %v773_v52, %v775_v35 }
 0x259   :  { %v731_v56 = vpop.xlane.xlu0 %730 }
 0x25a   :  { %v749_v7 = vsel %vm340_vm8, %v731_v56, -1e+30 }
 0x25b   :  { %v776_v9 = vsel %vm751_vm14, %v749_v7, -inf }
 0x25c   :  { %v777_v28 = vmax.f32 %v769_v6, %v776_v9 }
 0x25e   :  { %v781_v18 = vmax.f32 %v777_v28, %v779_v0 }
 0x260   :  { %v782_v39 = vmax.f32 %v780_v10, %v781_v18 }
 0x262   :  { %783 = vmax.xlane.f32.xlu2 %v782_v39 }
 0x2d5   :  { %v784_v54 = vpop.xlane.xlu2 %783 }
 0x2d6   :  { %v785_v13 = vrot.slane %v784_v54, 4 }
 0x2d8   :  { %v786_v12 = vmax.f32 %v784_v54, %v785_v13 }
 0x2da   :  { %v787_v1 = vrot.slane %v786_v12, 2 }
 0x2dc   :  { %v788_v24 = vmax.f32 %v786_v12, %v787_v1 }
 0x2de   :  { %v789_v46 = vrot.slane %v788_v24, 1 }
 0x2e0   :  { %v790_v15 = vmax.f32 %v788_v24, %v789_v46 }
 0x2e2   :  { %1203 = vpush %v790_v15 }
 0x313   :  { %s1204_s10 = spop %1203 }
 0x314   :  { %s793_s6 = smax.f32 %s1306_s1, %s1204_s10  ;;  %p794_p0 = scmp.gt.f32.partialorder %s1204_s10, -1e+30 }
 0x315   :  { %s798_s5 = ssub.f32 (%p794_p0), -1e+30, %s793_s6  ;;  %v802_v18 = vld [vmem:[#allocation5] sm:$0xff] (%p794_p0)  ;;  %v803_v35 = vld [vmem:[#allocation5 + $0x8] sm:$0xff] (%p794_p0) }
 0x316   :  { %797 = sbr.rel (!%p794_p0) target bundleno = 805 (0x325), region = 41  ;;  %810 = sst [smem:[#allocation4]] (%p794_p0), %s793_s6 }
 0x317   :  { %v799_v38 = vstv (%p794_p0), %s798_s5 }
 0x318   :  { %v800_v6 = vmul.f32 (%p794_p0), 1.442695, %v799_v38 }
 0x31a   :  { %1218 = vpow2.f32 (%p794_p0), %v800_v6 }
 0x320   :  { %v1219_v28 = vpop.eup %1218 }
 0x321   :  { %v804_v17 = vmul.f32 %v1219_v28, %v802_v18  ;;  %v805_v30 = vmul.f32 %v1219_v28, %v803_v35 }
 0x323   :  { %807 = vst.msk [vmem:[#allocation5] sm:$0xff] %vm85_vm2, %v804_v17 }
 0x324   :  { %808 = vst.msk [vmem:[#allocation5 + $0x8] sm:$0xff] %vm85_vm2, %v805_v30 }
 0x325 PF:  { %v2056_v31 = vmov 0   ;;  %v1890_v33 = vstv %s793_s6  ;;  %s1307_s11 = smov 32  }
 0x326   :  { %1220 = vset.pattern.permute.xlu0 %v2056_v31  ;;  %1226 = vset.pattern.permute.xlu1 %v2056_v31  ;;  %v827_v63 = vsub.f32 %v1863_v53, %v1890_v33  ;;  %v826_v52 = vsub.f32 %v731_v56, %v1890_v33  ;;  %v824_v5 = vsub.f32 %v1794_v55, %v1890_v33 }
 0x327   :  { %1227 = vset.pattern.permute.xlu2 %v2056_v31  ;;  %v825_v7 = vsub.f32 %v1854_v2, %v1890_v33  ;;  %v823_v53 = vsub.f32 %v1790_v50, %v1890_v33  ;;  %v822_v56 = vsub.f32 %v1780_v43, %v1890_v33  ;;  %v821_v29 = vsub.f32 %v1782_v45, %v1890_v33 }
 0x328   :  { %v858_v9 = vmul.f32 1.442695, %v827_v63  ;;  %v856_v0 = vmul.f32 1.442695, %v826_v52  ;;  %v852_v10 = vmul.f32 1.442695, %v824_v5  ;;  %v820_v19 = vsub.f32 %v1844_v47, %v1890_v33 }
 0x329   :  { %v854_v39 = vmul.f32 1.442695, %v825_v7  ;;  %v850_v12 = vmul.f32 1.442695, %v823_v53  ;;  %v848_v46 = vmul.f32 1.442695, %v822_v56  ;;  %v819_v45 = vsub.f32 %v1798_v58, %v1890_v33 }
 0x32a   :  { %1267 = vpow2.f32 %v858_v9  ;;  %v846_v21 = vmul.f32 1.442695, %v821_v29  ;;  %v844_v6 = vmul.f32 1.442695, %v820_v19  ;;  %v818_v57 = vsub.f32 %v1806_v59, %v1890_v33 }
 0x32b   :  { %1269 = vpow2.f32 %v856_v0  ;;  %v842_v30 = vmul.f32 1.442695, %v819_v45  ;;  %v817_v14 = vsub.f32 %v1796_v36, %v1890_v33  ;;  %v816_v40 = vsub.f32 %v1792_v51, %v1890_v33 }
 0x32c   :  { %1271 = vpow2.f32 %v852_v10  ;;  %v840_v31 = vmul.f32 1.442695, %v818_v57  ;;  %v815_v8 = vsub.f32 %v1784_v49, %v1890_v33  ;;  %v814_v20 = vsub.f32 %v1788_v60, %v1890_v33 }
 0x32d   :  { %1273 = vpow2.f32 %v854_v39  ;;  %v838_v7 = vmul.f32 1.442695, %v817_v14  ;;  %v836_v9 = vmul.f32 1.442695, %v816_v40  ;;  %v813_v61 = vsub.f32 %v1786_v34, %v1890_v33 }
 0x32e   :  { %1275 = vpow2.f32 %v850_v12  ;;  %v834_v53 = vmul.f32 1.442695, %v815_v8  ;;  %v832_v56 = vmul.f32 1.442695, %v814_v20  ;;  %v812_v23 = vsub.f32 %v1778_v41, %v1890_v33 }
 0x32f   :  { %1277 = vpow2.f32 %v848_v46 }
 0x330   :  { %v1268_v54 = vpop.eup %1267  ;;  %1279 = vpow2.f32 %v846_v21  ;;  %v828_v12 = vmul.f32 1.442695, %v812_v23 }
 0x331   :  { %v1270_v13 = vpop.eup %1269  ;;  %v875_v55 = vsel %vm341_vm7, %v1268_v54, 0.0  ;;  %1281 = vpow2.f32 %v844_v6 }
 0x332   :  { %953 = vperm.xlu0 %1220, %v875_v55   ;;  %v874_v2 = vsel %vm340_vm8, %v1270_v13, 0.0  ;;  %v1272_v1 = vpop.eup %1271  ;;  %1283 = vpow2.f32 %v842_v30 }
 0x333   :  { %v1221_v24 = vpack.i.bf16 %v874_v2, %v875_v55  ;;  %v872_v50 = vsel %vm338_vm6, %v1272_v1, 0.0  ;;  %v1274_v15 = vpop.eup %1273  ;;  %1285 = vpow2.f32 %v840_v31  ;;  %vm2058_vm6 = vcmp.ge.s32.totalorder %v1366_v3, 0 }
 0x334   :  { %938 = vperm.xlu2 %1227, %v872_v50   ;;  %v873_v43 = vsel %vm339_vm1, %v1274_v15, 0.0  ;;  %v1276_v18 = vpop.eup %1275  ;;  %1287 = vpow2.f32 %v838_v7  ;;  %vm2057_vm1 = vcmp.ge.s32.totalorder %v1374_v4, 0 }
 0x335   :  { %1222 = vrot.lane.b32.xlu1 %v1221_v24, %s1307_s11  ;;  %v1228_v38 = vpack.i.bf16 %v872_v50, %v873_v43  ;;  %v1278_v35 = vpop.eup %1277  ;;  %v871_v28 = vsel %vm337_vm9, %v1276_v18, 0.0  ;;  %1289 = vpow2.f32 %v836_v9  ;;  %vm2059_vm9 = vcmask 261120  }
 0x336   :  { %v870_v47 = vsel %vm336_vm3, %v1278_v35, 0.0  ;;  %v1280_v63 = vpop.eup %1279  ;;  %1291 = vpow2.f32 %v834_v53  ;;  %vm2060_vm7 = vmmov %vm2059_vm9 }
 0x337   :  { %v1233_v17 = vpack.i.bf16 %v870_v47, %v871_v28  ;;  %v1282_v52 = vpop.eup %1281  ;;  %v869_v58 = vsel %vm335_vm11, %v1280_v63, 0.0  ;;  %1293 = vpow2.f32 %v832_v56  ;;  %vm2061_vm8 = vmmov %vm2060_vm7 }
 0x338   :  { %v868_v59 = vsel %vm334_vm4, %v1282_v52, 0.0  ;;  %v1284_v0 = vpop.eup %1283  ;;  %vm2063_vm11 = vmmov %vm2060_vm7 }
 0x339   :  { %v1238_v5 = vpack.i.bf16 %v868_v59, %v869_v58  ;;  %v1286_v10 = vpop.eup %1285  ;;  %v867_v36 = vsel %vm333_vm13, %v1284_v0, 0.0  ;;  %vm2065_vm13 = vmmov %vm2060_vm7 }
 0x33a   :  { %948 = vperm.xlu0 %1220, %v874_v2   ;;  %v866_v51 = vsel %vm332_vm0, %v1286_v10, 0.0  ;;  %v1288_v54 = vpop.eup %1287  ;;  %v830_v2 = vmul.f32 1.442695, %v813_v61  ;;  %vm2066_vm14 = vmmov %vm2060_vm7 }
 0x33b   :  { %v1243_v39 = vpack.i.bf16 %v866_v51, %v867_v36  ;;  %v1290_v13 = vpop.eup %1289  ;;  %v865_v49 = vsel %vm331_vm12, %v1288_v54, 0.0  ;;  %vm2064_vm12 = vmmov %vm2060_vm7 }
 0x33c   :  { %1229 = vrot.lane.b32.xlu2 %v1228_v38, %s1307_s11  ;;  %v864_v60 = vsel %vm330_vm10, %v1290_v13, 0.0  ;;  %v1292_v1 = vpop.eup %1291  ;;  %1295 = vpow2.f32 %v830_v2  ;;  %vm2062_vm10 = vmmov %vm2060_vm7 }
 0x33d   :  { %943 = vperm.xlu1 %1226, %v873_v43   ;;  %v1248_v55 = vpack.i.bf16 %v864_v60, %v865_v49  ;;  %v1294_v24 = vpop.eup %1293  ;;  %v863_v16 = vsel %vm329_vm5, %v1292_v1, 0.0  ;;  %1297 = vpow2.f32 %v828_v12  ;;  %vm2070_vm5 = vmmov %vm2060_vm7 }
 0x33e   :  { %v862_v41 = vsel %vm328_vm15, %v1294_v24, 0.0  ;;  %vm2068_vm15 = vmmov %vm2060_vm7 }
 0x33f   :  { %v1253_v34 = vpack.i.bf16 %v862_v41, %v863_v16  ;;  %vm2072_vm0 = vmmov %vm2070_vm5 }
 0x340   :  { %vm2074_vm3 = vmmov %vm2072_vm0 }
 0x341   :  { %vm2076_vm4 = vmmov %vm2072_vm0 }
 0x342   :  { %933 = vperm.xlu0 %1220, %v871_v28   ;;  %v1296_v42 = vpop.eup %1295 }
 0x343   :  { %v1298_v33 = vpop.eup %1297  ;;  %v861_v46 = vsel %vm2057_vm1, %v1296_v42, 0.0  ;;  %vm2078_vm1 = vmmov %vm2072_vm0 }
 0x344   :  { %1234 = vrot.lane.b32.xlu2 %v1233_v17, %s1307_s11  ;;  %v860_v50 = vsel %vm2058_vm6, %v1298_v33, 0.0  ;;  %vm2080_vm6 = vmmov %vm2072_vm0 }
 0x345   :  { %928 = vperm.xlu1 %1226, %v870_v47   ;;  %v1258_v15 = vpack.i.bf16 %v860_v50, %v861_v46 }
 0x34a   :  { %923 = vperm.xlu0 %1220, %v869_v58  }
 0x34c   :  { %1239 = vrot.lane.b32.xlu2 %v1238_v5, %s1307_s11 }
 0x34d   :  { %918 = vperm.xlu1 %1226, %v868_v59  }
 0x352   :  { %913 = vperm.xlu0 %1220, %v867_v36  }
 0x354   :  { %1244 = vrot.lane.b32.xlu2 %v1243_v39, %s1307_s11  ;;  %v2067_v39 = vld [vmem:[#allocation9_spill] sm:$0xff] }
 0x355   :  { %908 = vperm.xlu1 %1226, %v866_v51  }
 0x35a   :  { %903 = vperm.xlu0 %1220, %v865_v49  }
 0x35c   :  { %1249 = vrot.lane.b32.xlu2 %v1248_v55, %s1307_s11 }
 0x35d   :  { %898 = vperm.xlu1 %1226, %v864_v60   ;;  %v2071_v60 = vld [vmem:[#allocation15_spill] sm:$0xff] }
 0x362   :  { %893 = vperm.xlu0 %1220, %v863_v16   ;;  %v2073_v16 = vld [vmem:[#allocation14_spill] sm:$0xff] }
 0x364   :  { %1254 = vrot.lane.b32.xlu2 %v1253_v34, %s1307_s11 }
 0x365   :  { %888 = vperm.xlu1 %1226, %v862_v41  }
 0x36a   :  { %883 = vperm.xlu0 %1220, %v861_v46   ;;  %v2075_v46 = vld [vmem:[#allocation13_spill] sm:$0xff] }
 0x36c   :  { %1259 = vrot.lane.b32.xlu2 %v1258_v15, %s1307_s11 }
 0x36d   :  { %878 = vperm.xlu1 %1226, %v860_v50  }
 0x38e   :  { %v939_v11 = vpop.permute.xlu2 %938 }
 0x38f   :  { %v968_v28 = vmul.f32 %v939_v11, %v1700_v44 }
 0x396   :  { %v1230_v37 = vpop.permute.xlu2 %1229 }
 0x397   :  { %v1232_v57 = vunpack.i.h.bf16 %v1230_v37  ;;  %v1231_v47 = vunpack.i.l.bf16 %v1230_v37 }
 0x399   :  { %v1032_v63 = vsel %vm2062_vm10, %v968_v28, %v1232_v57  ;;  %v2081_v28 = vld [vmem:[#allocation10_spill] sm:$0xff] }
 0x39e   :  { %v1235_v19 = vpop.permute.xlu2 %1234 }
 0x39f   :  { %v1236_v31 = vunpack.i.l.bf16 %v1235_v19  ;;  %v1237_v44 = vunpack.i.h.bf16 %v1235_v19 }
 0x3a4   :  { %v954_v29 = vpop.permute.xlu0 %953 }
 0x3a5   :  { %v971_v38 = vmul.f32 %v954_v29, %v1756_v32  ;;  %v2077_v29 = vld [vmem:[#allocation12_spill] sm:$0xff] }
 0x3a6   :  { %v1240_v30 = vpop.permute.xlu2 %1239 }
 0x3a7   :  { %v1223_v43 = vpop.permute.xlu1 %1222  ;;  %v1241_v5 = vunpack.i.l.bf16 %v1240_v30  ;;  %v1242_v8 = vunpack.i.h.bf16 %v1240_v30  ;;  %v2083_v30 = vld [vmem:[#allocation7_spill] sm:$0xff] }
 0x3a8   :  { %v1224_v21 = vunpack.i.l.bf16 %v1223_v43  ;;  %v1225_v18 = vunpack.i.h.bf16 %v1223_v43 }
 0x3aa   :  { %v1035_v6 = vsel %vm2059_vm9, %v971_v38, %v1224_v21  ;;  %vm2082_vm9 = vmmov %vm2072_vm0 }
 0x3ab   :  { %1038 = vmatpush.msrb.mxu3 %v1035_v6 }
 0x3ac   :  { %v949_v4 = vpop.permute.xlu0 %948 }
 0x3ad   :  { %v970_v3 = vmul.f32 %v949_v4, %v1739_v62  ;;  %v2079_v4 = vld [vmem:[#allocation11_spill] sm:$0xff] }
 0x3ae   :  { %v1245_v59 = vpop.permute.xlu2 %1244 }
 0x3af   :  { %v944_v35 = vpop.permute.xlu1 %943  ;;  %v1034_v45 = vsel %vm2060_vm7, %v970_v3, %v1225_v18  ;;  %v1247_v13 = vunpack.i.h.bf16 %v1245_v59 }
 0x3b0   :  { %v969_v17 = vmul.f32 %v944_v35, %v1724_v27  ;;  %1039 = vmatpush.msrb.mxu3 %v1034_v45 }
 0x3b2   :  { %v1033_v32 = vsel %vm2061_vm8, %v969_v17, %v1231_v47  ;;  %v1308_v17 = vmov 1.0  }
 0x3b3   :  { %1040 = vmatpush.msrb.mxu3 %v1033_v32  ;;  %v2084_v32 = vld [vmem:[#allocation6_spill] sm:$0xff] }
 0x3b4   :  { %v934_v52 = vpop.permute.xlu0 %933  ;;  %vm2085_vm7 = vcmp.eq.s32.totalorder %v2083_v30, %v2084_v32 }
 0x3b5   :  { %1041 = vmatpush.msrb.mxu3 %v1032_v63  ;;  %v967_v62 = vmul.f32 %v934_v52, %v1691_v26  ;;  %v1309_v63 = vmov 32   ;;  %v1036_v52 = vld [vmem:[#allocation5] sm:$0xff] }
 0x3b6   :  { %v1250_v51 = vpop.permute.xlu2 %1249  ;;  %1263 = vset.pattern.permute.xlu0 %v1309_v63  ;;  %1264 = vset.pattern.permute.xlu1 %v1309_v63 }
 0x3b7   :  { %v929_v14 = vpop.permute.xlu1 %928  ;;  %v1031_v58 = vsel %vm2063_vm11, %v967_v62, %v1236_v31  ;;  %v1252_v24 = vunpack.i.h.bf16 %v1250_v51  ;;  %v2086_v31 = vld [vmem:[#allocation8_spill] sm:$0xff] }
 0x3b8   :  { %v966_v40 = vmul.f32 %v929_v14, %v1673_v48  ;;  %1042 = vmatpush.msrb.mxu3 %v1031_v58  ;;  %v1246_v48 = vunpack.i.l.bf16 %v1245_v59  ;;  %vm2087_vm8 = vcmp.eq.s32.totalorder %v2083_v30, %v2086_v31  ;;  %v1037_v58 = vld [vmem:[#allocation5 + $0x8] sm:$0xff] }
 0x3ba   :  { %v1030_v27 = vsel %vm2064_vm12, %v966_v40, %v1237_v44 }
 0x3bb   :  { %1043 = vmatpush.msrb.mxu3 %v1030_v27 }
 0x3bc   :  { %v924_v7 = vpop.permute.xlu0 %923 }
 0x3bd   :  { %v965_v9 = vmul.f32 %v924_v7, %v1651_v25  ;;  %v2069_v25 = vld [vmem:[#allocation16_spill] sm:$0xff] }
 0x3be   :  { %v1255_v2 = vpop.permute.xlu2 %1254 }
 0x3bf   :  { %v919_v0 = vpop.permute.xlu1 %918  ;;  %v1029_v10 = vsel %vm2065_vm13, %v965_v9, %v1241_v5  ;;  %v1256_v42 = vunpack.i.l.bf16 %v1255_v2  ;;  %v1257_v37 = vunpack.i.h.bf16 %v1255_v2 }
 0x3c0   :  { %v964_v26 = vmul.f32 %v919_v0, %v1647_v22  ;;  %1044 = vmatpush.msrb.mxu3 %v1029_v10  ;;  %v1251_v22 = vunpack.i.l.bf16 %v1250_v51 }
 0x3c2   :  { %v1028_v36 = vsel %vm2066_vm14, %v964_v26, %v1242_v8 }
 0x3c3   :  { %1045 = vmatpush.msrb.mxu3 %v1028_v36 }
 0x3c4   :  { %v914_v20 = vpop.permute.xlu0 %913 }
 0x3c5   :  { %v963_v53 = vmul.f32 %v914_v20, %v2067_v39 }
 0x3c6   :  { %v1260_v43 = vpop.permute.xlu2 %1259 }
 0x3c7   :  { %v909_v56 = vpop.permute.xlu1 %908  ;;  %v1027_v54 = vsel %vm2068_vm15, %v963_v53, %v1246_v48  ;;  %v1261_v21 = vunpack.i.l.bf16 %v1260_v43  ;;  %v1262_v45 = vunpack.i.h.bf16 %v1260_v43 }
 0x3c8   :  { %v962_v61 = vmul.f32 %v909_v56, %v2069_v25  ;;  %1046 = vmatpush.msrb.mxu3 %v1027_v54  ;;  %v1265_v56 = vld [vmem:[%s2026_s7 + $0x1] ss:$0 sm:$0xff] }
 0x3ca   :  { %v1026_v49 = vsel %vm2070_vm5, %v962_v61, %v1247_v13  ;;  %v1266_v61 = vld [vmem:[%s2026_s7 + $0x2] ss:$0 sm:$0xff] }
 0x3cb   :  { %1047 = vmatpush.msrb.mxu3 %v1026_v49 }
 0x3cc   :  { %v904_v23 = vpop.permute.xlu0 %903 }
 0x3cd   :  { %v961_v55 = vmul.f32 %v904_v23, %v2071_v60 }
 0x3cf   :  { %v899_v12 = vpop.permute.xlu1 %898  ;;  %v1025_v1 = vsel %vm2072_vm0, %v961_v55, %v1251_v22 }
 0x3d0   :  { %v960_v41 = vmul.f32 %v899_v12, %v2073_v16  ;;  %1048 = vmatpush.msrb.mxu3 %v1025_v1 }
 0x3d2   :  { %v1024_v34 = vsel %vm2074_vm3, %v960_v41, %v1252_v24  ;;  %vm2088_vm3 = vmmov %vm2072_vm0 }
 0x3d3   :  { %1049 = vmatpush.msrb.mxu3 %v1024_v34 }
 0x3d4   :  { %v894_v33 = vpop.permute.xlu0 %893 }
 0x3d5   :  { %v959_v50 = vmul.f32 %v894_v33, %v2075_v46 }
 0x3d7   :  { %v889_v15 = vpop.permute.xlu1 %888  ;;  %v1023_v11 = vsel %vm2076_vm4, %v959_v50, %v1256_v42 }
 0x3d8   :  { %v958_v19 = vmul.f32 %v889_v15, %v2077_v29  ;;  %1050 = vmatpush.msrb.mxu3 %v1023_v11 }
 0x3da   :  { %v1022_v38 = vsel %vm2078_vm1, %v958_v19, %v1257_v37 }
 0x3db   :  { %1051 = vmatpush.msrb.mxu3 %v1022_v38 }
 0x3dc   :  { %v884_v6 = vpop.permute.xlu0 %883 }
 0x3dd   :  { %v957_v18 = vmul.f32 %v884_v6, %v2079_v4 }
 0x3df   :  { %v879_v3 = vpop.permute.xlu1 %878  ;;  %v1021_v35 = vsel %vm2080_vm6, %v957_v18, %v1261_v21 }
 0x3e0   :  { %v956_v57 = vmul.f32 %v879_v3, %v2081_v28  ;;  %1052 = vmatpush.msrb.mxu3 %v1021_v35 }
 0x3e2   :  { %v1020_v47 = vsel %vm2082_vm9, %v956_v57, %v1262_v45 }
 0x3e3   :  { %1053 = vmatpush.msrb.mxu3 %v1020_v47 }
 0x3e4   :  { %1197 = vmatmul.msk.f32.vlgmr.msrb.gmra.mxu3 %vm2085_vm7, %v1308_v17 }
 0x3ec   :  { %1198 = vmatmul.msk.f32.gmra.mxu3 %vm2087_vm8, %v1308_v17 }
 0x467   :  { %v1055_v62 = vpop.f32.mrf.mxu3 }
 0x468   :  { %v1061_v14 = vadd.f32 %v1055_v62, %v1036_v52 }
 0x46a   :  { %1064 = vst.msk [vmem:[#allocation5] sm:$0xff] %vm85_vm2, %v1061_v14 }
 0x46f   :  { %v1058_v44 = vpop.f32.mrf.mxu3 }
 0x470   :  { %v1062_v40 = vadd.f32 %v1058_v44, %v1037_v58 }
 0x471   :  { %v1069_v27 = vld [vmem:[#allocation5] sm:$0xff] }
 0x472   :  { %1065 = vst.msk [vmem:[#allocation5 + $0x8] sm:$0xff] %vm85_vm2, %v1062_v40  ;;  %v1073_v59 = vmax.f32 %v1069_v27, 1e-20 }
 0x474   :  { %1077 = vperm.xlu0 %1263, %v1073_v59  }
 0x479   :  { %v1070_v5 = vld [vmem:[#allocation5 + $0x8] sm:$0xff] }
 0x47a   :  { %v1074_v7 = vmax.f32 %v1070_v5, 1e-20 }
 0x47c   :  { %1082 = vperm.xlu1 %1264, %v1074_v7  }
 0x4e6   :  { %v1078_v9 = vpop.permute.xlu0 %1077 }
 0x4e7   :  { %1299 = vrcp.f32 %v1078_v9  ;;  %v1096_v36 = vand.u32 2147483648, %v1078_v9  ;;  %v1094_v20 = vand.u32 2147483647, %v1078_v9  ;;  %vm1090_vm11 = vweird.f32 %v1078_v9 }
 0x4e9   :  { %v1097_v53 = vor.u32 1.1754944e-38, %v1096_v36  ;;  %vm1095_vm12 = vcmp.eq.f32.partialorder %v1094_v20, 8.507059e+37 }
 0x4ed   :  { %v1300_v0 = vpop.eup %1299 }
 0x4ee   :  { %v1086_v10 = vmul.f32 %v1300_v0, %v1078_v9  ;;  %v1083_v8 = vpop.permute.xlu1 %1082  ;;  %vm1091_vm10 = vweird.f32 %v1300_v0 }
 0x4ef   :  { %1301 = vrcp.f32 %v1083_v8  ;;  %vm1092_vm2 = vmor %vm1090_vm11, %vm1091_vm10  ;;  %v1111_v23 = vand.u32 2147483648, %v1083_v8  ;;  %v1109_v2 = vand.u32 2147483647, %v1083_v8  ;;  %vm1105_vm14 = vweird.f32 %v1083_v8 }
 0x4f0   :  { %v1087_v26 = vsub.f32 1.0, %v1086_v10 }
 0x4f1   :  { %v1112_v24 = vor.u32 1.1754944e-38, %v1111_v23  ;;  %vm1110_vm5 = vcmp.eq.f32.partialorder %v1109_v2, 8.507059e+37 }
 0x4f2   :  { %v1088_v48 = vmul.f32 %v1300_v0, %v1087_v26 }
 0x4f4   :  { %v1089_v51 = vadd.f32 %v1300_v0, %v1088_v48 }
 0x4f5   :  { %v1302_v39 = vpop.eup %1301 }
 0x4f6   :  { %v1093_v54 = vsel %vm1092_vm2, %v1300_v0, %v1089_v51  ;;  %v1101_v13 = vmul.f32 %v1302_v39, %v1083_v8  ;;  %vm1106_vm13 = vweird.f32 %v1302_v39 }
 0x4f7   :  { %v1098_v25 = vsel %vm1095_vm12, %v1097_v53, %v1093_v54  ;;  %vm1107_vm15 = vmor %vm1105_vm14, %vm1106_vm13 }
 0x4f8   :  { %v1099_v49 = vmul.f32 %v1098_v25, %v1069_v27  ;;  %v1102_v22 = vsub.f32 1.0, %v1101_v13 }
 0x4fa   :  { %v1116_v60 = vmul.f32 %v1265_v56, %v1099_v49  ;;  %v1103_v55 = vmul.f32 %v1302_v39, %v1102_v22 }
 0x4fc   :  { %v1119_v12 = vadd.f32 %v1266_v61, %v1116_v60  ;;  %v1104_v1 = vadd.f32 %v1302_v39, %v1103_v55 }
 0x4fe   :  { %v1121_v16 = vmax.f32 %v1119_v12, 0.0  ;;  %v1108_v41 = vsel %vm1107_vm15, %v1302_v39, %v1104_v1 }
 0x4ff   :  { %v1113_v34 = vsel %vm1110_vm5, %v1112_v24, %v1108_v41 }
 0x500   :  { %1123 = vst.msk [vmem:[%s2020_s8] sm:$0xff] %vm2072_vm0, %v1121_v16  ;;  %v1114_v42 = vmul.f32 %v1113_v34, %v1070_v5 }
 0x502   :  { %v1117_v33 = vmul.f32 %v1265_v56, %v1114_v42 }
 0x504   :  { %v1120_v46 = vadd.f32 %v1266_v61, %v1117_v33 }
 0x506   :  { %v1122_v50 = vmax.f32 %v1120_v46, 0.0 }
 0x508   :  { %1124 = vst.msk [vmem:[%s2020_s8 + $0x8] sm:$0xff] %vm2088_vm3, %v1122_v50 }

// kernel: energy_gnn_forward.3
= control target key start
LH: loop header
LB: loop body
LE: loop exit
PB: predicated region body
PF: predicated region fallthrough
CT: control target
= control target key end

     0   :  { %v2217_v3 = vmov 0   ;;  %vm2215_vm0 = vcmask 261120   ;;  %vm104_vm1 = vcmask 269312   ;;  %v1417_v34 = vmov 0.0   ;;  %s2200_s5 = inlined_call_operand.vmem [shape: f32[32,64], index: 5, kind: input, shape index: {}]   ;;  %s2201_s8 = inlined_call_operand.vmem [shape: f32[2,16], index: 8, kind: input, shape index: {}]   ;;  %s2202_s9 = inlined_call_operand.vmem [shape: f32[32,32], index: 9, kind: input, shape index: {}]   ;;  %s2203_s10 = inlined_call_operand.vmem [shape: f32[1,32], index: 10, kind: input, shape index: {}]   ;;  %s2204_s11 = inlined_call_operand.vmem [shape: f32[32,1], index: 11, kind: input, shape index: {}]   ;;  %s2205_s12 = inlined_call_operand.<no memory space> [shape: f32[1,1], index: 12, kind: input, shape index: {}]   ;;  %s2206_s13 = inlined_call_operand.vmem [shape: f32[2,1], index: 13, kind: output, shape index: {}]   ;;  %s2207_s3 = inlined_call_operand.vmem [shape: s32[128,1], index: 3, kind: input, shape index: {}]   ;;  %s2208_s0 = inlined_call_operand.vmem [shape: f32[16,32], index: 0, kind: input, shape index: {}]   ;;  %s2209_s6 = inlined_call_operand.vmem [shape: f32[1,64], index: 6, kind: input, shape index: {}]   ;;  %s2210_s2 = inlined_call_operand.vmem [shape: s32[128,1], index: 2, kind: input, shape index: {}]   ;;  %s2211_s4 = inlined_call_operand.vmem [shape: s32[1,128], index: 4, kind: input, shape index: {}]   ;;  %s2212_s7 = inlined_call_operand.vmem [shape: f32[3,32], index: 7, kind: input, shape index: {}]   ;;  %s2213_s1 = inlined_call_operand.vmem [shape: f32[128,32], index: 1, kind: input, shape index: {}]  }
   0x1   :  { %v18_v0 = vstv %s2205_s12  ;;  %v55_v1 = vld [vmem:[%s2200_s5 + $0x18] sm:$0xff]  ;;  %v54_v2 = vld [vmem:[%s2200_s5 + $0x10] sm:$0xff]  ;;  %1323 = vset.pattern.permute.xlu1 %v2217_v3  ;;  %1324 = vset.pattern.permute.xlu2 %v2217_v3  ;;  %v53_v4 = vld [vmem:[%s2200_s5 + $0x8] sm:$0xff]  ;;  %105 = vst.msk [vmem:[#allocation5] sm:$0xff] %vm104_vm1, %v1417_v34  ;;  %v141_v50 = vlaneseq  ;;  %vm2214_vm5 = vcmask 130048  }
   0x2   :  { %19 = vst [vmem:[#allocation6] sm:$0x1] %v18_v0  ;;  %79 = vmatpush.msra.mxu0 %v55_v1  ;;  %1325 = vset.pattern.permute.xlu0 %v2217_v3  ;;  %v1511_v5 = vld [vmem:[%s2207_s3] sm:$0xff]  ;;  %v1517_v6 = vld [vmem:[%s2207_s3 + $0x8] sm:$0xff]  ;;  %v114_v10 = vld [vmem:[%s2210_s2 + $0x30] sm:$0xff] }
   0x3   :  { %243 = vperm.xlu1 %1323, %v1511_v5   ;;  %v52_v7 = vld [vmem:[%s2200_s5] sm:$0xff]  ;;  %246 = vperm.xlu2 %1324, %v1517_v6   ;;  %v113_v9 = vld [vmem:[%s2210_s2 + $0x28] sm:$0xff]  ;;  %v115_v12 = vld [vmem:[%s2210_s2 + $0x38] sm:$0xff]  ;;  %106 = vst.msk [vmem:[#allocation5 + $0x8] sm:$0xff] %vm104_vm1, %v1417_v34  ;;  %v1657_v52 = vand.u32 127, %v141_v50  ;;  %v1668_v59 = vshrl.u32 %v141_v50, 7 }
   0x4   :  { %80 = vmatpush.msra.mxu0 %v54_v2  ;;  %v50_v8 = vld [vmem:[%s2208_s0] sm:$0xff]  ;;  %v51_v11 = vld [vmem:[%s2208_s0 + $0x8] sm:$0xff]  ;;  %v1543_v13 = vld [vmem:[%s2207_s3 + $0x18] sm:$0xff] }
   0x5   :  { %v123_v14 = vld [vmem:[%s2210_s2 + $0x78] sm:$0xff]  ;;  %v116_v15 = vld [vmem:[%s2210_s2 + $0x40] sm:$0xff]  ;;  %v1555_v16 = vld [vmem:[%s2207_s3 + $0x50] sm:$0xff]  ;;  %2231 = vst [vmem:[#allocation7_spill] sm:$0xff] %v1668_v59  ;;  %v1678_v61 = vadd.s32 8, %v1668_v59 }
   0x6   :  { %81 = vmatpush.msra.mxu0 %v53_v4  ;;  %v117_v17 = vld [vmem:[%s2210_s2 + $0x48] sm:$0xff]  ;;  %v1564_v18 = vld [vmem:[%s2207_s3 + $0x58] sm:$0xff]  ;;  %v108_v19 = vld [vmem:[%s2210_s2] sm:$0xff] }
   0x7   :  { %v1573_v20 = vld [vmem:[%s2207_s3 + $0x30] sm:$0xff]  ;;  %v119_v21 = vld [vmem:[%s2210_s2 + $0x58] sm:$0xff]  ;;  %v1591_v24 = vld [vmem:[%s2207_s3 + $0x48] sm:$0xff]  ;;  %2233 = vst [vmem:[#allocation9_spill] sm:$0xff] %v1678_v61 }
   0x8   :  { %82 = vmatpush.msra.mxu0 %v52_v7  ;;  %v110_v22 = vld [vmem:[%s2210_s2 + $0x10] sm:$0xff]  ;;  %v1596_v25 = vld [vmem:[%s2207_s3 + $0x60] sm:$0xff]  ;;  %v1606_v27 = vld [vmem:[%s2207_s3 + $0x38] sm:$0xff]  ;;  %vm354_vm8 = vcmp.ge.s32.totalorder %v1591_v24, 0 }
   0x9   :  { %1235 = vmatmul.msk.f32.vlgmr.msra.gmra.mxu0 %vm2215_vm0, %v50_v8  ;;  %v1585_v23 = vld [vmem:[%s2207_s3 + $0x70] sm:$0xff]  ;;  %v120_v28 = vld [vmem:[%s2210_s2 + $0x60] sm:$0xff]  ;;  %v111_v29 = vld [vmem:[%s2210_s2 + $0x18] sm:$0xff]  ;;  %vm357_vm6 = vcmp.ge.s32.totalorder %v1596_v25, 0 }
   0xa   :  { %v122_v26 = vld [vmem:[%s2210_s2 + $0x70] sm:$0xff]  ;;  %v1326_v30 = vld [vmem:[%s2209_s6] ss:$0 sm:$0xff]  ;;  %v1622_v33 = vld [vmem:[%s2207_s3 + $0x78] sm:$0xff]  ;;  %s1418_s6 = smov 96  }
   0xb   :  { %162 = vperm.xlu1 %1323, %v113_v9   ;;  %165 = vperm.xlu2 %1324, %v114_v10   ;;  %v1635_v41 = vld [vmem:[%s2207_s3 + $0x10] sm:$0xff]  ;;  %v1645_v44 = vld [vmem:[%s2207_s3 + $0x20] sm:$0xff]  ;;  %v1651_v47 = vld [vmem:[%s2207_s3 + $0x28] sm:$0xff] }
   0xc   :  { %v118_v51 = vld [vmem:[%s2210_s2 + $0x50] sm:$0xff]  ;;  %v109_v55 = vld [vmem:[%s2210_s2 + $0x8] sm:$0xff]  ;;  %v1673_v60 = vld [vmem:[%s2211_s4] ss:$0 sm:$0xff] }
   0xd   :  { %2232 = vst [vmem:[#allocation8_spill] sm:$0xff] %v1673_v60  ;;  %v1689_v62 = vld [vmem:[%s2207_s3 + $0x68] sm:$0xff]  ;;  %v1698_v0 = vld [vmem:[%s2207_s3 + $0x40] sm:$0xff] }
   0xe   :  { %v121_v2 = vld [vmem:[%s2210_s2 + $0x68] sm:$0xff]  ;;  %v112_v7 = vld [vmem:[%s2210_s2 + $0x20] sm:$0xff] }
  0x11   :  { %1236 = vmatmul.msk.f32.gmra.mxu0 %vm2215_vm0, %v51_v11 }
  0x13   :  { %168 = vperm.xlu1 %1323, %v115_v12   ;;  %252 = vperm.xlu2 %1324, %v1543_v13  }
  0x1b   :  { %192 = vperm.xlu1 %1323, %v123_v14   ;;  %171 = vperm.xlu2 %1324, %v116_v15  }
  0x23   :  { %273 = vperm.xlu1 %1323, %v1555_v16   ;;  %174 = vperm.xlu2 %1324, %v117_v17  }
  0x2b   :  { %276 = vperm.xlu1 %1323, %v1564_v18   ;;  %147 = vperm.xlu2 %1324, %v108_v19  }
  0x33   :  { %261 = vperm.xlu1 %1323, %v1573_v20   ;;  %279 = vperm.xlu2 %1324, %v1596_v25  }
  0x3b   :  { %180 = vperm.xlu1 %1323, %v119_v21   ;;  %264 = vperm.xlu2 %1324, %v1606_v27  }
  0x43   :  { %153 = vperm.xlu1 %1323, %v110_v22   ;;  %183 = vperm.xlu2 %1324, %v120_v28  }
  0x4b   :  { %285 = vperm.xlu1 %1323, %v1585_v23   ;;  %156 = vperm.xlu2 %1324, %v111_v29  }
  0x53   :  { %270 = vperm.xlu1 %1323, %v1591_v24   ;;  %288 = vperm.xlu2 %1324, %v1622_v33  }
  0x5b   :  { %189 = vperm.xlu1 %1323, %v122_v26  }
  0x5d   :  { %v1630_v37 = vpop.permute.xlu2 %246 }
  0x5e   :  { %vm291_vm14 = vcmp.eq.s32.totalorder %v1630_v37, %v1657_v52 }
  0x5f   :  { %v1254_v26 = vsel %vm291_vm14, 1.0, %v1417_v34 }
  0x65   :  { %v166_v40 = vpop.permute.xlu2 %165 }
  0x66   :  { %vm200_vm7 = vcmp.eq.s32.totalorder %v166_v40, %v1657_v52 }
  0x67   :  { %v1243_v63 = vsel %vm200_vm7, 1.0, %v1417_v34 }
  0x6d   :  { %v1640_v43 = vpop.permute.xlu2 %252 }
  0x75   :  { %v1637_v42 = vpop.permute.xlu1 %243  ;;  %v172_v46 = vpop.permute.xlu2 %171 }
  0x76   :  { %vm202_vm10 = vcmp.eq.s32.totalorder %v172_v46, %v1657_v52  ;;  %vm290_vm12 = vcmp.eq.s32.totalorder %v1637_v42, %v1657_v52 }
  0x77   :  { %v1245_v4 = vsel %vm202_vm10, 1.0, %v1417_v34  ;;  %v1253_v19 = vsel %vm290_vm12, 1.0, %v1417_v34 }
  0x7d   :  { %v163_v45 = vpop.permute.xlu1 %162  ;;  %v175_v48 = vpop.permute.xlu2 %174 }
  0x7e   :  { %vm199_vm2 = vcmp.eq.s32.totalorder %v163_v45, %v1657_v52  ;;  %vm203_vm11 = vcmp.eq.s32.totalorder %v175_v48, %v1657_v52 }
  0x7f   :  { %v1242_v56 = vsel %vm199_vm2, 1.0, %v1417_v34  ;;  %v1246_v8 = vsel %vm203_vm11, 1.0, %v1417_v34 }
  0x85   :  { %v169_v49 = vpop.permute.xlu1 %168  ;;  %v148_v53 = vpop.permute.xlu2 %147 }
  0x86   :  { %v84_v31 = vpop.f32.mrf.mxu0  ;;  %vm194_vm3 = vcmp.eq.s32.totalorder %v148_v53, %v1657_v52  ;;  %vm201_vm9 = vcmp.eq.s32.totalorder %v169_v49, %v1657_v52 }
  0x87   :  { %v85_v32 = vadd.f32 %v1326_v30, %v84_v31  ;;  %v1237_v57 = vsel %vm194_vm3, 1.0, %v1417_v34  ;;  %v1244_v1 = vsel %vm201_vm9, 1.0, %v1417_v34 }
  0x89   :  { %90 = vst.msk [vmem:[#allocation2] sm:$0xff] %vm2215_vm0, %v85_v32 }
  0x8d   :  { %v193_v54 = vpop.permute.xlu1 %192 }
  0x8e   :  { %v87_v35 = vpop.f32.mrf.mxu0  ;;  %vm209_vm4 = vcmp.eq.s32.totalorder %v193_v54, %v1657_v52 }
  0x8f   :  { %v88_v36 = vadd.f32 %v1326_v30, %v87_v35  ;;  %v1252_v58 = vsel %vm209_vm4, 1.0, %v1417_v34  ;;  %v280_v30 = vpop.permute.xlu2 %279  ;;  %vm293_vm4 = vcmp.eq.s32.totalorder %v1640_v43, %v1657_v52 }
  0x90   :  { %v361_v39 = vld [vmem:[#allocation2] sm:$0xff]  ;;  %vm302_vm2 = vcmp.eq.s32.totalorder %v280_v30, %v1657_v52 }
  0x91   :  { %91 = vst.msk [vmem:[#allocation2 + $0x8] sm:$0xff] %vm2215_vm0, %v88_v36  ;;  %96 = vrot.lane.b32.xlu0 %v88_v36, %s1418_s6 }
  0x95   :  { %v274_v10 = vpop.permute.xlu1 %273 }
  0x96   :  { %vm300_vm13 = vcmp.eq.s32.totalorder %v274_v10, %v1657_v52 }
  0x97   :  { %v1263_v21 = vsel %vm300_vm13, 1.0, %v1417_v34  ;;  %v265_v37 = vpop.permute.xlu2 %264 }
  0x98   :  { %v362_v38 = vld [vmem:[#allocation2 + $0x8] sm:$0xff] }
  0x99   :  { %426 = vmatpush.msrb.mxu0 %v362_v38  ;;  %1308 = vmatpush.msra.mxu1 %v362_v38 }
  0x9a   :  { %1309 = vmatpush.msra.mxu3 %v362_v38  ;;  %94 = vrot.lane.b32.xlu0 %v85_v32, %s1418_s6  ;;  %v1265_v32 = vsel %vm302_vm2, 1.0, %v1417_v34 }
  0x9b   :  { %427 = vmatpush.msrb.mxu0 %v361_v39  ;;  %1310 = vmatpush.msra.mxu1 %v361_v39 }
  0x9c   :  { %1311 = vmatpush.msra.mxu3 %v361_v39  ;;  %1276 = vmatmul.msk.f32.vlgmr.msra.gmra.mxu1 %vm2214_vm5, %v1242_v56  ;;  %v1256_v39 = vsel %vm293_vm4, 1.0, %v1417_v34 }
  0x9d   :  { %1271 = vmatmul.msk.f32.vlgmr.msrb.gmra.mxu0 %vm2214_vm5, %v1237_v57  ;;  %1286 = vmatmul.msk.f32.vlgmr.msra.gmra.mxu3 %vm2214_vm5, %v1252_v58  ;;  %v277_v14 = vpop.permute.xlu1 %276 }
  0x9e   :  { %vm301_vm15 = vcmp.eq.s32.totalorder %v277_v14, %v1657_v52 }
  0x9f   :  { %v1264_v28 = vsel %vm301_vm15, 1.0, %v1417_v34  ;;  %v184_v46 = vpop.permute.xlu2 %183 }
  0xa0   :  { %vm206_vm14 = vcmp.eq.s32.totalorder %v184_v46, %v1657_v52 }
  0xa2   :  { %249 = vperm.xlu0 %1325, %v1635_v41  }
  0xa4   :  { %1277 = vmatmul.msk.f32.gmra.mxu1 %vm2214_vm5, %v1243_v63 }
  0xa5   :  { %v262_v29 = vpop.permute.xlu1 %261 }
  0xa6   :  { %vm296_vm2 = vcmp.eq.s32.totalorder %v262_v29, %v1657_v52 }
  0xa7   :  { %v157_v57 = vpop.permute.xlu2 %156  ;;  %v1259_v63 = vsel %vm296_vm2, 1.0, %v1417_v34 }
  0xaa   :  { %255 = vperm.xlu0 %1325, %v1645_v44  }
  0xac   :  { %1278 = vmatmul.msk.f32.gmra.mxu1 %vm2214_vm5, %v1244_v1 }
  0xad   :  { %v181_v36 = vpop.permute.xlu1 %180 }
  0xae   :  { %vm205_vm10 = vcmp.eq.s32.totalorder %v181_v36, %v1657_v52 }
  0xaf   :  { %v1248_v48 = vsel %vm205_vm10, 1.0, %v1417_v34 }
  0xb2   :  { %258 = vperm.xlu0 %1325, %v1651_v47  }
  0xb4   :  { %1279 = vmatmul.msk.f32.gmra.mxu1 %vm2214_vm5, %v1245_v4 }
  0xb5   :  { %v154_v42 = vpop.permute.xlu1 %153 }
  0xb6   :  { %vm196_vm13 = vcmp.eq.s32.totalorder %v154_v42, %v1657_v52 }
  0xb7   :  { %v1239_v54 = vsel %vm196_vm13, 1.0, %v1417_v34 }
  0xba   :  { %177 = vperm.xlu0 %1325, %v118_v51  }
  0xbc   :  { %1280 = vmatmul.msk.f32.gmra.mxu1 %vm2214_vm5, %v1246_v8 }
  0xbd   :  { %v286_v50 = vpop.permute.xlu1 %285 }
  0xbe   :  { %vm304_vm4 = vcmp.eq.s32.totalorder %v286_v50, %v1657_v52 }
  0xbf   :  { %v1267_v4 = vsel %vm304_vm4, 1.0, %v1417_v34 }
  0xc2   :  { %150 = vperm.xlu0 %1325, %v109_v55   ;;  %v1249_v55 = vsel %vm206_vm14, 1.0, %v1417_v34 }
  0xc5   :  { %v271_v1 = vpop.permute.xlu1 %270 }
  0xc6   :  { %vm299_vm14 = vcmp.eq.s32.totalorder %v271_v1, %v1657_v52  ;;  %v619_v1 = vld [vmem:[%s2213_s1 + $0x58] sm:$0xff] }
  0xca   :  { %282 = vperm.xlu0 %1325, %v1689_v62  }
  0xd2   :  { %267 = vperm.xlu0 %1325, %v1698_v0  }
  0xda   :  { %186 = vperm.xlu0 %1325, %v121_v2  }
  0xe2   :  { %159 = vperm.xlu0 %1325, %v112_v7   ;;  %v289_v7 = vpop.permute.xlu2 %288 }
 0x103   :  { %v97_v9 = vpop.permute.xlu0 %96 }
 0x104   :  { %101 = vst.msk [vmem:[#allocation3 + $0x8] sm:$0xff] %vm2215_vm0, %v97_v9 }
 0x10b   :  { %v478_v11 = vld [vmem:[#allocation3 + $0x8] sm:$0xff] }
 0x10c   :  { %v95_v12 = vpop.permute.xlu0 %94  ;;  %541 = vmatpush.msra.mxu2 %v478_v11  ;;  %1312 = vmatpush.msrb.mxu3 %v478_v11 }
 0x10d   :  { %100 = vst.msk [vmem:[#allocation3] sm:$0xff] %vm2215_vm0, %v95_v12  ;;  %v190_v12 = vpop.permute.xlu1 %189 }
 0x114   :  { %v250_v15 = vpop.permute.xlu0 %249  ;;  %v477_v17 = vld [vmem:[#allocation3] sm:$0xff] }
 0x115   :  { %542 = vmatpush.msra.mxu2 %v477_v17  ;;  %1313 = vmatpush.msrb.mxu3 %v477_v17  ;;  %vm292_vm3 = vcmp.eq.s32.totalorder %v250_v15, %v1657_v52 }
 0x116   :  { %1287 = vmatmul.msk.f32.vlgmr.msra.gmra.mxu2 %vm2214_vm5, %v1253_v19  ;;  %1297 = vmatmul.msk.f32.vlgmr.msrb.gmra.mxu3 %vm2214_vm5, %v1263_v21  ;;  %v1255_v35 = vsel %vm292_vm3, 1.0, %v1417_v34  ;;  %vm197_vm3 = vcmp.eq.s32.totalorder %v157_v57, %v1657_v52  ;;  %v1262_v21 = vsel %vm299_vm14, 1.0, %v1417_v34 }
 0x117   :  { %v1240_v2 = vsel %vm197_vm3, 1.0, %v1417_v34 }
 0x11a   :  { %v1801_v29 = vpop.f32.mrf.mxu0 }
 0x11b   :  { %2236 = vst [vmem:[#allocation12_spill] sm:$0xff] %v1801_v29 }
 0x11c   :  { %v256_v22 = vpop.permute.xlu0 %255 }
 0x11d   :  { %vm294_vm9 = vcmp.eq.s32.totalorder %v256_v22, %v1657_v52  ;;  %v1795_v22 = vpop.f32.mrf.mxu1 }
 0x11e   :  { %1288 = vmatmul.msk.f32.gmra.mxu2 %vm2214_vm5, %v1254_v26  ;;  %1298 = vmatmul.msk.f32.gmra.mxu3 %vm2214_vm5, %v1264_v28  ;;  %v1257_v43 = vsel %vm294_vm9, 1.0, %v1417_v34  ;;  %vm305_vm9 = vcmp.eq.s32.totalorder %v289_v7, %v1657_v52  ;;  %2234 = vst [vmem:[#allocation10_spill] sm:$0xff] %v1795_v22 }
 0x11f   :  { %v1268_v11 = vsel %vm305_vm9, 1.0, %v1417_v34 }
 0x124   :  { %v259_v31 = vpop.permute.xlu0 %258 }
 0x125   :  { %vm295_vm12 = vcmp.eq.s32.totalorder %v259_v31, %v1657_v52  ;;  %v1797_v26 = vpop.f32.mrf.mxu1  ;;  %v608_v31 = vld [vmem:[%s2213_s1] sm:$0xff] }
 0x126   :  { %1289 = vmatmul.msk.f32.gmra.mxu2 %vm2214_vm5, %v1255_v35  ;;  %1299 = vmatmul.msk.f32.gmra.mxu3 %vm2214_vm5, %v1265_v32  ;;  %v1258_v53 = vsel %vm295_vm12, 1.0, %v1417_v34  ;;  %vm208_vm12 = vcmp.eq.s32.totalorder %v190_v12, %v1657_v52  ;;  %2235 = vst [vmem:[#allocation11_spill] sm:$0xff] %v1797_v26  ;;  %v1812_v35 = vld [vmem:[%s2212_s7] ss:$0 sm:$0xff] }
 0x127   :  { %v1251_v17 = vsel %vm208_vm12, 1.0, %v1417_v34 }
 0x12c   :  { %v178_v38 = vpop.permute.xlu0 %177 }
 0x12d   :  { %vm204_vm7 = vcmp.eq.s32.totalorder %v178_v38, %v1657_v52  ;;  %v1799_v28 = vpop.f32.mrf.mxu1 }
 0x12e   :  { %v1247_v40 = vsel %vm204_vm7, 1.0, %v1417_v34  ;;  %1290 = vmatmul.msk.f32.gmra.mxu2 %vm2214_vm5, %v1256_v39  ;;  %vm297_vm7 = vcmp.eq.s32.totalorder %v265_v37, %v1657_v52  ;;  %v1814_v37 = vpop.f32.mrf.mxu3 }
 0x12f   :  { %1281 = vmatmul.msk.f32.gmra.mxu1 %vm2214_vm5, %v1247_v40  ;;  %v1260_v9 = vsel %vm297_vm7, 1.0, %v1417_v34 }
 0x134   :  { %v151_v45 = vpop.permute.xlu0 %150 }
 0x135   :  { %vm195_vm11 = vcmp.eq.s32.totalorder %v151_v45, %v1657_v52  ;;  %v1806_v32 = vpop.f32.mrf.mxu1 }
 0x136   :  { %v1238_v49 = vsel %vm195_vm11, 1.0, %v1417_v34  ;;  %1291 = vmatmul.msk.f32.gmra.mxu2 %vm2214_vm5, %v1257_v43 }
 0x137   :  { %1272 = vmatmul.msk.f32.gmra.mxu0 %vm2214_vm5, %v1238_v49  ;;  %1282 = vmatmul.msk.f32.gmra.mxu1 %vm2214_vm5, %v1248_v48  ;;  %v618_v49 = vld [vmem:[%s2213_s1 + $0x50] sm:$0xff] }
 0x13c   :  { %v283_v51 = vpop.permute.xlu0 %282 }
 0x13d   :  { %vm303_vm15 = vcmp.eq.s32.totalorder %v283_v51, %v1657_v52  ;;  %v1818_v45 = vpop.f32.mrf.mxu1 }
 0x13e   :  { %v1266_v56 = vsel %vm303_vm15, 1.0, %v1417_v34  ;;  %1292 = vmatmul.msk.f32.gmra.mxu2 %vm2214_vm5, %v1258_v53 }
 0x13f   :  { %1273 = vmatmul.msk.f32.gmra.mxu0 %vm2214_vm5, %v1239_v54  ;;  %1283 = vmatmul.msk.f32.gmra.mxu1 %vm2214_vm5, %v1249_v55 }
 0x140   :  { %1300 = vmatmul.msk.f32.gmra.mxu3 %vm2214_vm5, %v1266_v56 }
 0x144   :  { %v268_v58 = vpop.permute.xlu0 %267 }
 0x145   :  { %vm298_vm11 = vcmp.eq.s32.totalorder %v268_v58, %v1657_v52  ;;  %v609_v58 = vld [vmem:[%s2213_s1 + $0x8] sm:$0xff] }
 0x146   :  { %1293 = vmatmul.msk.f32.gmra.mxu2 %vm2214_vm5, %v1259_v63  ;;  %v1261_v15 = vsel %vm298_vm11, 1.0, %v1417_v34 }
 0x147   :  { %1274 = vmatmul.msk.f32.gmra.mxu0 %vm2214_vm5, %v1240_v2 }
 0x148   :  { %1301 = vmatmul.msk.f32.gmra.mxu3 %vm2214_vm5, %v1267_v4 }
 0x14c   :  { %v187_v8 = vpop.permute.xlu0 %186 }
 0x14d   :  { %vm207_vm10 = vcmp.eq.s32.totalorder %v187_v8, %v1657_v52 }
 0x14e   :  { %v1250_v10 = vsel %vm207_vm10, 1.0, %v1417_v34  ;;  %1294 = vmatmul.msk.f32.gmra.mxu2 %vm2214_vm5, %v1260_v9 }
 0x14f   :  { %1284 = vmatmul.msk.f32.gmra.mxu1 %vm2214_vm5, %v1250_v10 }
 0x150   :  { %1302 = vmatmul.msk.f32.gmra.mxu3 %vm2214_vm5, %v1268_v11 }
 0x154   :  { %v160_v14 = vpop.permute.xlu0 %159 }
 0x155   :  { %vm198_vm13 = vcmp.eq.s32.totalorder %v160_v14, %v1657_v52 }
 0x156   :  { %v1241_v19 = vsel %vm198_vm13, 1.0, %v1417_v34  ;;  %1295 = vmatmul.msk.f32.gmra.mxu2 %vm2214_vm5, %v1261_v15 }
 0x157   :  { %1275 = vmatmul.msk.f32.gmra.mxu0 %vm2214_vm5, %v1241_v19  ;;  %1285 = vmatmul.msk.f32.gmra.mxu1 %vm2214_vm5, %v1251_v17 }
 0x15e   :  { %1296 = vmatmul.msk.f32.gmra.mxu2 %vm2214_vm5, %v1262_v21  ;;  %v610_v21 = vld [vmem:[%s2213_s1 + $0x10] sm:$0xff]  ;;  %vm353_vm5 = vcmp.ge.s32.totalorder %v1698_v0, 0 }
 0x199   :  { %v544_v30 = vpop.f32.mrf.mxu2  ;;  %v574_v46 = vpop.f32.mrf.mxu3 }
 0x19a   :  { %v592_v52 = vadd.f32 %v544_v30, %v1801_v29 }
 0x19c   :  { %v624_v34 = vadd.f32 %v608_v31, %v592_v52  ;;  %v620_v31 = vld [vmem:[%s2213_s1 + $0x60] sm:$0xff] }
 0x19e   :  { %v656_v36 = vmul.f32 0.2, %v624_v34  ;;  %vm640_vm15 = vcmp.gt.f32.partialorder %v624_v34, 0.0 }
 0x1a0   :  { %v672_v38 = vsel %vm640_vm15, %v624_v34, %v656_v36 }
 0x1a1   :  { %v547_v39 = vpop.f32.mrf.mxu2  ;;  %v689_v40 = vmul.f32 %v1812_v35, %v672_v38  ;;  %v577_v53 = vpop.f32.mrf.mxu3 }
 0x1a3   :  { %v706_v42 = vsel %vm2215_vm0, %v689_v40, 0.0 }
 0x1a4   :  { %707 = vadd.xlane.f32.xlu2 %v706_v42 }
 0x1a9   :  { %v550_v43 = vpop.f32.mrf.mxu2  ;;  %v580_v15 = vpop.f32.mrf.mxu3 }
 0x1ac   :  { %v1820_v48 = vpop.f32.mrf.mxu1 }
 0x1ad   :  { %v602_v50 = vadd.f32 %v574_v46, %v1820_v48 }
 0x1af   :  { %v634_v51 = vadd.f32 %v618_v49, %v602_v50  ;;  %v613_v50 = vld [vmem:[%s2213_s1 + $0x28] sm:$0xff] }
 0x1b1   :  { %v666_v54 = vmul.f32 0.2, %v634_v51  ;;  %v553_v55 = vpop.f32.mrf.mxu2  ;;  %vm650_vm2 = vcmp.gt.f32.partialorder %v634_v51, 0.0 }
 0x1b3   :  { %v682_v56 = vsel %vm650_vm2, %v634_v51, %v666_v54 }
 0x1b4   :  { %v1826_v57 = vpop.f32.mrf.mxu0  ;;  %v1831_v63 = vpop.f32.mrf.mxu1  ;;  %v699_v2 = vmul.f32 %v1812_v35, %v682_v56 }
 0x1b5   :  { %2237 = vst [vmem:[#allocation13_spill] sm:$0xff] %v1826_v57  ;;  %v593_v4 = vadd.f32 %v547_v39, %v1826_v57  ;;  %v603_v7 = vadd.f32 %v577_v53, %v1831_v63 }
 0x1b6   :  { %v736_v8 = vsel %vm2215_vm0, %v699_v2, 0.0 }
 0x1b7   :  { %v625_v9 = vadd.f32 %v609_v58, %v593_v4  ;;  %v635_v10 = vadd.f32 %v619_v1, %v603_v7  ;;  %737 = vadd.xlane.f32.xlu2 %v736_v8  ;;  %v611_v1 = vld [vmem:[%s2213_s1 + $0x18] sm:$0xff] }
 0x1b9   :  { %v657_v11 = vmul.f32 0.2, %v625_v9  ;;  %v1840_v12 = vpop.f32.mrf.mxu2  ;;  %vm641_vm3 = vcmp.gt.f32.partialorder %v625_v9, 0.0  ;;  %v667_v14 = vmul.f32 0.2, %v635_v10  ;;  %vm651_vm4 = vcmp.gt.f32.partialorder %v635_v10, 0.0 }
 0x1bb   :  { %v673_v17 = vsel %vm641_vm3, %v625_v9, %v657_v11  ;;  %v683_v39 = vsel %vm651_vm4, %v635_v10, %v667_v14 }
 0x1bc   :  { %v1842_v19 = vpop.f32.mrf.mxu0  ;;  %v1847_v30 = vpop.f32.mrf.mxu1  ;;  %v690_v52 = vmul.f32 %v1812_v35, %v673_v17  ;;  %v700_v51 = vmul.f32 %v1812_v35, %v683_v39 }
 0x1bd   :  { %2238 = vst [vmem:[#allocation14_spill] sm:$0xff] %v1842_v19  ;;  %v594_v34 = vadd.f32 %v550_v43, %v1842_v19  ;;  %v604_v36 = vadd.f32 %v580_v15, %v1847_v30 }
 0x1be   :  { %v709_v38 = vsel %vm2215_vm0, %v690_v52, 0.0  ;;  %v739_v7 = vsel %vm2215_vm0, %v700_v51, 0.0 }
 0x1bf   :  { %v626_v40 = vadd.f32 %v610_v21, %v594_v34  ;;  %v636_v42 = vadd.f32 %v620_v31, %v604_v36  ;;  %710 = vadd.xlane.f32.xlu0 %v709_v38  ;;  %v614_v31 = vld [vmem:[%s2213_s1 + $0x30] sm:$0xff] }
 0x1c1   :  { %v658_v46 = vmul.f32 0.2, %v626_v40  ;;  %v559_v49 = vpop.f32.mrf.mxu2  ;;  %vm642_vm7 = vcmp.gt.f32.partialorder %v626_v40, 0.0  ;;  %v668_v53 = vmul.f32 0.2, %v636_v42  ;;  %vm652_vm9 = vcmp.gt.f32.partialorder %v636_v42, 0.0 }
 0x1c2   :  { %v597_v43 = vadd.f32 %v559_v49, %v1795_v22 }
 0x1c3   :  { %v674_v54 = vsel %vm642_vm7, %v626_v40, %v658_v46  ;;  %v684_v10 = vsel %vm652_vm9, %v636_v42, %v668_v53  ;;  %v583_v15 = vpop.f32.mrf.mxu3  ;;  %vm2216_vm9 = vcmp.ge.s32.totalorder %v1511_v5, 0 }
 0x1c4   :  { %v629_v56 = vadd.f32 %v613_v50, %v597_v43  ;;  %v1861_v58 = vpop.f32.mrf.mxu0  ;;  %v691_v2 = vmul.f32 %v1812_v35, %v674_v54 }
 0x1c5   :  { %2239 = vst [vmem:[#allocation15_spill] sm:$0xff] %v1861_v58  ;;  %v595_v4 = vadd.f32 %v553_v55, %v1861_v58  ;;  %v701_v55 = vmul.f32 %v1812_v35, %v684_v10 }
 0x1c6   :  { %v661_v8 = vmul.f32 0.2, %v629_v56  ;;  %v712_v9 = vsel %vm2215_vm0, %v691_v2, 0.0  ;;  %vm645_vm10 = vcmp.gt.f32.partialorder %v629_v56, 0.0 }
 0x1c7   :  { %v627_v11 = vadd.f32 %v611_v1, %v595_v4  ;;  %740 = vadd.xlane.f32.xlu0 %v739_v7  ;;  %713 = vadd.xlane.f32.xlu1 %v712_v9  ;;  %v742_v42 = vsel %vm2215_vm0, %v701_v55, 0.0  ;;  %v615_v1 = vld [vmem:[%s2213_s1 + $0x38] sm:$0xff]  ;;  %v612_v4 = vld [vmem:[%s2213_s1 + $0x20] sm:$0xff] }
 0x1c8   :  { %v677_v14 = vsel %vm645_vm10, %v629_v56, %v661_v8  ;;  %v616_v55 = vld [vmem:[%s2213_s1 + $0x40] sm:$0xff]  ;;  %vm2228_vm10 = vcmp.ge.s32.totalorder %v1517_v6, 0 }
 0x1c9   :  { %v659_v17 = vmul.f32 0.2, %v627_v11  ;;  %v562_v21 = vpop.f32.mrf.mxu2  ;;  %vm643_vm11 = vcmp.gt.f32.partialorder %v627_v11, 0.0  ;;  %v694_v34 = vmul.f32 %v1812_v35, %v677_v14 }
 0x1ca   :  { %v598_v52 = vadd.f32 %v562_v21, %v1797_v26  ;;  %v622_v21 = vld [vmem:[%s2213_s1 + $0x70] sm:$0xff] }
 0x1cb   :  { %v675_v36 = vsel %vm643_vm11, %v627_v11, %v659_v17  ;;  %v721_v49 = vsel %vm2215_vm0, %v694_v34, 0.0  ;;  %v586_v54 = vpop.f32.mrf.mxu3  ;;  %vm350_vm11 = vcmp.ge.s32.totalorder %v1651_v47, 0 }
 0x1cc   :  { %v630_v38 = vadd.f32 %v614_v31, %v598_v52  ;;  %v1876_v39 = vpop.f32.mrf.mxu1  ;;  %v692_v40 = vmul.f32 %v1812_v35, %v675_v36 }
 0x1cd   :  { %v605_v52 = vadd.f32 %v583_v15, %v1876_v39 }
 0x1ce   :  { %v662_v46 = vmul.f32 0.2, %v630_v38  ;;  %v715_v50 = vsel %vm2215_vm0, %v692_v40, 0.0  ;;  %vm646_vm12 = vcmp.gt.f32.partialorder %v630_v38, 0.0 }
 0x1cf   :  { %722 = vadd.xlane.f32.xlu0 %v721_v49  ;;  %743 = vadd.xlane.f32.xlu1 %v742_v42 }
 0x1d0   :  { %716 = vadd.xlane.f32.xlu2 %v715_v50  ;;  %v678_v51 = vsel %vm646_vm12, %v630_v38, %v662_v46  ;;  %v621_v38 = vld [vmem:[%s2213_s1 + $0x68] sm:$0xff]  ;;  %vm770_vm12 = vcmask 7168  }
 0x1d1   :  { %v565_v53 = vpop.f32.mrf.mxu2  ;;  %v695_v43 = vmul.f32 %v1812_v35, %v678_v51 }
 0x1d2   :  { %v599_v56 = vadd.f32 %v565_v53, %v1799_v28  ;;  %v637_v53 = vadd.f32 %v621_v38, %v605_v52 }
 0x1d3   :  { %v724_v9 = vsel %vm2215_vm0, %v695_v43, 0.0  ;;  %v589_v49 = vpop.f32.mrf.mxu3 }
 0x1d4   :  { %v1887_v2 = vpop.f32.mrf.mxu0  ;;  %v1894_v8 = vpop.f32.mrf.mxu1  ;;  %v631_v10 = vadd.f32 %v615_v1, %v599_v56  ;;  %v607_v15 = vadd.f32 %v589_v49, %v1814_v37  ;;  %v623_v1 = vld [vmem:[%s2213_s1 + $0x78] sm:$0xff]  ;;  %vm653_vm3 = vcmp.gt.f32.partialorder %v637_v53, 0.0 }
 0x1d5   :  { %2240 = vst [vmem:[#allocation16_spill] sm:$0xff] %v1887_v2  ;;  %v596_v7 = vadd.f32 %v1840_v12, %v1887_v2  ;;  %v606_v14 = vadd.f32 %v586_v54, %v1894_v8 }
 0x1d6   :  { %v663_v34 = vmul.f32 0.2, %v631_v10  ;;  %vm647_vm14 = vcmp.gt.f32.partialorder %v631_v10, 0.0 }
 0x1d7   :  { %v628_v11 = vadd.f32 %v612_v4, %v596_v7  ;;  %725 = vadd.xlane.f32.xlu1 %v724_v9  ;;  %v638_v40 = vadd.f32 %v622_v21, %v606_v14  ;;  %v617_v7 = vld [vmem:[%s2213_s1 + $0x48] sm:$0xff]  ;;  %v669_v14 = vmul.f32 0.2, %v637_v53  ;;  %v639_v21 = vadd.f32 %v623_v1, %v607_v15  ;;  %s1419_s1 = smov -1e+30  }
 0x1d8   :  { %v679_v43 = vsel %vm647_vm14, %v631_v10, %v663_v34  ;;  %vm355_vm14 = vcmp.ge.s32.totalorder %v1555_v16, 0  ;;  %103 = sst [smem:[#allocation4]] %s1419_s1 }
 0x1d9   :  { %v660_v17 = vmul.f32 0.2, %v628_v11  ;;  %v568_v31 = vpop.f32.mrf.mxu2  ;;  %vm644_vm13 = vcmp.gt.f32.partialorder %v628_v11, 0.0  ;;  %v670_v54 = vmul.f32 0.2, %v638_v40  ;;  %vm654_vm2 = vcmp.gt.f32.partialorder %v638_v40, 0.0 }
 0x1da   :  { %v600_v12 = vadd.f32 %v568_v31, %v1806_v32  ;;  %v696_v10 = vmul.f32 %v1812_v35, %v679_v43  ;;  %v671_v38 = vmul.f32 0.2, %v639_v21  ;;  %vm655_vm7 = vcmp.gt.f32.partialorder %v639_v21, 0.0 }
 0x1db   :  { %v676_v36 = vsel %vm644_vm13, %v628_v11, %v660_v17  ;;  %vm351_vm13 = vcmp.ge.s32.totalorder %v1573_v20, 0 }
 0x1dc   :  { %v632_v42 = vadd.f32 %v616_v55, %v600_v12  ;;  %v693_v46 = vmul.f32 %v1812_v35, %v676_v36  ;;  %v686_v55 = vsel %vm654_vm2, %v638_v40, %v670_v54  ;;  %v727_v52 = vsel %vm2215_vm0, %v696_v10, 0.0 }
 0x1dd   :  { %v703_v34 = vmul.f32 %v1812_v35, %v686_v55  ;;  %v685_v36 = vsel %vm653_vm3, %v637_v53, %v669_v14  ;;  %vm352_vm2 = vcmp.ge.s32.totalorder %v1606_v27, 0  ;;  %vm347_vm3 = vcmp.ge.s32.totalorder %v1635_v41, 0 }
 0x1de   :  { %v664_v50 = vmul.f32 0.2, %v632_v42  ;;  %v718_v51 = vsel %vm2215_vm0, %v693_v46, 0.0  ;;  %vm648_vm15 = vcmp.gt.f32.partialorder %v632_v42, 0.0  ;;  %v702_v49 = vmul.f32 %v1812_v35, %v685_v36 }
 0x1df   :  { %719 = vadd.xlane.f32.xlu2 %v718_v51  ;;  %v687_v51 = vsel %vm655_vm7, %v639_v21, %v671_v38  ;;  %vm356_vm7 = vcmp.ge.s32.totalorder %v1564_v18, 0 }
 0x1e0   :  { %v680_v56 = vsel %vm648_vm15, %v632_v42, %v664_v50  ;;  %v748_v50 = vsel %vm2215_vm0, %v703_v34, 0.0  ;;  %v745_v43 = vsel %vm2215_vm0, %v702_v49, 0.0  ;;  %v704_v15 = vmul.f32 %v1812_v35, %v687_v51 }
 0x1e1   :  { %v571_v4 = vpop.f32.mrf.mxu2  ;;  %v697_v9 = vmul.f32 %v1812_v35, %v680_v56  ;;  %vm349_vm15 = vcmp.ge.s32.totalorder %v1645_v44, 0 }
 0x1e2   :  { %v601_v11 = vadd.f32 %v571_v4, %v1818_v45  ;;  %v751_v53 = vsel %vm2215_vm0, %v704_v15, 0.0 }
 0x1e3   :  { %v730_v17 = vsel %vm2215_vm0, %v697_v9, 0.0 }
 0x1e4   :  { %v633_v31 = vadd.f32 %v617_v7, %v601_v11  ;;  %731 = vadd.xlane.f32.xlu0 %v730_v17 }
 0x1e6   :  { %v665_v12 = vmul.f32 0.2, %v633_v31  ;;  %vm649_vm4 = vcmp.gt.f32.partialorder %v633_v31, 0.0 }
 0x1e7   :  { %728 = vadd.xlane.f32.xlu2 %v727_v52 }
 0x1e8   :  { %v681_v42 = vsel %vm649_vm4, %v633_v31, %v665_v12  ;;  %vm348_vm4 = vcmp.ge.s32.totalorder %v1543_v13, 0 }
 0x1e9   :  { %v698_v46 = vmul.f32 %v1812_v35, %v681_v42 }
 0x1eb   :  { %v733_v40 = vsel %vm2215_vm0, %v698_v46, 0.0  ;;  %vm358_vm0 = vcmp.ge.s32.totalorder %v1689_v62, 0 }
 0x1ec   :  { %749 = vadd.xlane.f32.xlu0 %v748_v50  ;;  %734 = vadd.xlane.f32.xlu1 %v733_v40 }
 0x1ef   :  { %746 = vadd.xlane.f32.xlu2 %v745_v43 }
 0x1f4   :  { %752 = vadd.xlane.f32.xlu1 %v751_v53 }
 0x217   :  { %v1931_v54 = vpop.xlane.xlu2 %707 }
 0x218   :  { %v754_v31 = vsel %vm2216_vm9, %v1931_v54, -1e+30  ;;  %vm359_vm9 = vcmp.ge.s32.totalorder %v1585_v23, 0 }
 0x219   :  { %v771_v34 = vsel %vm770_vm12, %v754_v31, -inf }
 0x22a   :  { %v1935_v1 = vpop.xlane.xlu2 %737 }
 0x232   :  { %v1933_v56 = vpop.xlane.xlu0 %710 }
 0x233   :  { %v755_v55 = vsel %vm2228_vm10, %v1933_v56, -1e+30  ;;  %vm360_vm10 = vcmp.ge.s32.totalorder %v1622_v33, 0 }
 0x234   :  { %v772_v42 = vsel %vm770_vm12, %v755_v55, -inf }
 0x23a   :  { %v1937_v4 = vpop.xlane.xlu1 %713  ;;  %v1939_v7 = vpop.xlane.xlu0 %740 }
 0x23b   :  { %v756_v46 = vsel %vm347_vm3, %v1937_v4, -1e+30  ;;  %v765_v3 = vsel %vm356_vm7, %v1939_v7, -1e+30 }
 0x23c   :  { %v773_v61 = vsel %vm770_vm12, %v756_v46, -inf }
 0x242   :  { %v1943_v11 = vpop.xlane.xlu1 %743  ;;  %v1945_v10 = vpop.xlane.xlu0 %722 }
 0x243   :  { %v1941_v9 = vpop.xlane.xlu2 %716  ;;  %v759_v12 = vsel %vm350_vm11, %v1945_v10, -1e+30 }
 0x244   :  { %v777_v49 = vsel %vm770_vm12, %v759_v12, -inf  ;;  %v757_v50 = vsel %vm348_vm4, %v1941_v9, -1e+30 }
 0x245   :  { %v778_v59 = vmax.f32 %v772_v42, %v777_v49 }
 0x24a   :  { %v1949_v14 = vpop.xlane.xlu1 %725 }
 0x24b   :  { %v760_v52 = vsel %vm351_vm13, %v1949_v14, -1e+30 }
 0x24c   :  { %v779_v51 = vsel %vm770_vm12, %v760_v52, -inf  ;;  %v764_v52 = vsel %vm355_vm14, %v1935_v1, -1e+30 }
 0x24d   :  { %v780_v60 = vmax.f32 %v773_v61, %v779_v51  ;;  %v766_v61 = vsel %vm357_vm6, %v1943_v11, -1e+30  ;;  %v787_v49 = vsel %vm770_vm12, %v764_v52, -inf }
 0x252   :  { %v1947_v35 = vpop.xlane.xlu2 %719 }
 0x253   :  { %v758_v36 = vsel %vm349_vm15, %v1947_v35, -1e+30 }
 0x254   :  { %v775_v53 = vsel %vm770_vm12, %v758_v36, -inf }
 0x255   :  { %v776_v57 = vmax.f32 %v771_v34, %v775_v53 }
 0x257   :  { %v1951_v17 = vpop.xlane.xlu0 %731 }
 0x258   :  { %v762_v43 = vsel %vm353_vm5, %v1951_v17, -1e+30 }
 0x259   :  { %v783_v29 = vsel %vm770_vm12, %v762_v43, -inf  ;;  %v788_v43 = vmax.f32 %v780_v60, %v787_v49 }
 0x25a   :  { %v1957_v21 = vpop.xlane.xlu2 %728  ;;  %v784_v46 = vmax.f32 %v776_v57, %v783_v29 }
 0x25b   :  { %v761_v38 = vsel %vm352_vm2, %v1957_v21, -1e+30 }
 0x25c   :  { %v781_v31 = vsel %vm770_vm12, %v761_v38, -inf  ;;  %v774_v38 = vsel %vm770_vm12, %v757_v50, -inf  ;;  %v789_v50 = vsel %vm770_vm12, %v765_v3, -inf }
 0x25d   :  { %v782_v19 = vmax.f32 %v774_v38, %v781_v31 }
 0x25f   :  { %v1995_v40 = vpop.xlane.xlu1 %734  ;;  %v2008_v55 = vpop.xlane.xlu0 %749  ;;  %v790_v31 = vmax.f32 %v782_v19, %v789_v50 }
 0x260   :  { %v763_v15 = vsel %vm354_vm8, %v1995_v40, -1e+30  ;;  %v768_v58 = vsel %vm359_vm9, %v2008_v55, -1e+30 }
 0x261   :  { %v785_v12 = vsel %vm770_vm12, %v763_v15, -inf  ;;  %v795_v34 = vsel %vm770_vm12, %v768_v58, -inf }
 0x262   :  { %v2018_v36 = vpop.xlane.xlu2 %746  ;;  %v786_v2 = vmax.f32 %v778_v59, %v785_v12  ;;  %v791_v12 = vsel %vm770_vm12, %v766_v61, -inf  ;;  %v796_v22 = vmax.f32 %v788_v43, %v795_v34 }
 0x263   :  { %v767_v15 = vsel %vm358_vm0, %v2018_v36, -1e+30 }
 0x264   :  { %v793_v42 = vsel %vm770_vm12, %v767_v15, -inf  ;;  %v792_v15 = vmax.f32 %v784_v46, %v791_v12 }
 0x265   :  { %v794_v53 = vmax.f32 %v786_v2, %v793_v42 }
 0x267   :  { %v753_v51 = vpop.xlane.xlu1 %752  ;;  %v799_v57 = vmax.f32 %v792_v15, %v794_v53 }
 0x268   :  { %v769_v59 = vsel %vm360_vm10, %v753_v51, -1e+30 }
 0x269   :  { %v797_v38 = vsel %vm770_vm12, %v769_v59, -inf }
 0x26a   :  { %v798_v29 = vmax.f32 %v790_v31, %v797_v38 }
 0x26c   :  { %v800_v52 = vmax.f32 %v796_v22, %v798_v29 }
 0x26e   :  { %v801_v26 = vmax.f32 %v799_v57, %v800_v52 }
 0x270   :  { %802 = vmax.xlane.f32.xlu2 %v801_v26 }
 0x2e3   :  { %v803_v3 = vpop.xlane.xlu2 %802 }
 0x2e4   :  { %v804_v60 = vrot.slane %v803_v3, 4 }
 0x2e6   :  { %v805_v58 = vmax.f32 %v803_v3, %v804_v60 }
 0x2e8   :  { %v806_v2 = vrot.slane %v805_v58, 2 }
 0x2ea   :  { %v807_v42 = vmax.f32 %v805_v58, %v806_v2 }
 0x2ec   :  { %v808_v49 = vrot.slane %v807_v42, 1 }
 0x2ee   :  { %v809_v19 = vmax.f32 %v807_v42, %v808_v49 }
 0x2f0   :  { %1314 = vpush %v809_v19 }
 0x321   :  { %s1315_s16 = spop %1314 }
 0x322   :  { %s812_s0 = smax.f32 %s1419_s1, %s1315_s16  ;;  %p813_p0 = scmp.gt.f32.partialorder %s1315_s16, -1e+30 }
 0x323   :  { %s817_s17 = ssub.f32 (%p813_p0), -1e+30, %s812_s0  ;;  %v821_v26 = vld [vmem:[#allocation5] sm:$0xff] (%p813_p0)  ;;  %v822_v46 = vld [vmem:[#allocation5 + $0x8] sm:$0xff] (%p813_p0) }
 0x324   :  { %816 = sbr.rel (!%p813_p0) target bundleno = 819 (0x333), region = 61  ;;  %829 = sst [smem:[#allocation4]] (%p813_p0), %s812_s0 }
 0x325   :  { %v818_v61 = vstv (%p813_p0), %s817_s17 }
 0x326   :  { %v819_v22 = vmul.f32 (%p813_p0), 1.442695, %v818_v61 }
 0x328   :  { %1329 = vpow2.f32 (%p813_p0), %v819_v22 }
 0x32e   :  { %v1330_v50 = vpop.eup %1329 }
 0x32f   :  { %v823_v34 = vmul.f32 %v1330_v50, %v821_v26  ;;  %v824_v43 = vmul.f32 %v1330_v50, %v822_v46 }
 0x331   :  { %826 = vst.msk [vmem:[#allocation5] sm:$0xff] %vm104_vm1, %v823_v34 }
 0x332   :  { %827 = vst.msk [vmem:[#allocation5 + $0x8] sm:$0xff] %vm104_vm1, %v824_v43 }
 0x333 PF:  { %v2241_v53 = vmov 0   ;;  %v2043_v59 = vstv %s812_s0  ;;  %s1420_s18 = smov 32  }
 0x334   :  { %1331 = vset.pattern.permute.xlu0 %v2241_v53  ;;  %1337 = vset.pattern.permute.xlu1 %v2241_v53  ;;  %v846_v31 = vsub.f32 %v753_v51, %v2043_v59  ;;  %v845_v12 = vsub.f32 %v2008_v55, %v2043_v59  ;;  %v843_v38 = vsub.f32 %v1943_v11, %v2043_v59 }
 0x335   :  { %1338 = vset.pattern.permute.xlu2 %v2241_v53  ;;  %v844_v15 = vsub.f32 %v2018_v36, %v2043_v59  ;;  %v842_v51 = vsub.f32 %v1939_v7, %v2043_v59  ;;  %v841_v55 = vsub.f32 %v1935_v1, %v2043_v59  ;;  %v840_v33 = vsub.f32 %v1995_v40, %v2043_v59 }
 0x336   :  { %v877_v29 = vmul.f32 1.442695, %v846_v31  ;;  %v875_v57 = vmul.f32 1.442695, %v845_v12  ;;  %v871_v52 = vmul.f32 1.442695, %v843_v38  ;;  %v839_v23 = vsub.f32 %v1951_v17, %v2043_v59 }
 0x337   :  { %v873_v3 = vmul.f32 1.442695, %v844_v15  ;;  %v869_v2 = vmul.f32 1.442695, %v842_v51  ;;  %v867_v19 = vmul.f32 1.442695, %v841_v55  ;;  %v838_v40 = vsub.f32 %v1957_v21, %v2043_v59 }
 0x338   :  { %1380 = vpow2.f32 %v877_v29  ;;  %v865_v25 = vmul.f32 1.442695, %v840_v33  ;;  %v863_v26 = vmul.f32 1.442695, %v839_v23  ;;  %v837_v62 = vsub.f32 %v1949_v14, %v2043_v59 }
 0x339   :  { %1382 = vpow2.f32 %v875_v57  ;;  %v861_v53 = vmul.f32 1.442695, %v838_v40  ;;  %v836_v18 = vsub.f32 %v1945_v10, %v2043_v59  ;;  %v835_v16 = vsub.f32 %v1947_v35, %v2043_v59 }
 0x33a   :  { %1384 = vpow2.f32 %v871_v52  ;;  %v859_v31 = vmul.f32 1.442695, %v837_v62  ;;  %v834_v24 = vsub.f32 %v1941_v9, %v2043_v59  ;;  %v833_v0 = vsub.f32 %v1937_v4, %v2043_v59 }
 0x33b   :  { %1386 = vpow2.f32 %v873_v3  ;;  %v857_v29 = vmul.f32 1.442695, %v836_v18  ;;  %v855_v57 = vmul.f32 1.442695, %v835_v16  ;;  %v832_v27 = vsub.f32 %v1933_v56, %v2043_v59 }
 0x33c   :  { %1388 = vpow2.f32 %v869_v2  ;;  %v853_v55 = vmul.f32 1.442695, %v834_v24  ;;  %v831_v20 = vsub.f32 %v1931_v54, %v2043_v59 }
 0x33d   :  { %1390 = vpow2.f32 %v867_v19  ;;  %v849_v2 = vmul.f32 1.442695, %v832_v27 }
 0x33e   :  { %v1381_v60 = vpop.eup %1380  ;;  %1392 = vpow2.f32 %v865_v25 }
 0x33f   :  { %v1383_v58 = vpop.eup %1382  ;;  %v894_v11 = vsel %vm360_vm10, %v1381_v60, 0.0  ;;  %1394 = vpow2.f32 %v863_v26  ;;  %v851_v60 = vmul.f32 1.442695, %v833_v0 }
 0x340   :  { %972 = vperm.xlu0 %1331, %v894_v11   ;;  %v893_v36 = vsel %vm359_vm9, %v1383_v58, 0.0  ;;  %v1385_v42 = vpop.eup %1384  ;;  %1396 = vpow2.f32 %v861_v53 }
 0x341   :  { %v1332_v49 = vpack.i.bf16 %v893_v36, %v894_v11  ;;  %v891_v7 = vsel %vm357_vm6, %v1385_v42, 0.0  ;;  %v1387_v61 = vpop.eup %1386  ;;  %1398 = vpow2.f32 %v859_v31  ;;  %v847_v42 = vmul.f32 1.442695, %v831_v20 }
 0x342   :  { %957 = vperm.xlu2 %1338, %v891_v7   ;;  %v892_v1 = vsel %vm358_vm0, %v1387_v61, 0.0  ;;  %v1389_v46 = vpop.eup %1388  ;;  %1400 = vpow2.f32 %v857_v29  ;;  %vm2242_vm0 = vcmp.ge.s32.totalorder %v1517_v6, 0  ;;  %vm2244_vm6 = vcmask 261120  }
 0x343   :  { %1333 = vrot.lane.b32.xlu1 %v1332_v49, %s1420_s18  ;;  %v1339_v22 = vpack.i.bf16 %v891_v7, %v892_v1  ;;  %v1391_v50 = vpop.eup %1390  ;;  %v890_v34 = vsel %vm356_vm7, %v1389_v46, 0.0  ;;  %1402 = vpow2.f32 %v855_v57  ;;  %vm2246_vm9 = vmmov %vm2244_vm6 }
 0x344   :  { %v889_v17 = vsel %vm355_vm14, %v1391_v50, 0.0  ;;  %v1393_v12 = vpop.eup %1392  ;;  %1404 = vpow2.f32 %v853_v55  ;;  %vm2247_vm10 = vmmov %vm2244_vm6 }
 0x345   :  { %v1344_v43 = vpack.i.bf16 %v889_v17, %v890_v34  ;;  %v1395_v38 = vpop.eup %1394  ;;  %v888_v21 = vsel %vm354_vm8, %v1393_v12, 0.0  ;;  %1406 = vpow2.f32 %v851_v60  ;;  %vm2245_vm8 = vmmov %vm2244_vm6 }
 0x346   :  { %v887_v14 = vsel %vm353_vm5, %v1395_v38, 0.0  ;;  %v1397_v52 = vpop.eup %1396  ;;  %1408 = vpow2.f32 %v849_v2  ;;  %vm2243_vm5 = vcmp.ge.s32.totalorder %v1511_v5, 0  ;;  %vm2249_vm12 = vmmov %vm2244_vm6 }
 0x347   :  { %v1349_v15 = vpack.i.bf16 %v887_v14, %v888_v21  ;;  %v1399_v3 = vpop.eup %1398  ;;  %v886_v10 = vsel %vm352_vm2, %v1397_v52, 0.0  ;;  %1410 = vpow2.f32 %v847_v42  ;;  %vm2251_vm14 = vmmov %vm2244_vm6 }
 0x348   :  { %967 = vperm.xlu0 %1331, %v893_v36   ;;  %v885_v35 = vsel %vm351_vm13, %v1399_v3, 0.0  ;;  %v1401_v58 = vpop.eup %1400  ;;  %vm2250_vm13 = vmmov %vm2244_vm6 }
 0x349   :  { %v1354_v51 = vpack.i.bf16 %v885_v35, %v886_v10  ;;  %v1403_v11 = vpop.eup %1402  ;;  %v884_v9 = vsel %vm350_vm11, %v1401_v58, 0.0  ;;  %vm2248_vm11 = vmmov %vm2244_vm6 }
 0x34a   :  { %1340 = vrot.lane.b32.xlu2 %v1339_v22, %s1420_s18  ;;  %v883_v4 = vsel %vm349_vm15, %v1403_v11, 0.0  ;;  %v1405_v49 = vpop.eup %1404  ;;  %vm2252_vm15 = vmmov %vm2244_vm6 }
 0x34b   :  { %962 = vperm.xlu1 %1337, %v892_v1   ;;  %v1359_v36 = vpack.i.bf16 %v883_v4, %v884_v9  ;;  %v1407_v19 = vpop.eup %1406  ;;  %v882_v47 = vsel %vm348_vm4, %v1405_v49, 0.0  ;;  %vm2254_vm2 = vmmov %vm2244_vm6 }
 0x34c   :  { %v881_v54 = vsel %vm347_vm3, %v1407_v19, 0.0  ;;  %v1409_v44 = vpop.eup %1408  ;;  %vm2256_vm3 = vmmov %vm2254_vm2 }
 0x34d   :  { %v1364_v56 = vpack.i.bf16 %v881_v54, %v882_v47  ;;  %v1411_v59 = vpop.eup %1410  ;;  %v880_v7 = vsel %vm2242_vm0, %v1409_v44, 0.0  ;;  %vm2258_vm4 = vmmov %vm2254_vm2 }
 0x34e   :  { %v879_v61 = vsel %vm2243_vm5, %v1411_v59, 0.0  ;;  %v2259_v59 = vld [vmem:[#allocation15_spill] sm:$0xff]  ;;  %vm2260_vm7 = vmmov %vm2254_vm2 }
 0x34f   :  { %v1369_v33 = vpack.i.bf16 %v879_v61, %v880_v7  ;;  %vm2262_vm0 = vmmov %vm2254_vm2 }
 0x350   :  { %952 = vperm.xlu0 %1331, %v890_v34   ;;  %vm2264_vm5 = vmmov %vm2262_vm0 }
 0x352   :  { %1345 = vrot.lane.b32.xlu2 %v1344_v43, %s1420_s18 }
 0x353   :  { %947 = vperm.xlu1 %1337, %v889_v17  }
 0x358   :  { %942 = vperm.xlu0 %1331, %v888_v21  }
 0x35a   :  { %1350 = vrot.lane.b32.xlu2 %v1349_v15, %s1420_s18 }
 0x35b   :  { %937 = vperm.xlu1 %1337, %v887_v14  }
 0x360   :  { %932 = vperm.xlu0 %1331, %v886_v10  }
 0x362   :  { %1355 = vrot.lane.b32.xlu2 %v1354_v51, %s1420_s18 }
 0x363   :  { %927 = vperm.xlu1 %1337, %v885_v35  }
 0x368   :  { %922 = vperm.xlu0 %1331, %v884_v9  }
 0x36a   :  { %1360 = vrot.lane.b32.xlu2 %v1359_v36, %s1420_s18 }
 0x36b   :  { %917 = vperm.xlu1 %1337, %v883_v4   ;;  %v2255_v4 = vld [vmem:[#allocation10_spill] sm:$0xff] }
 0x370   :  { %912 = vperm.xlu0 %1331, %v882_v47  }
 0x372   :  { %1365 = vrot.lane.b32.xlu2 %v1364_v56, %s1420_s18 }
 0x373   :  { %907 = vperm.xlu1 %1337, %v881_v54  }
 0x378   :  { %902 = vperm.xlu0 %1331, %v880_v7  }
 0x37a   :  { %1370 = vrot.lane.b32.xlu2 %v1369_v33, %s1420_s18 }
 0x37b   :  { %897 = vperm.xlu1 %1337, %v879_v61  }
 0x39c   :  { %v958_v13 = vpop.permute.xlu2 %957 }
 0x39d   :  { %v987_v62 = vmul.f32 %v958_v13, %v1847_v30 }
 0x3a4   :  { %v1341_v41 = vpop.permute.xlu2 %1340 }
 0x3a5   :  { %v1343_v17 = vunpack.i.h.bf16 %v1341_v41  ;;  %v1342_v43 = vunpack.i.l.bf16 %v1341_v41  ;;  %v2261_v41 = vld [vmem:[#allocation14_spill] sm:$0xff] }
 0x3a7   :  { %v1051_v38 = vsel %vm2247_vm10, %v987_v62, %v1343_v17 }
 0x3ac   :  { %v1346_v1 = vpop.permute.xlu2 %1345 }
 0x3ad   :  { %v1347_v12 = vunpack.i.l.bf16 %v1346_v1  ;;  %v1348_v30 = vunpack.i.h.bf16 %v1346_v1 }
 0x3b2   :  { %v973_v23 = vpop.permute.xlu0 %972 }
 0x3b3   :  { %v990_v25 = vmul.f32 %v973_v23, %v1814_v37 }
 0x3b4   :  { %v1351_v31 = vpop.permute.xlu2 %1350 }
 0x3b5   :  { %v1334_v22 = vpop.permute.xlu1 %1333  ;;  %v1352_v29 = vunpack.i.l.bf16 %v1351_v31  ;;  %v1353_v10 = vunpack.i.h.bf16 %v1351_v31  ;;  %v2268_v31 = vld [vmem:[#allocation7_spill] sm:$0xff] }
 0x3b6   :  { %v1335_v26 = vunpack.i.l.bf16 %v1334_v22  ;;  %v1336_v50 = vunpack.i.h.bf16 %v1334_v22 }
 0x3b8   :  { %v1054_v46 = vsel %vm2244_vm6, %v990_v25, %v1335_v26  ;;  %vm2266_vm6 = vmmov %vm2262_vm0 }
 0x3b9   :  { %1057 = vmatpush.msra.mxu3 %v1054_v46  ;;  %v2263_v46 = vld [vmem:[#allocation13_spill] sm:$0xff] }
 0x3ba   :  { %v968_v6 = vpop.permute.xlu0 %967 }
 0x3bb   :  { %v989_v5 = vmul.f32 %v968_v6, %v1894_v8 }
 0x3bc   :  { %v1356_v15 = vpop.permute.xlu2 %1355 }
 0x3bd   :  { %v963_v40 = vpop.permute.xlu1 %962  ;;  %v1053_v34 = vsel %vm2245_vm8, %v989_v5, %v1336_v50  ;;  %v1358_v11 = vunpack.i.h.bf16 %v1356_v15 }
 0x3be   :  { %v988_v53 = vmul.f32 %v963_v40, %v1876_v39  ;;  %1058 = vmatpush.msra.mxu3 %v1053_v34  ;;  %v2265_v34 = vld [vmem:[#allocation12_spill] sm:$0xff] }
 0x3c0   :  { %v1052_v37 = vsel %vm2246_vm9, %v988_v53, %v1342_v43  ;;  %v1421_v43 = vmov 1.0   ;;  %v2267_v53 = vld [vmem:[#allocation8_spill] sm:$0xff] }
 0x3c1   :  { %1059 = vmatpush.msra.mxu3 %v1052_v37  ;;  %vm2269_vm8 = vcmp.eq.s32.totalorder %v2267_v53, %v2268_v31  ;;  %v2270_v37 = vld [vmem:[#allocation9_spill] sm:$0xff] }
 0x3c2   :  { %v953_v18 = vpop.permute.xlu0 %952  ;;  %vm2271_vm9 = vcmp.eq.s32.totalorder %v2267_v53, %v2270_v37 }
 0x3c3   :  { %1060 = vmatpush.msra.mxu3 %v1051_v38  ;;  %v986_v8 = vmul.f32 %v953_v18, %v1831_v63  ;;  %v1055_v38 = vld [vmem:[#allocation5] sm:$0xff] }
 0x3c4   :  { %v1361_v51 = vpop.permute.xlu2 %1360 }
 0x3c5   :  { %v948_v21 = vpop.permute.xlu1 %947  ;;  %v1050_v16 = vsel %vm2248_vm11, %v986_v8, %v1347_v12  ;;  %v1363_v19 = vunpack.i.h.bf16 %v1361_v51  ;;  %v1422_v12 = vmov 32  }
 0x3c6   :  { %v985_v14 = vmul.f32 %v948_v21, %v1820_v48  ;;  %1061 = vmatpush.msra.mxu3 %v1050_v16  ;;  %v1357_v48 = vunpack.i.l.bf16 %v1356_v15  ;;  %1375 = vset.pattern.permute.xlu1 %v1422_v12  ;;  %v1056_v21 = vld [vmem:[#allocation5 + $0x8] sm:$0xff] }
 0x3c7   :  { %1374 = vset.pattern.permute.xlu0 %v1422_v12 }
 0x3c8   :  { %v1049_v39 = vsel %vm2249_vm12, %v985_v14, %v1348_v30 }
 0x3c9   :  { %1062 = vmatpush.msra.mxu3 %v1049_v39 }
 0x3ca   :  { %v943_v57 = vpop.permute.xlu0 %942 }
 0x3cb   :  { %v984_v52 = vmul.f32 %v943_v57, %v1818_v45  ;;  %v2253_v45 = vld [vmem:[#allocation11_spill] sm:$0xff] }
 0x3cc   :  { %v1366_v2 = vpop.permute.xlu2 %1365 }
 0x3cd   :  { %v938_v3 = vpop.permute.xlu1 %937  ;;  %v1048_v24 = vsel %vm2250_vm13, %v984_v52, %v1352_v29  ;;  %v1367_v56 = vunpack.i.l.bf16 %v1366_v2  ;;  %v1368_v13 = vunpack.i.h.bf16 %v1366_v2  ;;  %v1169_v52 = vld [vmem:[%s2202_s9 + $0x18] sm:$0xff] }
 0x3ce   :  { %v983_v63 = vmul.f32 %v938_v3, %v1806_v32  ;;  %1063 = vmatpush.msra.mxu3 %v1048_v24  ;;  %v1362_v32 = vunpack.i.l.bf16 %v1361_v51  ;;  %v1168_v3 = vld [vmem:[%s2202_s9 + $0x10] sm:$0xff]  ;;  %1189 = vmatpush.msra.mxu0 %v1169_v52 }
 0x3d0   :  { %v1047_v0 = vsel %vm2251_vm14, %v983_v63, %v1353_v10  ;;  %v1167_v10 = vld [vmem:[%s2202_s9 + $0x8] sm:$0xff]  ;;  %1190 = vmatpush.msra.mxu0 %v1168_v3 }
 0x3d1   :  { %1064 = vmatpush.msra.mxu3 %v1047_v0 }
 0x3d2   :  { %v933_v35 = vpop.permute.xlu0 %932  ;;  %1191 = vmatpush.msra.mxu0 %v1167_v10 }
 0x3d3   :  { %v982_v55 = vmul.f32 %v933_v35, %v1799_v28  ;;  %v2257_v28 = vld [vmem:[#allocation16_spill] sm:$0xff] }
 0x3d4   :  { %v1371_v1 = vpop.permute.xlu2 %1370 }
 0x3d5   :  { %v928_v60 = vpop.permute.xlu1 %927  ;;  %v1046_v58 = vsel %vm2252_vm15, %v982_v55, %v1357_v48  ;;  %v1372_v25 = vunpack.i.l.bf16 %v1371_v1  ;;  %v1373_v40 = vunpack.i.h.bf16 %v1371_v1  ;;  %v1201_v1 = vld [vmem:[%s2204_s11 + $0x18] sm:$0xff] }
 0x3d6   :  { %v981_v27 = vmul.f32 %v928_v60, %v2253_v45  ;;  %1065 = vmatpush.msra.mxu3 %v1046_v58 }
 0x3d8   :  { %v1045_v9 = vsel %vm2254_vm2, %v981_v27, %v1358_v11 }
 0x3d9   :  { %1066 = vmatpush.msra.mxu3 %v1045_v9 }
 0x3da   :  { %v923_v20 = vpop.permute.xlu0 %922 }
 0x3db   :  { %v980_v36 = vmul.f32 %v923_v20, %v2255_v4 }
 0x3dd   :  { %v918_v42 = vpop.permute.xlu1 %917  ;;  %v1044_v49 = vsel %vm2256_vm3, %v980_v36, %v1362_v32  ;;  %vm2272_vm3 = vcmask 130048  }
 0x3de   :  { %v979_v47 = vmul.f32 %v918_v42, %v2257_v28  ;;  %1067 = vmatpush.msra.mxu3 %v1044_v49  ;;  %v1376_v42 = vld [vmem:[%s2212_s7 + $0x1] ss:$0 sm:$0xff] }
 0x3e0   :  { %v1043_v54 = vsel %vm2258_vm4, %v979_v47, %v1363_v19  ;;  %vm2273_vm4 = vmmov %vm2262_vm0 }
 0x3e1   :  { %1068 = vmatpush.msra.mxu3 %v1043_v54 }
 0x3e2   :  { %v913_v44 = vpop.permute.xlu0 %912 }
 0x3e3   :  { %v978_v7 = vmul.f32 %v913_v44, %v2259_v59 }
 0x3e5   :  { %v908_v61 = vpop.permute.xlu1 %907  ;;  %v1042_v33 = vsel %vm2260_vm7, %v978_v7, %v1367_v56  ;;  %v1377_v56 = vld [vmem:[%s2212_s7 + $0x2] ss:$0 sm:$0xff]  ;;  %vm2274_vm7 = vmmov %vm2262_vm0 }
 0x3e6   :  { %v977_v23 = vmul.f32 %v908_v61, %v2261_v41  ;;  %1069 = vmatpush.msra.mxu3 %v1042_v33  ;;  %v1142_v41 = vld [vmem:[%s2201_s8] sm:$0x3] }
 0x3e8   :  { %v1041_v22 = vsel %vm2262_vm0, %v977_v23, %v1368_v13  ;;  %v1166_v23 = vld [vmem:[%s2202_s9] sm:$0xff]  ;;  %vm1229_vm0 = vcmask 1024  }
 0x3e9   :  { %1070 = vmatpush.msra.mxu3 %v1041_v22  ;;  %1192 = vmatpush.msra.mxu0 %v1166_v23  ;;  %v1200_v22 = vld [vmem:[%s2204_s11 + $0x10] sm:$0xff] }
 0x3ea   :  { %v903_v26 = vpop.permute.xlu0 %902 }
 0x3eb   :  { %v976_v6 = vmul.f32 %v903_v26, %v2263_v46  ;;  %1221 = vmatpush.msrb.mxu0 %v1201_v1  ;;  %v1199_v26 = vld [vmem:[%s2204_s11 + $0x8] sm:$0xff]  ;;  %v1198_v46 = vld [vmem:[%s2204_s11] sm:$0xff] }
 0x3ed   :  { %v898_v50 = vpop.permute.xlu1 %897  ;;  %v1040_v5 = vsel %vm2264_vm5, %v976_v6, %v1372_v25  ;;  %1222 = vmatpush.msrb.mxu0 %v1200_v22  ;;  %v1378_v6 = vld [vmem:[%s2203_s10] ss:$0 sm:$0xff] }
 0x3ee   :  { %v975_v62 = vmul.f32 %v898_v50, %v2265_v34  ;;  %1071 = vmatpush.msra.mxu3 %v1040_v5  ;;  %v1379_v34 = vld [vmem:[#allocation6] ss:$0 sm:$0xff] }
 0x3ef   :  { %1223 = vmatpush.msrb.mxu0 %v1199_v26 }
 0x3f0   :  { %v1039_v17 = vsel %vm2266_vm6, %v975_v62, %v1373_v40 }
 0x3f1   :  { %1072 = vmatpush.msra.mxu3 %v1039_v17  ;;  %1224 = vmatpush.msrb.mxu0 %v1198_v46 }
 0x3f2   :  { %1303 = vmatmul.msk.f32.vlgmr.msra.gmra.mxu3 %vm2269_vm8, %v1421_v43 }
 0x3fa   :  { %1304 = vmatmul.msk.f32.gmra.mxu3 %vm2271_vm9, %v1421_v43 }
 0x475   :  { %v1074_v18 = vpop.f32.mrf.mxu3 }
 0x476   :  { %v1080_v8 = vadd.f32 %v1074_v18, %v1055_v38 }
 0x478   :  { %1083 = vst.msk [vmem:[#allocation5] sm:$0xff] %vm104_vm1, %v1080_v8 }
 0x47d   :  { %v1077_v16 = vpop.f32.mrf.mxu3 }
 0x47e   :  { %v1081_v30 = vadd.f32 %v1077_v16, %v1056_v21 }
 0x47f   :  { %v1088_v14 = vld [vmem:[#allocation5] sm:$0xff] }
 0x480   :  { %1084 = vst.msk [vmem:[#allocation5 + $0x8] sm:$0xff] %vm104_vm1, %v1081_v30  ;;  %v1092_v39 = vmax.f32 %v1088_v14, 1e-20 }
 0x482   :  { %1096 = vperm.xlu1 %1375, %v1092_v39  }
 0x487   :  { %v1089_v15 = vld [vmem:[#allocation5 + $0x8] sm:$0xff] }
 0x488   :  { %v1093_v29 = vmax.f32 %v1089_v15, 1e-20 }
 0x48a   :  { %1101 = vperm.xlu0 %1374, %v1093_v29  }
 0x4f4   :  { %v1097_v57 = vpop.permute.xlu1 %1096 }
 0x4f5   :  { %1412 = vrcp.f32 %v1097_v57  ;;  %v1115_v51 = vand.u32 2147483648, %v1097_v57  ;;  %vm1109_vm10 = vweird.f32 %v1097_v57  ;;  %v1113_v60 = vand.u32 2147483647, %v1097_v57 }
 0x4f7   :  { %v1116_v27 = vor.u32 1.1754944e-38, %v1115_v51  ;;  %vm1114_vm12 = vcmp.eq.f32.partialorder %v1113_v60, 8.507059e+37 }
 0x4fb   :  { %v1413_v24 = vpop.eup %1412 }
 0x4fc   :  { %v1105_v63 = vmul.f32 %v1413_v24, %v1097_v57  ;;  %v1102_v0 = vpop.permute.xlu0 %1101  ;;  %vm1110_vm1 = vweird.f32 %v1413_v24 }
 0x4fd   :  { %1414 = vrcp.f32 %v1102_v0  ;;  %vm1111_vm11 = vmor %vm1109_vm10, %vm1110_vm1  ;;  %v1130_v32 = vand.u32 2147483648, %v1102_v0  ;;  %v1128_v36 = vand.u32 2147483647, %v1102_v0  ;;  %vm1124_vm14 = vweird.f32 %v1102_v0 }
 0x4fe   :  { %v1106_v48 = vsub.f32 1.0, %v1105_v63 }
 0x4ff   :  { %v1131_v19 = vor.u32 1.1754944e-38, %v1130_v32  ;;  %vm1129_vm2 = vcmp.eq.f32.partialorder %v1128_v36, 8.507059e+37 }
 0x500   :  { %v1107_v35 = vmul.f32 %v1413_v24, %v1106_v48 }
 0x502   :  { %v1108_v55 = vadd.f32 %v1413_v24, %v1107_v35 }
 0x503   :  { %v1415_v58 = vpop.eup %1414 }
 0x504   :  { %v1112_v11 = vsel %vm1111_vm11, %v1413_v24, %v1108_v55  ;;  %v1120_v45 = vmul.f32 %v1415_v58, %v1102_v0  ;;  %vm1125_vm13 = vweird.f32 %v1415_v58 }
 0x505   :  { %v1117_v20 = vsel %vm1114_vm12, %v1116_v27, %v1112_v11  ;;  %vm1126_vm15 = vmor %vm1124_vm14, %vm1125_vm13 }
 0x506   :  { %v1121_v9 = vsub.f32 1.0, %v1120_v45  ;;  %v1118_v49 = vmul.f32 %v1117_v20, %v1088_v14 }
 0x508   :  { %v1122_v4 = vmul.f32 %v1415_v58, %v1121_v9  ;;  %v1135_v44 = vmul.f32 %v1376_v42, %v1118_v49 }
 0x50a   :  { %v1123_v2 = vadd.f32 %v1415_v58, %v1122_v4  ;;  %v1138_v61 = vadd.f32 %v1377_v56, %v1135_v44 }
 0x50c   :  { %v1127_v28 = vsel %vm1126_vm15, %v1415_v58, %v1123_v2  ;;  %v1140_v13 = vmax.f32 %v1138_v61, 0.0 }
 0x50d   :  { %v1132_v47 = vsel %vm1129_vm2, %v1131_v19, %v1127_v28 }
 0x50e   :  { %v1133_v54 = vmul.f32 %v1132_v47, %v1089_v15 }
 0x510   :  { %v1136_v59 = vmul.f32 %v1376_v42, %v1133_v54 }
 0x512   :  { %v1139_v7 = vadd.f32 %v1377_v56, %v1136_v59 }
 0x514   :  { %v1141_v33 = vmax.f32 %v1139_v7, 0.0 }
 0x516   :  { %1160 = vmatpush.msrb.mxu3 %v1141_v33 }
 0x518   :  { %1161 = vmatpush.msrb.mxu3 %v1140_v13 }
 0x519   :  { %1305 = vmatmul.msk.f32.vlgmr.msrb.gmra.mxu3 %vm2272_vm3, %v1142_v41 }
 0x59c   :  { %v1163_v25 = vpop.f32.mrf.mxu3 }
 0x59d   :  { %1306 = vmatmul.msk.f32.vlgmr.msra.gmra.mxu0 %vm2273_vm4, %v1163_v25 }
 0x61a   :  { %v1194_v50 = vpop.f32.mrf.mxu0 }
 0x61b   :  { %v1195_v5 = vadd.f32 %v1378_v6, %v1194_v50 }
 0x61d   :  { %v1197_v40 = vmax.f32 %v1195_v5, 0.0 }
 0x61f   :  { %1307 = vmatmul.msk.f32.vlgmr.msrb.gmra.mxu0 %vm2274_vm7, %v1197_v40 }
 0x69c   :  { %v1226_v62 = vpop.f32.mrf.mxu0 }
 0x69d   :  { %v1227_v17 = vadd.f32 %v1379_v34, %v1226_v62 }
 0x69f   :  { %1230 = vst.msk [vmem:[%s2206_s13] sm:$0x3] %vm1229_vm0, %v1227_v17 }

</bundles_post_ra>
